<compile_context>
chip_gen: v6e
topology: v6e:2x2x1
jax: 0.10.0
libtpu: 0.0.40
codegen_flags: <defaults>
</compile_context>

<pallas_src>
import jax
import jax.numpy as jnp
from jax.experimental import pallas as pl
from jax.experimental.pallas import tpu as pltpu


# Stride-2 / k=4 / pad=1 geometry: kernel tap a (0..3) reads input row
# 2*i - 1 + a = 2*(i + q_a) + p_a  ->  parity p_a, coarse offset q_a.
_TAP_PARITY = (1, 0, 1, 0)   # p_a
_TAP_START = (0, 1, 1, 2)    # 1 + q_a (start into the zero-padded coarse grid)


def _make_fused_kernel(H2, W2, C1, C2):
    """Fused two-layer PiNet forward for one image (one grid step)."""
    M2 = H2 * W2

    def kernel(p1_ref, w1_ref, w2_ref, o_ref, pfeat_ref):
        # ---- layer 1: one concatenated matmul + PiNet product fusion ------
        p1 = p1_ref[0]                                       # [4*M2, K1]
        h1 = jnp.dot(p1, w1_ref[...], preferred_element_type=jnp.float32)
        a1 = h1[:, :C1]
        feat = a1 * h1[:, C1:] + a1                          # [4*M2, C1]

        # Scatter into the zero-padded, parity-ordered feature buffer:
        #   pfeat[ph, pw, 1 + hc, 1 + wc, c] = layer1(2*hc + ph, 2*wc + pw, c)
        pfeat_ref[...] = jnp.zeros(pfeat_ref.shape, pfeat_ref.dtype)
        pfeat_ref[:, :, 1:H2 + 1, 1:W2 + 1, :] = feat.reshape(2, 2, H2, W2, C1)

        # ---- layer 2: 16 unit-stride tap matmuls, f32 accumulation --------
        acc = jnp.zeros((M2, 2 * C2), jnp.float32)
        for a in range(4):
            for b in range(4):
                s = pfeat_ref[_TAP_PARITY[a], _TAP_PARITY[b],
                              _TAP_START[a]:_TAP_START[a] + H2,
                              _TAP_START[b]:_TAP_START[b] + W2, :]
                acc = acc + jnp.dot(s.reshape(M2, C1), w2_ref[a * 4 + b],
                                    preferred_element_type=jnp.float32)
        a2 = acc[:, :C2]
        o_ref[0] = (a2 * acc[:, C2:] + a2).astype(o_ref.dtype)

    return kernel


@jax.jit
def pinet_shallow_two_layer_forward(x, w1a, w1b, w2a, w2b):
    """x: [B, 3, H, W] (NCHW); weights in torch [O, I, kh, kw] layout."""
    B, Cin, H, W = x.shape
    C1 = w1a.shape[0]              # 64
    C2 = w2a.shape[0]              # 256
    kh = kw = 4
    assert H % 4 == 0 and W % 4 == 0, (H, W)
    H1, W1 = H // 2, W // 2        # layer-1 output spatial
    H2, W2 = H1 // 2, W1 // 2      # layer-2 output spatial
    K1 = Cin * kh * kw
    M1, M2 = H1 * W1, H2 * W2

    # Layer-1 im2col: one XLA op; feature ordering is (c, kh, kw), identical
    # to torch weight.reshape(C1, -1).  HIGHEST precision -> exact patches.
    patches = jax.lax.conv_general_dilated_patches(
        x, (kh, kw), (2, 2), ((1, 1), (1, 1)),
        dimension_numbers=("NCHW", "OIHW", "NCHW"),
        precision=jax.lax.Precision.HIGHEST)                 # [B, K1, H1, W1]
    # Reorder rows into parity order (h%2, w%2, h//2, w//2) so the in-kernel
    # layer-2 im2col reduces to unit-stride static slices.
    p1 = patches.reshape(B, K1, H2, 2, W2, 2)
    p1 = p1.transpose(0, 3, 5, 2, 4, 1).reshape(B, M1, K1)

    # Concatenate conv_01 | conv_02 weights -> one matmul operand per layer.
    w1t = jnp.concatenate([w1a, w1b], axis=0).reshape(2 * C1, K1).T   # [K1, 2*C1]
    w2t = jnp.concatenate([w2a, w2b], axis=0)                         # [2*C2, C1, 4, 4]
    w2t = w2t.transpose(2, 3, 1, 0).reshape(kh * kw, C1, 2 * C2)      # [tap, C1, 2*C2]

    flops = B * (2 * M1 * K1 * (2 * C1) + 2 * M2 * (kh * kw * C1) * (2 * C2))
    bytes_accessed = 4 * (B * M1 * K1 + K1 * 2 * C1
                          + kh * kw * C1 * 2 * C2 + B * M2 * C2)

    out = pl.pallas_call(
        _make_fused_kernel(H2, W2, C1, C2),
        out_shape=jax.ShapeDtypeStruct((B, M2, C2), jnp.float32),
        grid_spec=pltpu.PrefetchScalarGridSpec(
            num_scalar_prefetch=0,
            grid=(B,),
            in_specs=[
                pl.BlockSpec((1, M1, K1), lambda b: (b, 0, 0)),            # patches
                pl.BlockSpec((K1, 2 * C1), lambda b: (0, 0)),              # layer-1 W1|W2
                pl.BlockSpec((kh * kw, C1, 2 * C2), lambda b: (0, 0, 0)),  # layer-2 W1|W2
            ],
            out_specs=pl.BlockSpec((1, M2, C2), lambda b: (b, 0, 0)),
            scratch_shapes=[
                pltpu.VMEM((2, 2, H2 + 2, W2 + 2, C1), jnp.float32)],
        ),
        compiler_params=pltpu.CompilerParams(
            dimension_semantics=("parallel",)),
        cost_estimate=pl.CostEstimate(
            flops=flops, transcendentals=0, bytes_accessed=bytes_accessed),
    )(p1, w1t, w2t)

    # Single layout change back to NCHW, at the very end.
    return out.reshape(B, H2, W2, C2).transpose(0, 3, 1, 2)


# ---------------------------------------------------------------------------
# Pure-JAX reference (lax conv) for correctness checking.
# ---------------------------------------------------------------------------
def _ref_conv(x, w, stride, pad):
    return jax.lax.conv_general_dilated(
        x, w, window_strides=(stride, stride),
        padding=((pad, pad), (pad, pad)),
        dimension_numbers=("NCHW", "OIHW", "NCHW"))


def _ref_forward(x, w1a, w1b, w2a, w2b):
    o = _ref_conv(x, w1a, 2, 1)
    o = o * _ref_conv(x, w1b, 2, 1) + o
    p = _ref_conv(o, w2a, 2, 1)
    p = p * _ref_conv(o, w2b, 2, 1) + p
    return p


if __name__ == "__main__":
    key = jax.random.PRNGKey(0)
    kx, k1a, k1b, k2a, k2b = jax.random.split(key, 5)

    # CIFAR-style input, small batch.
    x = jax.random.normal(kx, (2, 3, 32, 32), dtype=jnp.float32)

    # Deterministic synthetic weights (shapes from the module __init__).
    w1a = jax.random.normal(k1a, (64, 3, 4, 4), dtype=jnp.float32) * 0.1
    w1b = jax.random.normal(k1b, (64, 3, 4, 4), dtype=jnp.float32) * 0.1
    w2a = jax.random.normal(k2a, (256, 64, 4, 4), dtype=jnp.float32) * 0.05
    w2b = jax.random.normal(k2b, (256, 64, 4, 4), dtype=jnp.float32) * 0.05

    out = jax.block_until_ready(
        pinet_shallow_two_layer_forward(x, w1a, w1b, w2a, w2b))
    assert out.shape == (2, 256, 8, 8), out.shape

    ref = jax.block_until_ready(_ref_forward(x, w1a, w1b, w2a, w2b))
    err = float(jnp.max(jnp.abs(out - ref)))
    assert err < 2e-3, err

    print("KERNEL_OK")
</pallas_src>

<mosaic_0001>
module attributes {stable_mosaic.version = 11 : i64} {
  func.func @kernel(%arg0: i32, %arg1: memref<1x256x48xf32, #tpu.memory_space<vmem>>, %arg2: memref<48x128xf32, #tpu.memory_space<vmem>>, %arg3: memref<16x64x512xf32, #tpu.memory_space<vmem>>, %arg4: memref<1x64x256xf32, #tpu.memory_space<vmem>>, %arg5: memref<2x2x10x10x64xf32, #tpu.memory_space<vmem>>) attributes {dimension_semantics = [#tpu.dimension_semantics<parallel>], iteration_bounds = array<i64: 2>, scalar_prefetch = 0 : i64, scratch_operands = 1 : i64, tpu.core_type = #tpu.core_type<tc>, window_params = [{transform_indices = @transform_0, window_bounds = array<i64: 1, 256, 48>}, {pipeline_mode = #tpu.pipeline_mode<synchronous>, transform_indices = @transform_1, window_bounds = array<i64: 48, 128>}, {pipeline_mode = #tpu.pipeline_mode<synchronous>, transform_indices = @transform_2, window_bounds = array<i64: 16, 64, 512>}, {transform_indices = @transform_3, window_bounds = array<i64: 1, 64, 256>}]} {
    %c0 = arith.constant 0 : index
    %c0_0 = arith.constant 0 : index
    %c0_1 = arith.constant 0 : index
    %0 = vector.load %arg1[%c0, %c0_0, %c0_1] : memref<1x256x48xf32, #tpu.memory_space<vmem>>, vector<1x256x48xf32>
    %1 = vector.shape_cast %0 : vector<1x256x48xf32> to vector<256x48xf32>
    %c0_2 = arith.constant 0 : index
    %c0_3 = arith.constant 0 : index
    %2 = vector.load %arg2[%c0_2, %c0_3] : memref<48x128xf32, #tpu.memory_space<vmem>>, vector<48x128xf32>
    %cst = arith.constant dense<0.000000e+00> : vector<256x128xf32>
    %3 = tpu.matmul %1, %2, %cst {dimension_numbers = #tpu.dot_dimension_numbers<[1], [0], [0], [1], [0, 0, 1, 1], [], []>} : vector<256x48xf32>, vector<48x128xf32>, vector<256x128xf32> -> vector<256x128xf32>
    %4 = vector.extract_strided_slice %3 {offsets = [0, 0], sizes = [256, 64], strides = [1, 1]} : vector<256x128xf32> to vector<256x64xf32>
    %5 = vector.extract_strided_slice %3 {offsets = [0, 64], sizes = [256, 64], strides = [1, 1]} : vector<256x128xf32> to vector<256x64xf32>
    %6 = arith.mulf %4, %5 : vector<256x64xf32>
    %7 = arith.addf %6, %4 : vector<256x64xf32>
    %cst_4 = arith.constant 0.000000e+00 : f32
    %8 = vector.broadcast %cst_4 : f32 to vector<2x2x10x10x64xf32>
    %c0_5 = arith.constant 0 : index
    %c0_6 = arith.constant 0 : index
    %c0_7 = arith.constant 0 : index
    %c0_8 = arith.constant 0 : index
    %c0_9 = arith.constant 0 : index
    %9 = vector.load %arg5[%c0_5, %c0_6, %c0_7, %c0_8, %c0_9] : memref<2x2x10x10x64xf32, #tpu.memory_space<vmem>>, vector<2x2x10x10x64xf32>
    tpu.vector_store %arg5[%c0_5, %c0_6, %c0_7, %c0_8, %c0_9], %8 {strides = array<i32>} : memref<2x2x10x10x64xf32, #tpu.memory_space<vmem>>, vector<2x2x10x10x64xf32>,
    %10 = vector.shape_cast %7 : vector<256x64xf32> to vector<2x2x8x8x64xf32>
    %c0_10 = arith.constant 0 : index
    %c0_11 = arith.constant 0 : index
    %c1 = arith.constant 1 : index
    %c1_12 = arith.constant 1 : index
    %c0_13 = arith.constant 0 : index
    %11 = vector.load %arg5[%c0_10, %c0_11, %c1, %c1_12, %c0_13] : memref<2x2x10x10x64xf32, #tpu.memory_space<vmem>>, vector<2x2x8x8x64xf32>
    tpu.vector_store %arg5[%c0_10, %c0_11, %c1, %c1_12, %c0_13], %10 {strides = array<i32>} : memref<2x2x10x10x64xf32, #tpu.memory_space<vmem>>, vector<2x2x8x8x64xf32>,
    %cst_14 = arith.constant 0.000000e+00 : f32
    %12 = vector.broadcast %cst_14 : f32 to vector<64x512xf32>
    %c1_15 = arith.constant 1 : index
    %c1_16 = arith.constant 1 : index
    %c0_17 = arith.constant 0 : index
    %c0_18 = arith.constant 0 : index
    %c0_19 = arith.constant 0 : index
    %13 = vector.load %arg5[%c1_15, %c1_16, %c0_17, %c0_18, %c0_19] : memref<2x2x10x10x64xf32, #tpu.memory_space<vmem>>, vector<1x1x8x8x64xf32>
    %14 = vector.shape_cast %13 : vector<1x1x8x8x64xf32> to vector<8x8x64xf32>
    %15 = vector.shape_cast %14 : vector<8x8x64xf32> to vector<64x64xf32>
    %c0_20 = arith.constant 0 : index
    %c0_21 = arith.constant 0 : index
    %c0_22 = arith.constant 0 : index
    %16 = vector.load %arg3[%c0_20, %c0_21, %c0_22] : memref<16x64x512xf32, #tpu.memory_space<vmem>>, vector<1x64x512xf32>
    %17 = vector.shape_cast %16 : vector<1x64x512xf32> to vector<64x512xf32>
    %cst_23 = arith.constant dense<0.000000e+00> : vector<64x512xf32>
    %18 = tpu.matmul %15, %17, %cst_23 {dimension_numbers = #tpu.dot_dimension_numbers<[1], [0], [0], [1], [0, 0, 1, 1], [], []>} : vector<64x64xf32>, vector<64x512xf32>, vector<64x512xf32> -> vector<64x512xf32>
    %19 = arith.addf %12, %18 : vector<64x512xf32>
    %c1_24 = arith.constant 1 : index
    %c0_25 = arith.constant 0 : index
    %c0_26 = arith.constant 0 : index
    %c1_27 = arith.constant 1 : index
    %c0_28 = arith.constant 0 : index
    %20 = vector.load %arg5[%c1_24, %c0_25, %c0_26, %c1_27, %c0_28] : memref<2x2x10x10x64xf32, #tpu.memory_space<vmem>>, vector<1x1x8x8x64xf32>
    %21 = vector.shape_cast %20 : vector<1x1x8x8x64xf32> to vector<8x8x64xf32>
    %22 = vector.shape_cast %21 : vector<8x8x64xf32> to vector<64x64xf32>
    %c1_29 = arith.constant 1 : index
    %c0_30 = arith.constant 0 : index
    %c0_31 = arith.constant 0 : index
    %23 = vector.load %arg3[%c1_29, %c0_30, %c0_31] : memref<16x64x512xf32, #tpu.memory_space<vmem>>, vector<1x64x512xf32>
    %24 = vector.shape_cast %23 : vector<1x64x512xf32> to vector<64x512xf32>
    %cst_32 = arith.constant dense<0.000000e+00> : vector<64x512xf32>
    %25 = tpu.matmul %22, %24, %cst_32 {dimension_numbers = #tpu.dot_dimension_numbers<[1], [0], [0], [1], [0, 0, 1, 1], [], []>} : vector<64x64xf32>, vector<64x512xf32>, vector<64x512xf32> -> vector<64x512xf32>
    %26 = arith.addf %19, %25 : vector<64x512xf32>
    %c1_33 = arith.constant 1 : index
    %c1_34 = arith.constant 1 : index
    %c0_35 = arith.constant 0 : index
    %c1_36 = arith.constant 1 : index
    %c0_37 = arith.constant 0 : index
    %27 = vector.load %arg5[%c1_33, %c1_34, %c0_35, %c1_36, %c0_37] : memref<2x2x10x10x64xf32, #tpu.memory_space<vmem>>, vector<1x1x8x8x64xf32>
    %28 = vector.shape_cast %27 : vector<1x1x8x8x64xf32> to vector<8x8x64xf32>
    %29 = vector.shape_cast %28 : vector<8x8x64xf32> to vector<64x64xf32>
    %c2 = arith.constant 2 : index
    %c0_38 = arith.constant 0 : index
    %c0_39 = arith.constant 0 : index
    %30 = vector.load %arg3[%c2, %c0_38, %c0_39] : memref<16x64x512xf32, #tpu.memory_space<vmem>>, vector<1x64x512xf32>
    %31 = vector.shape_cast %30 : vector<1x64x512xf32> to vector<64x512xf32>
    %cst_40 = arith.constant dense<0.000000e+00> : vector<64x512xf32>
    %32 = tpu.matmul %29, %31, %cst_40 {dimension_numbers = #tpu.dot_dimension_numbers<[1], [0], [0], [1], [0, 0, 1, 1], [], []>} : vector<64x64xf32>, vector<64x512xf32>, vector<64x512xf32> -> vector<64x512xf32>
    %33 = arith.addf %26, %32 : vector<64x512xf32>
    %c1_41 = arith.constant 1 : index
    %c0_42 = arith.constant 0 : index
    %c0_43 = arith.constant 0 : index
    %c2_44 = arith.constant 2 : index
    %c0_45 = arith.constant 0 : index
    %34 = vector.load %arg5[%c1_41, %c0_42, %c0_43, %c2_44, %c0_45] : memref<2x2x10x10x64xf32, #tpu.memory_space<vmem>>, vector<1x1x8x8x64xf32>
    %35 = vector.shape_cast %34 : vector<1x1x8x8x64xf32> to vector<8x8x64xf32>
    %36 = vector.shape_cast %35 : vector<8x8x64xf32> to vector<64x64xf32>
    %c3 = arith.constant 3 : index
    %c0_46 = arith.constant 0 : index
    %c0_47 = arith.constant 0 : index
    %37 = vector.load %arg3[%c3, %c0_46, %c0_47] : memref<16x64x512xf32, #tpu.memory_space<vmem>>, vector<1x64x512xf32>
    %38 = vector.shape_cast %37 : vector<1x64x512xf32> to vector<64x512xf32>
    %cst_48 = arith.constant dense<0.000000e+00> : vector<64x512xf32>
    %39 = tpu.matmul %36, %38, %cst_48 {dimension_numbers = #tpu.dot_dimension_numbers<[1], [0], [0], [1], [0, 0, 1, 1], [], []>} : vector<64x64xf32>, vector<64x512xf32>, vector<64x512xf32> -> vector<64x512xf32>
    %40 = arith.addf %33, %39 : vector<64x512xf32>
    %c0_49 = arith.constant 0 : index
    %c1_50 = arith.constant 1 : index
    %c1_51 = arith.constant 1 : index
    %c0_52 = arith.constant 0 : index
    %c0_53 = arith.constant 0 : index
    %41 = vector.load %arg5[%c0_49, %c1_50, %c1_51, %c0_52, %c0_53] : memref<2x2x10x10x64xf32, #tpu.memory_space<vmem>>, vector<1x1x8x8x64xf32>
    %42 = vector.shape_cast %41 : vector<1x1x8x8x64xf32> to vector<8x8x64xf32>
    %43 = vector.shape_cast %42 : vector<8x8x64xf32> to vector<64x64xf32>
    %c4 = arith.constant 4 : index
    %c0_54 = arith.constant 0 : index
    %c0_55 = arith.constant 0 : index
    %44 = vector.load %arg3[%c4, %c0_54, %c0_55] : memref<16x64x512xf32, #tpu.memory_space<vmem>>, vector<1x64x512xf32>
    %45 = vector.shape_cast %44 : vector<1x64x512xf32> to vector<64x512xf32>
    %cst_56 = arith.constant dense<0.000000e+00> : vector<64x512xf32>
    %46 = tpu.matmul %43, %45, %cst_56 {dimension_numbers = #tpu.dot_dimension_numbers<[1], [0], [0], [1], [0, 0, 1, 1], [], []>} : vector<64x64xf32>, vector<64x512xf32>, vector<64x512xf32> -> vector<64x512xf32>
    %47 = arith.addf %40, %46 : vector<64x512xf32>
    %c0_57 = arith.constant 0 : index
    %c0_58 = arith.constant 0 : index
    %c1_59 = arith.constant 1 : index
    %c1_60 = arith.constant 1 : index
    %c0_61 = arith.constant 0 : index
    %48 = vector.load %arg5[%c0_57, %c0_58, %c1_59, %c1_60, %c0_61] : memref<2x2x10x10x64xf32, #tpu.memory_space<vmem>>, vector<1x1x8x8x64xf32>
    %49 = vector.shape_cast %48 : vector<1x1x8x8x64xf32> to vector<8x8x64xf32>
    %50 = vector.shape_cast %49 : vector<8x8x64xf32> to vector<64x64xf32>
    %c5 = arith.constant 5 : index
    %c0_62 = arith.constant 0 : index
    %c0_63 = arith.constant 0 : index
    %51 = vector.load %arg3[%c5, %c0_62, %c0_63] : memref<16x64x512xf32, #tpu.memory_space<vmem>>, vector<1x64x512xf32>
    %52 = vector.shape_cast %51 : vector<1x64x512xf32> to vector<64x512xf32>
    %cst_64 = arith.constant dense<0.000000e+00> : vector<64x512xf32>
    %53 = tpu.matmul %50, %52, %cst_64 {dimension_numbers = #tpu.dot_dimension_numbers<[1], [0], [0], [1], [0, 0, 1, 1], [], []>} : vector<64x64xf32>, vector<64x512xf32>, vector<64x512xf32> -> vector<64x512xf32>
    %54 = arith.addf %47, %53 : vector<64x512xf32>
    %c0_65 = arith.constant 0 : index
    %c1_66 = arith.constant 1 : index
    %c1_67 = arith.constant 1 : index
    %c1_68 = arith.constant 1 : index
    %c0_69 = arith.constant 0 : index
    %55 = vector.load %arg5[%c0_65, %c1_66, %c1_67, %c1_68, %c0_69] : memref<2x2x10x10x64xf32, #tpu.memory_space<vmem>>, vector<1x1x8x8x64xf32>
    %56 = vector.shape_cast %55 : vector<1x1x8x8x64xf32> to vector<8x8x64xf32>
    %57 = vector.shape_cast %56 : vector<8x8x64xf32> to vector<64x64xf32>
    %c6 = arith.constant 6 : index
    %c0_70 = arith.constant 0 : index
    %c0_71 = arith.constant 0 : index
    %58 = vector.load %arg3[%c6, %c0_70, %c0_71] : memref<16x64x512xf32, #tpu.memory_space<vmem>>, vector<1x64x512xf32>
    %59 = vector.shape_cast %58 : vector<1x64x512xf32> to vector<64x512xf32>
    %cst_72 = arith.constant dense<0.000000e+00> : vector<64x512xf32>
    %60 = tpu.matmul %57, %59, %cst_72 {dimension_numbers = #tpu.dot_dimension_numbers<[1], [0], [0], [1], [0, 0, 1, 1], [], []>} : vector<64x64xf32>, vector<64x512xf32>, vector<64x512xf32> -> vector<64x512xf32>
    %61 = arith.addf %54, %60 : vector<64x512xf32>
    %c0_73 = arith.constant 0 : index
    %c0_74 = arith.constant 0 : index
    %c1_75 = arith.constant 1 : index
    %c2_76 = arith.constant 2 : index
    %c0_77 = arith.constant 0 : index
    %62 = vector.load %arg5[%c0_73, %c0_74, %c1_75, %c2_76, %c0_77] : memref<2x2x10x10x64xf32, #tpu.memory_space<vmem>>, vector<1x1x8x8x64xf32>
    %63 = vector.shape_cast %62 : vector<1x1x8x8x64xf32> to vector<8x8x64xf32>
    %64 = vector.shape_cast %63 : vector<8x8x64xf32> to vector<64x64xf32>
    %c7 = arith.constant 7 : index
    %c0_78 = arith.constant 0 : index
    %c0_79 = arith.constant 0 : index
    %65 = vector.load %arg3[%c7, %c0_78, %c0_79] : memref<16x64x512xf32, #tpu.memory_space<vmem>>, vector<1x64x512xf32>
    %66 = vector.shape_cast %65 : vector<1x64x512xf32> to vector<64x512xf32>
    %cst_80 = arith.constant dense<0.000000e+00> : vector<64x512xf32>
    %67 = tpu.matmul %64, %66, %cst_80 {dimension_numbers = #tpu.dot_dimension_numbers<[1], [0], [0], [1], [0, 0, 1, 1], [], []>} : vector<64x64xf32>, vector<64x512xf32>, vector<64x512xf32> -> vector<64x512xf32>
    %68 = arith.addf %61, %67 : vector<64x512xf32>
    %c1_81 = arith.constant 1 : index
    %c1_82 = arith.constant 1 : index
    %c1_83 = arith.constant 1 : index
    %c0_84 = arith.constant 0 : index
    %c0_85 = arith.constant 0 : index
    %69 = vector.load %arg5[%c1_81, %c1_82, %c1_83, %c0_84, %c0_85] : memref<2x2x10x10x64xf32, #tpu.memory_space<vmem>>, vector<1x1x8x8x64xf32>
    %70 = vector.shape_cast %69 : vector<1x1x8x8x64xf32> to vector<8x8x64xf32>
    %71 = vector.shape_cast %70 : vector<8x8x64xf32> to vector<64x64xf32>
    %c8 = arith.constant 8 : index
    %c0_86 = arith.constant 0 : index
    %c0_87 = arith.constant 0 : index
    %72 = vector.load %arg3[%c8, %c0_86, %c0_87] : memref<16x64x512xf32, #tpu.memory_space<vmem>>, vector<1x64x512xf32>
    %73 = vector.shape_cast %72 : vector<1x64x512xf32> to vector<64x512xf32>
    %cst_88 = arith.constant dense<0.000000e+00> : vector<64x512xf32>
    %74 = tpu.matmul %71, %73, %cst_88 {dimension_numbers = #tpu.dot_dimension_numbers<[1], [0], [0], [1], [0, 0, 1, 1], [], []>} : vector<64x64xf32>, vector<64x512xf32>, vector<64x512xf32> -> vector<64x512xf32>
    %75 = arith.addf %68, %74 : vector<64x512xf32>
    %c1_89 = arith.constant 1 : index
    %c0_90 = arith.constant 0 : index
    %c1_91 = arith.constant 1 : index
    %c1_92 = arith.constant 1 : index
    %c0_93 = arith.constant 0 : index
    %76 = vector.load %arg5[%c1_89, %c0_90, %c1_91, %c1_92, %c0_93] : memref<2x2x10x10x64xf32, #tpu.memory_space<vmem>>, vector<1x1x8x8x64xf32>
    %77 = vector.shape_cast %76 : vector<1x1x8x8x64xf32> to vector<8x8x64xf32>
    %78 = vector.shape_cast %77 : vector<8x8x64xf32> to vector<64x64xf32>
    %c9 = arith.constant 9 : index
    %c0_94 = arith.constant 0 : index
    %c0_95 = arith.constant 0 : index
    %79 = vector.load %arg3[%c9, %c0_94, %c0_95] : memref<16x64x512xf32, #tpu.memory_space<vmem>>, vector<1x64x512xf32>
    %80 = vector.shape_cast %79 : vector<1x64x512xf32> to vector<64x512xf32>
    %cst_96 = arith.constant dense<0.000000e+00> : vector<64x512xf32>
    %81 = tpu.matmul %78, %80, %cst_96 {dimension_numbers = #tpu.dot_dimension_numbers<[1], [0], [0], [1], [0, 0, 1, 1], [], []>} : vector<64x64xf32>, vector<64x512xf32>, vector<64x512xf32> -> vector<64x512xf32>
    %82 = arith.addf %75, %81 : vector<64x512xf32>
    %c1_97 = arith.constant 1 : index
    %c1_98 = arith.constant 1 : index
    %c1_99 = arith.constant 1 : index
    %c1_100 = arith.constant 1 : index
    %c0_101 = arith.constant 0 : index
    %83 = vector.load %arg5[%c1_97, %c1_98, %c1_99, %c1_100, %c0_101] : memref<2x2x10x10x64xf32, #tpu.memory_space<vmem>>, vector<1x1x8x8x64xf32>
    %84 = vector.shape_cast %83 : vector<1x1x8x8x64xf32> to vector<8x8x64xf32>
    %85 = vector.shape_cast %84 : vector<8x8x64xf32> to vector<64x64xf32>
    %c10 = arith.constant 10 : index
    %c0_102 = arith.constant 0 : index
    %c0_103 = arith.constant 0 : index
    %86 = vector.load %arg3[%c10, %c0_102, %c0_103] : memref<16x64x512xf32, #tpu.memory_space<vmem>>, vector<1x64x512xf32>
    %87 = vector.shape_cast %86 : vector<1x64x512xf32> to vector<64x512xf32>
    %cst_104 = arith.constant dense<0.000000e+00> : vector<64x512xf32>
    %88 = tpu.matmul %85, %87, %cst_104 {dimension_numbers = #tpu.dot_dimension_numbers<[1], [0], [0], [1], [0, 0, 1, 1], [], []>} : vector<64x64xf32>, vector<64x512xf32>, vector<64x512xf32> -> vector<64x512xf32>
    %89 = arith.addf %82, %88 : vector<64x512xf32>
    %c1_105 = arith.constant 1 : index
    %c0_106 = arith.constant 0 : index
    %c1_107 = arith.constant 1 : index
    %c2_108 = arith.constant 2 : index
    %c0_109 = arith.constant 0 : index
    %90 = vector.load %arg5[%c1_105, %c0_106, %c1_107, %c2_108, %c0_109] : memref<2x2x10x10x64xf32, #tpu.memory_space<vmem>>, vector<1x1x8x8x64xf32>
    %91 = vector.shape_cast %90 : vector<1x1x8x8x64xf32> to vector<8x8x64xf32>
    %92 = vector.shape_cast %91 : vector<8x8x64xf32> to vector<64x64xf32>
    %c11 = arith.constant 11 : index
    %c0_110 = arith.constant 0 : index
    %c0_111 = arith.constant 0 : index
    %93 = vector.load %arg3[%c11, %c0_110, %c0_111] : memref<16x64x512xf32, #tpu.memory_space<vmem>>, vector<1x64x512xf32>
    %94 = vector.shape_cast %93 : vector<1x64x512xf32> to vector<64x512xf32>
    %cst_112 = arith.constant dense<0.000000e+00> : vector<64x512xf32>
    %95 = tpu.matmul %92, %94, %cst_112 {dimension_numbers = #tpu.dot_dimension_numbers<[1], [0], [0], [1], [0, 0, 1, 1], [], []>} : vector<64x64xf32>, vector<64x512xf32>, vector<64x512xf32> -> vector<64x512xf32>
    %96 = arith.addf %89, %95 : vector<64x512xf32>
    %c0_113 = arith.constant 0 : index
    %c1_114 = arith.constant 1 : index
    %c2_115 = arith.constant 2 : index
    %c0_116 = arith.constant 0 : index
    %c0_117 = arith.constant 0 : index
    %97 = vector.load %arg5[%c0_113, %c1_114, %c2_115, %c0_116, %c0_117] : memref<2x2x10x10x64xf32, #tpu.memory_space<vmem>>, vector<1x1x8x8x64xf32>
    %98 = vector.shape_cast %97 : vector<1x1x8x8x64xf32> to vector<8x8x64xf32>
    %99 = vector.shape_cast %98 : vector<8x8x64xf32> to vector<64x64xf32>
    %c12 = arith.constant 12 : index
    %c0_118 = arith.constant 0 : index
    %c0_119 = arith.constant 0 : index
    %100 = vector.load %arg3[%c12, %c0_118, %c0_119] : memref<16x64x512xf32, #tpu.memory_space<vmem>>, vector<1x64x512xf32>
    %101 = vector.shape_cast %100 : vector<1x64x512xf32> to vector<64x512xf32>
    %cst_120 = arith.constant dense<0.000000e+00> : vector<64x512xf32>
    %102 = tpu.matmul %99, %101, %cst_120 {dimension_numbers = #tpu.dot_dimension_numbers<[1], [0], [0], [1], [0, 0, 1, 1], [], []>} : vector<64x64xf32>, vector<64x512xf32>, vector<64x512xf32> -> vector<64x512xf32>
    %103 = arith.addf %96, %102 : vector<64x512xf32>
    %c0_121 = arith.constant 0 : index
    %c0_122 = arith.constant 0 : index
    %c2_123 = arith.constant 2 : index
    %c1_124 = arith.constant 1 : index
    %c0_125 = arith.constant 0 : index
    %104 = vector.load %arg5[%c0_121, %c0_122, %c2_123, %c1_124, %c0_125] : memref<2x2x10x10x64xf32, #tpu.memory_space<vmem>>, vector<1x1x8x8x64xf32>
    %105 = vector.shape_cast %104 : vector<1x1x8x8x64xf32> to vector<8x8x64xf32>
    %106 = vector.shape_cast %105 : vector<8x8x64xf32> to vector<64x64xf32>
    %c13 = arith.constant 13 : index
    %c0_126 = arith.constant 0 : index
    %c0_127 = arith.constant 0 : index
    %107 = vector.load %arg3[%c13, %c0_126, %c0_127] : memref<16x64x512xf32, #tpu.memory_space<vmem>>, vector<1x64x512xf32>
    %108 = vector.shape_cast %107 : vector<1x64x512xf32> to vector<64x512xf32>
    %cst_128 = arith.constant dense<0.000000e+00> : vector<64x512xf32>
    %109 = tpu.matmul %106, %108, %cst_128 {dimension_numbers = #tpu.dot_dimension_numbers<[1], [0], [0], [1], [0, 0, 1, 1], [], []>} : vector<64x64xf32>, vector<64x512xf32>, vector<64x512xf32> -> vector<64x512xf32>
    %110 = arith.addf %103, %109 : vector<64x512xf32>
    %c0_129 = arith.constant 0 : index
    %c1_130 = arith.constant 1 : index
    %c2_131 = arith.constant 2 : index
    %c1_132 = arith.constant 1 : index
    %c0_133 = arith.constant 0 : index
    %111 = vector.load %arg5[%c0_129, %c1_130, %c2_131, %c1_132, %c0_133] : memref<2x2x10x10x64xf32, #tpu.memory_space<vmem>>, vector<1x1x8x8x64xf32>
    %112 = vector.shape_cast %111 : vector<1x1x8x8x64xf32> to vector<8x8x64xf32>
    %113 = vector.shape_cast %112 : vector<8x8x64xf32> to vector<64x64xf32>
    %c14 = arith.constant 14 : index
    %c0_134 = arith.constant 0 : index
    %c0_135 = arith.constant 0 : index
    %114 = vector.load %arg3[%c14, %c0_134, %c0_135] : memref<16x64x512xf32, #tpu.memory_space<vmem>>, vector<1x64x512xf32>
    %115 = vector.shape_cast %114 : vector<1x64x512xf32> to vector<64x512xf32>
    %cst_136 = arith.constant dense<0.000000e+00> : vector<64x512xf32>
    %116 = tpu.matmul %113, %115, %cst_136 {dimension_numbers = #tpu.dot_dimension_numbers<[1], [0], [0], [1], [0, 0, 1, 1], [], []>} : vector<64x64xf32>, vector<64x512xf32>, vector<64x512xf32> -> vector<64x512xf32>
    %117 = arith.addf %110, %116 : vector<64x512xf32>
    %c0_137 = arith.constant 0 : index
    %c0_138 = arith.constant 0 : index
    %c2_139 = arith.constant 2 : index
    %c2_140 = arith.constant 2 : index
    %c0_141 = arith.constant 0 : index
    %118 = vector.load %arg5[%c0_137, %c0_138, %c2_139, %c2_140, %c0_141] : memref<2x2x10x10x64xf32, #tpu.memory_space<vmem>>, vector<1x1x8x8x64xf32>
    %119 = vector.shape_cast %118 : vector<1x1x8x8x64xf32> to vector<8x8x64xf32>
    %120 = vector.shape_cast %119 : vector<8x8x64xf32> to vector<64x64xf32>
    %c15 = arith.constant 15 : index
    %c0_142 = arith.constant 0 : index
    %c0_143 = arith.constant 0 : index
    %121 = vector.load %arg3[%c15, %c0_142, %c0_143] : memref<16x64x512xf32, #tpu.memory_space<vmem>>, vector<1x64x512xf32>
    %122 = vector.shape_cast %121 : vector<1x64x512xf32> to vector<64x512xf32>
    %cst_144 = arith.constant dense<0.000000e+00> : vector<64x512xf32>
    %123 = tpu.matmul %120, %122, %cst_144 {dimension_numbers = #tpu.dot_dimension_numbers<[1], [0], [0], [1], [0, 0, 1, 1], [], []>} : vector<64x64xf32>, vector<64x512xf32>, vector<64x512xf32> -> vector<64x512xf32>
    %124 = arith.addf %117, %123 : vector<64x512xf32>
    %125 = vector.extract_strided_slice %124 {offsets = [0, 0], sizes = [64, 256], strides = [1, 1]} : vector<64x512xf32> to vector<64x256xf32>
    %126 = vector.extract_strided_slice %124 {offsets = [0, 256], sizes = [64, 256], strides = [1, 1]} : vector<64x512xf32> to vector<64x256xf32>
    %127 = arith.mulf %125, %126 : vector<64x256xf32>
    %128 = arith.addf %127, %125 : vector<64x256xf32>
    %c0_145 = arith.constant 0 : index
    %c0_146 = arith.constant 0 : index
    %c0_147 = arith.constant 0 : index
    %129 = vector.load %arg4[%c0_145, %c0_146, %c0_147] : memref<1x64x256xf32, #tpu.memory_space<vmem>>, vector<1x64x256xf32>
    %130 = vector.shape_cast %129 : vector<1x64x256xf32> to vector<64x256xf32>
    %131 = vector.shape_cast %128 : vector<64x256xf32> to vector<1x64x256xf32>
    tpu.vector_store %arg4[%c0_145, %c0_146, %c0_147], %131 {strides = array<i32>} : memref<1x64x256xf32, #tpu.memory_space<vmem>>, vector<1x64x256xf32>,
    return
  }
  func.func @transform_0(%arg0: i32) -> (i32, i32, i32) {
    %c0_i32 = arith.constant 0 : i32
    %c0_i32_0 = arith.constant 0 : i32
    %c0_i32_1 = arith.constant 0 : i32
    return %arg0, %c0_i32, %c0_i32_0 : i32, i32, i32
  }
  func.func @transform_1(%arg0: i32) -> (i32, i32) {
    %c0_i32 = arith.constant 0 : i32
    %c0_i32_0 = arith.constant 0 : i32
    %c0_i32_1 = arith.constant 0 : i32
    return %c0_i32, %c0_i32_0 : i32, i32
  }
  func.func @transform_2(%arg0: i32) -> (i32, i32, i32) {
    %c0_i32 = arith.constant 0 : i32
    %c0_i32_0 = arith.constant 0 : i32
    %c0_i32_1 = arith.constant 0 : i32
    %c0_i32_2 = arith.constant 0 : i32
    return %c0_i32, %c0_i32_0, %c0_i32_1 : i32, i32, i32
  }
  func.func @transform_3(%arg0: i32) -> (i32, i32, i32) {
    %c0_i32 = arith.constant 0 : i32
    %c0_i32_0 = arith.constant 0 : i32
    %c0_i32_1 = arith.constant 0 : i32
    return %arg0, %c0_i32, %c0_i32_0 : i32, i32, i32
  }
}

</mosaic_0001>

<bundles_post_ra>
// kernel: pinet_shallow_two_layer_forward.1
= control target key start
LH: loop header
LB: loop body
LE: loop exit
PB: predicated region body
PF: predicated region fallthrough
CT: control target
= control target key end

     0   :  { %8 = vsyncpa [#allocation4], 0  ;;  %s11588_s0 = inlined_call_operand.vmem [shape: f32[2,256,48], index: 0, kind: input, shape index: {}]   ;;  %s11589_s1 = inlined_call_operand.vmem [shape: f32[48,128], index: 1, kind: input, shape index: {}]   ;;  %s11590_s2 = inlined_call_operand.vmem [shape: f32[16,64,512], index: 2, kind: input, shape index: {}]   ;;  %s11591_s3 = inlined_call_operand.hbm [shape: f32[2,64,256], index: 3, kind: output, shape index: {}]  }
   0x1   :  { %10 = vsyncpa [#allocation4 + $0x1], 0  ;;  %s7080_s12 = smov 0   ;;  %s7082_s13 = smov 0  }
   0x2   :  { %s7084_s14 = smov 0   ;;  %s7086_s15 = smov 0  }
   0x3 LB: > { %s7101_s16 = sadd.s32 4294967295, %s7053_s15   ;;  %s6070_s17 = sadd.s32 4294967294, %s7053_s15   ;;  %s7053_s15 = sphi %s7086_s15, %s11695_s15   ;;  %s7049_s14 = sphi %s7084_s14, %s11694_s14   ;;  %s7045_s13 = sphi %s7082_s13, %s11693_s13   ;;  %s7041_s12 = sphi %s7080_s12, %s11692_s12  }
   0x4   : > { %s7105_s18 = sadd.s32 1, %s7053_s15   ;;  %s91_s19 = sadd.s32 1, %s7049_s14 }
   0x5   : > { %s88_s20 = ssub.s32 %s7053_s15, %s7105_s18  ;;  %p101_p0 = scmp.ne.s32.totalorder %s7049_s14, %s7045_s13 }
   0x6   : > { %p89_p1 = scmp.eq.s32.totalorder %s88_s20, 0  ;;  %p102_p2 = scmp.eq.s32.totalorder %s7101_s16, 1 }
   0x7   : > { %p107_p3 = scmp.ne.s32.totalorder %s7045_s13, %s7041_s12  ;;  %p108_p4 = scmp.eq.s32.totalorder %s6070_s17, 1 }
   0x8   : > { %s7116_s21 = scalar_select %p89_p1, %s7049_s14, %s91_s19  }
   0x9   : > { %p7118_p5 = por %p102_p2, %p101_p0  ;;  %p7122_p6 = por %p108_p4, %p107_p3 }
   0xa   : > { %p6073_p7 = scmp.ge.s32.totalorder %s7053_s15, 1  ;;  %p140_p8 = scmp.lt.s32.totalorder %s7053_s15, 3 }
   0xc   : > { %p141_p9 = pnand %p6073_p7, %p140_p8 }
   0xe   : > { %144 = sbr.rel (%p141_p9) target bundleno = 1148 (0x47c), region = 32 }
  0x13   : > { %v206_v0 = vld [vmem:[%s11589_s1 + $0x28] sm:$0xff]  ;;  %v205_v1 = vld [vmem:[%s11589_s1 + $0x20] sm:$0xff]  ;;  %p164_p10 = scmp.lt.s32.totalorder %s7101_s16, 1  ;;  %v204_v2 = vld [vmem:[%s11589_s1 + $0x18] sm:$0xff]  ;;  %vm207_vm0 = vcmask 392192   ;;  %vm721_vm1 = vcmask 523264  }
  0x14   : > { %6890 = vmatprep.subr.mxu0 %v206_v0  ;;  %v203_v3 = vld [vmem:[%s11589_s1 + $0x10] sm:$0xff]  ;;  %v202_v4 = vld [vmem:[%s11589_s1 + $0x8] sm:$0xff]  ;;  %v201_v6 = vld [vmem:[%s11589_s1] sm:$0xff]  ;;  %vm723_vm2 = vcmask 517120   ;;  %v7055_v44 = vmov 0.0   ;;  %s7056_s17 = smov 64  }
  0x15   : > { %6891 = vmatpush3.msra.mxu0 %v206_v0  ;;  %s165_s30 = scalar_select %p164_p10, %s7101_s16, 1  ;;  %v6138_v38 = vld [vmem:[%s11590_s2 + $0x1e8] sm:$0xff]  ;;  %v7226_v40 = vld [vmem:[%s11590_s2 + $0x1e0] sm:$0xff]  ;;  %765 = vst.msk [vmem:[#allocation2 + $0x150] sm:$0xff] %vm721_vm1, %v7055_v44  ;;  %725 = vst.msk [vmem:[#allocation2 + $0x10] sm:$0xff] %vm721_vm1, %v7055_v44  ;;  %1007 = vmatprep.mubr.f32.mxu1 %v7055_v44 }
  0x16   : > { %6892 = vmatprep.subr.mxu0 %v205_v1  ;;  %v874_v39 = vld [vmem:[%s11590_s2 + $0xe8] sm:$0xff]  ;;  %959 = vmatprep.subr.mxu1 %v6138_v38  ;;  %v7231_v41 = vld [vmem:[%s11590_s2 + $0xe0] sm:$0xff]  ;;  %766 = vst.msk [vmem:[#allocation2 + $0x158] sm:$0x3] %vm723_vm2, %v7055_v44  ;;  %726 = vst.msk [vmem:[#allocation2 + $0x18] sm:$0x3] %vm723_vm2, %v7055_v44 }
  0x17   : > { %6893 = vmatpush3.msra.mxu0 %v205_v1  ;;  %s6850_s6 = sshll.u32 %s165_s30, 8  ;;  %v7236_v42 = vld [vmem:[%s11590_s2 + $0x1c8] sm:$0xff]  ;;  %727 = vst.msk [vmem:[#allocation2 + $0x20] sm:$0xff] %vm721_vm1, %v7055_v44  ;;  %729 = vst.msk [vmem:[#allocation2 + $0x30] sm:$0xff] %vm721_vm1, %v7055_v44  ;;  %960 = vmatpush1.msra.mxu1 %v7226_v40  ;;  %v6133_v45 = vld [vmem:[%s11590_s2 + $0x1c0] sm:$0xff]  ;;  %s161_s25 = sand.u32 1, %s7045_s13  }
  0x18   : > { %6894 = vmatprep.subr.mxu0 %v204_v2  ;;  %s7145_s9 = scalar_lea.vmem %s11588_s0, %s6850_s6  ;;  %v7241_v43 = vld [vmem:[%s11590_s2 + $0xc8] sm:$0xff]  ;;  %728 = vst.msk [vmem:[#allocation2 + $0x28] sm:$0x3] %vm723_vm2, %v7055_v44  ;;  %730 = vst.msk [vmem:[#allocation2 + $0x38] sm:$0x3] %vm723_vm2, %v7055_v44  ;;  %v869_v46 = vld [vmem:[%s11590_s2 + $0xc0] sm:$0xff]  ;;  %961 = vmatprep.subr.mxu1 %v7236_v42 }
  0x19   : > { %6895 = vmatpush3.msra.mxu0 %v204_v2  ;;  %v169_v5 = vld [vmem:[%s7145_s9] sm:$0xff]  ;;  %v170_v7 = vld [vmem:[%s7145_s9 + $0x8] sm:$0xff]  ;;  %v171_v8 = vld [vmem:[%s7145_s9 + $0x10] sm:$0xff]  ;;  %731 = vst.msk [vmem:[#allocation2 + $0x40] sm:$0xff] %vm721_vm1, %v7055_v44  ;;  %962 = vmatpush1.msra.mxu1 %v6133_v45  ;;  %s6074_s26 = sshll.u32 %s161_s25, 7  ;;  %s6851_s28 = sshll.u32 %s7101_s16, 11 }
  0x1a   : > { %6896 = vmatprep.subr.mxu0 %v203_v3  ;;  %6902 = vmatprep.mubr.msk.f32.mxu0 %vm207_vm0, %v169_v5  ;;  %v172_v9 = vld [vmem:[%s7145_s9 + $0x18] sm:$0xff]  ;;  %v173_v10 = vld [vmem:[%s7145_s9 + $0x20] sm:$0xff]  ;;  %v174_v11 = vld [vmem:[%s7145_s9 + $0x28] sm:$0xff]  ;;  %732 = vst.msk [vmem:[#allocation2 + $0x48] sm:$0x3] %vm723_vm2, %v7055_v44  ;;  %s11452_s27 = scalar_lea.vmem [#allocation3], %s6074_s26  ;;  %s11540_s5 = scalar_lea.hbm %s11591_s3, %s6851_s28 }
  0x1b   : > { %6897 = vmatpush3.msra.mxu0 %v203_v3  ;;  %v175_v12 = vld [vmem:[%s7145_s9 + $0x30] sm:$0xff]  ;;  %v176_v13 = vld [vmem:[%s7145_s9 + $0x38] sm:$0xff]  ;;  %v177_v14 = vld [vmem:[%s7145_s9 + $0x40] sm:$0xff]  ;;  %733 = vst.msk [vmem:[#allocation2 + $0x50] sm:$0xff] %vm721_vm1, %v7055_v44  ;;  %s6008_s29 = sshll.u32 %s11452_s27, 4  ;;  %s7057_s6 = smov [#allocation3]   ;;  %s11542_s29 = int_to_ptr.vmem [resolvable:$true] %s6008_s29 }
  0x1c   : > { %6898 = vmatprep.subr.mxu0 %v202_v4  ;;  %v178_v15 = vld [vmem:[%s7145_s9 + $0x48] sm:$0xff]  ;;  %v179_v16 = vld [vmem:[%s7145_s9 + $0x50] sm:$0xff]  ;;  %v180_v17 = vld [vmem:[%s7145_s9 + $0x58] sm:$0xff]  ;;  %734 = vst.msk [vmem:[#allocation2 + $0x58] sm:$0x3] %vm723_vm2, %v7055_v44  ;;  %s6993_s16 = scalar_lea.vmem %s11542_s29, 2048 }
  0x1d   : > { %6899 = vmatpush3.msra.mxu0 %v202_v4  ;;  %v181_v18 = vld [vmem:[%s7145_s9 + $0x60] sm:$0xff]  ;;  %v182_v19 = vld [vmem:[%s7145_s9 + $0x68] sm:$0xff]  ;;  %v183_v20 = vld [vmem:[%s7145_s9 + $0x70] sm:$0xff]  ;;  %735 = vst.msk [vmem:[#allocation2 + $0x60] sm:$0xff] %vm721_vm1, %v7055_v44  ;;  %p6994_p11 = scmp.ne.s32.totalorder %s11542_s29, %s6993_s16  ;;  %s6997_s7 = sshll.u32 %s7057_s6, 4  ;;  %s6998_s7 = int_to_ptr.vmem [resolvable:$false] %s6997_s7 }
  0x1e   : > { %6900 = vmatprep.subr.mxu0 %v201_v6  ;;  %v184_v21 = vld [vmem:[%s7145_s9 + $0x78] sm:$0xff]  ;;  %v185_v22 = vld [vmem:[%s7145_s9 + $0x80] sm:$0xff]  ;;  %v186_v23 = vld [vmem:[%s7145_s9 + $0x88] sm:$0xff]  ;;  %736 = vst.msk [vmem:[#allocation2 + $0x68] sm:$0x3] %vm723_vm2, %v7055_v44  ;;  %s6999_s8 = scalar_lea.vmem %s6998_s7, 4096  ;;  %p7000_p0 = scmp.lt.s32.totalorder %s11542_s29, %s6998_s7 }
  0x1f   : > { %6901 = vmatpush3.msra.mxu0 %v201_v6  ;;  %v187_v24 = vld [vmem:[%s7145_s9 + $0x90] sm:$0xff]  ;;  %v188_v25 = vld [vmem:[%s7145_s9 + $0x98] sm:$0xff]  ;;  %v189_v26 = vld [vmem:[%s7145_s9 + $0xa0] sm:$0xff]  ;;  %737 = vst.msk [vmem:[#allocation2 + $0x70] sm:$0xff] %vm721_vm1, %v7055_v44  ;;  %p6995_p12 = pnand %p6994_p11, %p7118_p5  ;;  %p7001_p1 = scmp.lt.s32.totalorder %s6999_s8, %s6993_s16 }
  0x20   : > { %6903 = vmatmul.mubr.msk.f32.vlgmr.msra.gmra.mxu0 %vm207_vm0, %v170_v7  ;;  %v190_v27 = vld [vmem:[%s7145_s9 + $0xa8] sm:$0xff]  ;;  %v191_v28 = vld [vmem:[%s7145_s9 + $0xb0] sm:$0xff]  ;;  %v192_v29 = vld [vmem:[%s7145_s9 + $0xb8] sm:$0xff]  ;;  %1209 = vmatprep.subr.mxu0 %v874_v39  ;;  %738 = vst.msk [vmem:[#allocation2 + $0x78] sm:$0x3] %vm723_vm2, %v7055_v44 }
  0x21   : > { %6905 = vmatprep.mubr.msk.f32.mxu0 %vm207_vm0, %v171_v8  ;;  %v193_v30 = vld [vmem:[%s7145_s9 + $0xc0] sm:$0xff]  ;;  %v194_v31 = vld [vmem:[%s7145_s9 + $0xc8] sm:$0xff]  ;;  %v195_v32 = vld [vmem:[%s7145_s9 + $0xd0] sm:$0xff]  ;;  %739 = vst.msk [vmem:[#allocation2 + $0x80] sm:$0xff] %vm721_vm1, %v7055_v44  ;;  %1210 = vmatpush1.msra.mxu0 %v7231_v41  ;;  %p6996_p13 = pneg %p6995_p12  ;;  %p7002_p2 = por %p7001_p1, %p7000_p0 }
  0x22   : > { %v196_v33 = vld [vmem:[%s7145_s9 + $0xd8] sm:$0xff]  ;;  %v197_v34 = vld [vmem:[%s7145_s9 + $0xe0] sm:$0xff]  ;;  %v198_v35 = vld [vmem:[%s7145_s9 + $0xe8] sm:$0xff]  ;;  %740 = vst.msk [vmem:[#allocation2 + $0x88] sm:$0x3] %vm723_vm2, %v7055_v44  ;;  %1211 = vmatprep.subr.mxu0 %v7241_v43 }
  0x23   : > { %v199_v36 = vld [vmem:[%s7145_s9 + $0xf0] sm:$0xff]  ;;  %v200_v37 = vld [vmem:[%s7145_s9 + $0xf8] sm:$0xff]  ;;  %741 = vst.msk [vmem:[#allocation2 + $0x90] sm:$0xff] %vm721_vm1, %v7055_v44  ;;  %745 = vst.msk [vmem:[#allocation2 + $0xb0] sm:$0xff] %vm721_vm1, %v7055_v44  ;;  %1212 = vmatpush1.msra.mxu0 %v869_v46  ;;  %p7003_p3 = pnand %p7002_p2, %p6996_p13 }
  0x24   : > { %6906 = vmatmul.mubr.msk.f32.gmra.mxu0 %vm207_vm0, %v172_v9  ;;  %742 = vst.msk [vmem:[#allocation2 + $0x98] sm:$0x3] %vm723_vm2, %v7055_v44  ;;  %746 = vst.msk [vmem:[#allocation2 + $0xb8] sm:$0x3] %vm723_vm2, %v7055_v44  ;;  %v6130_v47 = vld [vmem:[%s11590_s2 + $0x1a8] sm:$0xff]  ;;  %v6129_v49 = vld [vmem:[%s11590_s2 + $0x1a0] sm:$0xff] }
  0x25   : > { %6908 = vmatprep.mubr.msk.f32.mxu0 %vm207_vm0, %v173_v10  ;;  %747 = vst.msk [vmem:[#allocation2 + $0xc0] sm:$0xff] %vm721_vm1, %v7055_v44  ;;  %749 = vst.msk [vmem:[#allocation2 + $0xd0] sm:$0xff] %vm721_vm1, %v7055_v44  ;;  %v866_v48 = vld [vmem:[%s11590_s2 + $0xa8] sm:$0xff]  ;;  %v865_v50 = vld [vmem:[%s11590_s2 + $0xa0] sm:$0xff]  ;;  %963 = vmatprep.subr.mxu1 %v6130_v47 }
  0x26   : > { %748 = vst.msk [vmem:[#allocation2 + $0xc8] sm:$0x3] %vm723_vm2, %v7055_v44  ;;  %750 = vst.msk [vmem:[#allocation2 + $0xd8] sm:$0x3] %vm723_vm2, %v7055_v44  ;;  %v6126_v51 = vld [vmem:[%s11590_s2 + $0x188] sm:$0xff]  ;;  %1213 = vmatprep.subr.mxu0 %v866_v48  ;;  %v6125_v53 = vld [vmem:[%s11590_s2 + $0x180] sm:$0xff]  ;;  %964 = vmatpush1.msra.mxu1 %v6129_v49 }
  0x27   : > { %751 = vst.msk [vmem:[#allocation2 + $0xe0] sm:$0xff] %vm721_vm1, %v7055_v44  ;;  %753 = vst.msk [vmem:[#allocation2 + $0xf0] sm:$0xff] %vm721_vm1, %v7055_v44  ;;  %v862_v52 = vld [vmem:[%s11590_s2 + $0x88] sm:$0xff]  ;;  %v861_v54 = vld [vmem:[%s11590_s2 + $0x80] sm:$0xff]  ;;  %1214 = vmatpush1.msra.mxu0 %v865_v50  ;;  %965 = vmatprep.subr.mxu1 %v6126_v51 }
  0x28   : > { %6909 = vmatmul.mubr.msk.f32.gmra.mxu0 %vm207_vm0, %v174_v11  ;;  %752 = vst.msk [vmem:[#allocation2 + $0xe8] sm:$0x3] %vm723_vm2, %v7055_v44  ;;  %754 = vst.msk [vmem:[#allocation2 + $0xf8] sm:$0x3] %vm723_vm2, %v7055_v44  ;;  %v6122_v55 = vld [vmem:[%s11590_s2 + $0x168] sm:$0xff]  ;;  %1215 = vmatprep.subr.mxu0 %v862_v52  ;;  %v6121_v57 = vld [vmem:[%s11590_s2 + $0x160] sm:$0xff] }
  0x29   : > { %6911 = vmatprep.mubr.msk.f32.mxu0 %vm207_vm0, %v175_v12  ;;  %755 = vst.msk [vmem:[#allocation2 + $0x100] sm:$0xff] %vm721_vm1, %v7055_v44  ;;  %757 = vst.msk [vmem:[#allocation2 + $0x110] sm:$0xff] %vm721_vm1, %v7055_v44  ;;  %v858_v56 = vld [vmem:[%s11590_s2 + $0x68] sm:$0xff]  ;;  %v857_v58 = vld [vmem:[%s11590_s2 + $0x60] sm:$0xff]  ;;  %966 = vmatpush1.msra.mxu1 %v6125_v53 }
  0x2a   : > { %756 = vst.msk [vmem:[#allocation2 + $0x108] sm:$0x3] %vm723_vm2, %v7055_v44  ;;  %758 = vst.msk [vmem:[#allocation2 + $0x118] sm:$0x3] %vm723_vm2, %v7055_v44  ;;  %1216 = vmatpush1.msra.mxu0 %v861_v54  ;;  %967 = vmatprep.subr.mxu1 %v6122_v55  ;;  %v6118_v6 = vld [vmem:[%s11590_s2 + $0x148] sm:$0xff]  ;;  %v6117_v9 = vld [vmem:[%s11590_s2 + $0x140] sm:$0xff] }
  0x2b   : > { %759 = vst.msk [vmem:[#allocation2 + $0x120] sm:$0xff] %vm721_vm1, %v7055_v44  ;;  %761 = vst.msk [vmem:[#allocation2 + $0x130] sm:$0xff] %vm721_vm1, %v7055_v44  ;;  %1217 = vmatprep.subr.mxu0 %v858_v56  ;;  %968 = vmatpush1.msra.mxu1 %v6121_v57  ;;  %v854_v7 = vld [vmem:[%s11590_s2 + $0x48] sm:$0xff]  ;;  %v853_v10 = vld [vmem:[%s11590_s2 + $0x40] sm:$0xff] }
  0x2c   : > { %6912 = vmatmul.mubr.msk.f32.gmra.mxu0 %vm207_vm0, %v176_v13  ;;  %760 = vst.msk [vmem:[#allocation2 + $0x128] sm:$0x3] %vm723_vm2, %v7055_v44  ;;  %762 = vst.msk [vmem:[#allocation2 + $0x138] sm:$0x3] %vm723_vm2, %v7055_v44  ;;  %969 = vmatprep.subr.mxu1 %v6118_v6  ;;  %v6114_v11 = vld [vmem:[%s11590_s2 + $0x128] sm:$0xff]  ;;  %v6127_v40 = vld [vmem:[%s11590_s2 + $0x190] sm:$0xff] }
  0x2d   : > { %6914 = vmatprep.mubr.msk.f32.mxu0 %vm207_vm0, %v177_v14  ;;  %763 = vst.msk [vmem:[#allocation2 + $0x140] sm:$0xff] %vm721_vm1, %v7055_v44  ;;  %767 = vst.msk [vmem:[#allocation2 + $0x160] sm:$0xff] %vm721_vm1, %v7055_v44  ;;  %1218 = vmatpush1.msra.mxu0 %v857_v58  ;;  %v850_v12 = vld [vmem:[%s11590_s2 + $0x28] sm:$0xff]  ;;  %v6113_v14 = vld [vmem:[%s11590_s2 + $0x120] sm:$0xff] }
  0x2e   : > { %764 = vst.msk [vmem:[#allocation2 + $0x148] sm:$0x3] %vm723_vm2, %v7055_v44  ;;  %768 = vst.msk [vmem:[#allocation2 + $0x168] sm:$0x3] %vm723_vm2, %v7055_v44  ;;  %1219 = vmatprep.subr.mxu0 %v854_v7  ;;  %970 = vmatpush1.msra.mxu1 %v6117_v9  ;;  %v6124_v41 = vld [vmem:[%s11590_s2 + $0x178] sm:$0xff]  ;;  %v6123_v45 = vld [vmem:[%s11590_s2 + $0x170] sm:$0xff] }
  0x2f   : > { %769 = vst.msk [vmem:[#allocation2 + $0x170] sm:$0xff] %vm721_vm1, %v7055_v44  ;;  %771 = vst.msk [vmem:[#allocation2 + $0x180] sm:$0xff] %vm721_vm1, %v7055_v44  ;;  %1220 = vmatpush1.msra.mxu0 %v853_v10  ;;  %971 = vmatprep.subr.mxu1 %v6114_v11  ;;  %v6120_v46 = vld [vmem:[%s11590_s2 + $0x158] sm:$0xff]  ;;  %v6119_v49 = vld [vmem:[%s11590_s2 + $0x150] sm:$0xff] }
  0x30   : > { %6915 = vmatmul.mubr.msk.f32.gmra.mxu0 %vm207_vm0, %v178_v15  ;;  %770 = vst.msk [vmem:[#allocation2 + $0x178] sm:$0x3] %vm723_vm2, %v7055_v44  ;;  %772 = vst.msk [vmem:[#allocation2 + $0x188] sm:$0x3] %vm723_vm2, %v7055_v44  ;;  %1221 = vmatprep.subr.mxu0 %v850_v12  ;;  %v849_v15 = vld [vmem:[%s11590_s2 + $0x20] sm:$0xff]  ;;  %v6116_v50 = vld [vmem:[%s11590_s2 + $0x138] sm:$0xff] }
  0x31   : > { %6917 = vmatprep.mubr.msk.f32.mxu0 %vm207_vm0, %v179_v16  ;;  %773 = vst.msk [vmem:[#allocation2 + $0x190] sm:$0xff] %vm721_vm1, %v7055_v44  ;;  %775 = vst.msk [vmem:[#allocation2 + $0x1a0] sm:$0xff] %vm721_vm1, %v7055_v44  ;;  %972 = vmatpush1.msra.mxu1 %v6113_v14  ;;  %v6110_v16 = vld [vmem:[%s11590_s2 + $0x108] sm:$0xff]  ;;  %v6115_v53 = vld [vmem:[%s11590_s2 + $0x130] sm:$0xff] }
  0x32   : > { %774 = vst.msk [vmem:[#allocation2 + $0x198] sm:$0x3] %vm723_vm2, %v7055_v44  ;;  %776 = vst.msk [vmem:[#allocation2 + $0x1a8] sm:$0x3] %vm723_vm2, %v7055_v44  ;;  %1222 = vmatpush1.msra.mxu0 %v849_v15  ;;  %973 = vmatprep.subr.mxu1 %v6110_v16  ;;  %v6112_v54 = vld [vmem:[%s11590_s2 + $0x118] sm:$0xff]  ;;  %v6111_v56 = vld [vmem:[%s11590_s2 + $0x110] sm:$0xff] }
  0x33   : > { %777 = vst.msk [vmem:[#allocation2 + $0x1b0] sm:$0xff] %vm721_vm1, %v7055_v44  ;;  %779 = vst.msk [vmem:[#allocation2 + $0x1c0] sm:$0xff] %vm721_vm1, %v7055_v44  ;;  %v6202_v57 = vld [vmem:[%s11590_s2 + $0x2e8] sm:$0xff]  ;;  %v876_v6 = vld [vmem:[%s11590_s2 + $0xf8] sm:$0xff] }
  0x34   : > { %6918 = vmatmul.mubr.msk.f32.gmra.mxu0 %vm207_vm0, %v180_v17  ;;  %778 = vst.msk [vmem:[#allocation2 + $0x1b8] sm:$0x3] %vm723_vm2, %v7055_v44  ;;  %780 = vst.msk [vmem:[#allocation2 + $0x1c8] sm:$0x3] %vm723_vm2, %v7055_v44  ;;  %v846_v17 = vld [vmem:[%s11590_s2 + $0x8] sm:$0xff]  ;;  %v6201_v7 = vld [vmem:[%s11590_s2 + $0x2e0] sm:$0xff] }
  0x35   : > { %6920 = vmatprep.mubr.msk.f32.mxu0 %vm207_vm0, %v181_v18  ;;  %783 = vst.msk [vmem:[#allocation2 + $0x1e0] sm:$0xff] %vm721_vm1, %v7055_v44  ;;  %785 = vst.msk [vmem:[#allocation2 + $0x1f0] sm:$0xff] %vm721_vm1, %v7055_v44  ;;  %1223 = vmatprep.subr.mxu0 %v846_v17  ;;  %v6198_v9 = vld [vmem:[%s11590_s2 + $0x2c8] sm:$0xff]  ;;  %v6197_v10 = vld [vmem:[%s11590_s2 + $0x2c0] sm:$0xff] }
  0x36   : > { %784 = vst.msk [vmem:[#allocation2 + $0x1e8] sm:$0x3] %vm723_vm2, %v7055_v44  ;;  %786 = vst.msk [vmem:[#allocation2 + $0x1f8] sm:$0x3] %vm723_vm2, %v7055_v44  ;;  %v6194_v11 = vld [vmem:[%s11590_s2 + $0x2a8] sm:$0xff]  ;;  %v6193_v12 = vld [vmem:[%s11590_s2 + $0x2a0] sm:$0xff] }
  0x37   : > { %787 = vst.msk [vmem:[#allocation2 + $0x200] sm:$0xff] %vm721_vm1, %v7055_v44  ;;  %789 = vst.msk [vmem:[#allocation2 + $0x210] sm:$0xff] %vm721_vm1, %v7055_v44  ;;  %v6190_v14 = vld [vmem:[%s11590_s2 + $0x288] sm:$0xff]  ;;  %v6189_v15 = vld [vmem:[%s11590_s2 + $0x280] sm:$0xff] }
  0x38   : > { %6921 = vmatmul.mubr.msk.f32.gmra.mxu0 %vm207_vm0, %v182_v19  ;;  %788 = vst.msk [vmem:[#allocation2 + $0x208] sm:$0x3] %vm723_vm2, %v7055_v44  ;;  %790 = vst.msk [vmem:[#allocation2 + $0x218] sm:$0x3] %vm723_vm2, %v7055_v44  ;;  %v6109_v19 = vld [vmem:[%s11590_s2 + $0x100] sm:$0xff]  ;;  %v6186_v16 = vld [vmem:[%s11590_s2 + $0x268] sm:$0xff] }
  0x39   : > { %6923 = vmatprep.mubr.msk.f32.mxu0 %vm207_vm0, %v183_v20  ;;  %791 = vst.msk [vmem:[#allocation2 + $0x220] sm:$0xff] %vm721_vm1, %v7055_v44  ;;  %793 = vst.msk [vmem:[#allocation2 + $0x230] sm:$0xff] %vm721_vm1, %v7055_v44  ;;  %v845_v20 = vld [vmem:[%s11590_s2] sm:$0xff]  ;;  %974 = vmatpush1.msra.mxu1 %v6109_v19  ;;  %v6182_v19 = vld [vmem:[%s11590_s2 + $0x248] sm:$0xff] }
  0x3a   : > { %792 = vst.msk [vmem:[#allocation2 + $0x228] sm:$0x3] %vm723_vm2, %v7055_v44  ;;  %794 = vst.msk [vmem:[#allocation2 + $0x238] sm:$0x3] %vm723_vm2, %v7055_v44  ;;  %1224 = vmatpush1.msra.mxu0 %v845_v20  ;;  %v6185_v17 = vld [vmem:[%s11590_s2 + $0x260] sm:$0xff] }
  0x3b   : > { %795 = vst.msk [vmem:[#allocation2 + $0x240] sm:$0xff] %vm721_vm1, %v7055_v44  ;;  %797 = vst.msk [vmem:[#allocation2 + $0x250] sm:$0xff] %vm721_vm1, %v7055_v44  ;;  %1500 = vmatprep.subr.mxu0 %v6202_v57  ;;  %v6181_v20 = vld [vmem:[%s11590_s2 + $0x240] sm:$0xff] }
  0x3c   : > { %6924 = vmatmul.mubr.msk.f32.gmra.mxu0 %vm207_vm0, %v184_v21  ;;  %796 = vst.msk [vmem:[#allocation2 + $0x248] sm:$0x3] %vm723_vm2, %v7055_v44  ;;  %798 = vst.msk [vmem:[#allocation2 + $0x258] sm:$0x3] %vm723_vm2, %v7055_v44  ;;  %v7499_v21 = vld [vmem:[#allocation2 + $0x141] sm:$0xff] }
  0x3d   : > { %6926 = vmatprep.mubr.msk.f32.mxu0 %vm207_vm0, %v185_v22  ;;  %799 = vst.msk [vmem:[#allocation2 + $0x260] sm:$0xff] %vm721_vm1, %v7055_v44  ;;  %v7501_v22 = vld [vmem:[#allocation2 + $0x1e0] sm:$0xff]  ;;  %6141 = vmatmul.mubr.msk.f32.vlgmr.msra.gmra.mxu1 %vm721_vm1, %v7499_v21 }
  0x3e   : > { %800 = vst.msk [vmem:[#allocation2 + $0x268] sm:$0x3] %vm723_vm2, %v7055_v44  ;;  %1013 = vmatprep.mubr.f32.mxu1 %v7055_v44 }
  0x40   : > { %6927 = vmatmul.mubr.msk.f32.gmra.mxu0 %vm207_vm0, %v186_v23 }
  0x41   : > { %6929 = vmatprep.mubr.msk.f32.mxu0 %vm207_vm0, %v187_v24 }
  0x44   : > { %6930 = vmatmul.mubr.msk.f32.gmra.mxu0 %vm207_vm0, %v188_v25  ;;  %v6140_v25 = vld [vmem:[%s11590_s2 + $0x1f8] sm:$0xff] }
  0x45   : > { %6932 = vmatprep.mubr.msk.f32.mxu0 %vm207_vm0, %v189_v26  ;;  %1072 = vmatprep.subr.mxu1 %v6140_v25  ;;  %v6178_v25 = vld [vmem:[%s11590_s2 + $0x228] sm:$0xff] }
  0x48   : > { %6933 = vmatmul.mubr.msk.f32.gmra.mxu0 %vm207_vm0, %v190_v27 }
  0x49   : > { %6935 = vmatprep.mubr.msk.f32.mxu0 %vm207_vm0, %v191_v28  ;;  %v6139_v28 = vld [vmem:[%s11590_s2 + $0x1f0] sm:$0xff] }
  0x4a   : > { %1073 = vmatpush1.msra.mxu1 %v6139_v28  ;;  %v6177_v28 = vld [vmem:[%s11590_s2 + $0x220] sm:$0xff] }
  0x4c   : > { %6936 = vmatmul.mubr.msk.f32.gmra.mxu0 %vm207_vm0, %v192_v29  ;;  %v6136_v29 = vld [vmem:[%s11590_s2 + $0x1d8] sm:$0xff] }
  0x4d   : > { %6938 = vmatprep.mubr.msk.f32.mxu0 %vm207_vm0, %v193_v30  ;;  %1074 = vmatprep.subr.mxu1 %v6136_v29  ;;  %v6174_v29 = vld [vmem:[%s11590_s2 + $0x208] sm:$0xff] }
  0x50   : > { %6939 = vmatmul.mubr.msk.f32.gmra.mxu0 %vm207_vm0, %v194_v31 }
  0x51   : > { %6941 = vmatprep.mubr.msk.f32.mxu0 %vm207_vm0, %v195_v32  ;;  %v6135_v32 = vld [vmem:[%s11590_s2 + $0x1d0] sm:$0xff] }
  0x52   : > { %1075 = vmatpush1.msra.mxu1 %v6135_v32  ;;  %v6173_v32 = vld [vmem:[%s11590_s2 + $0x200] sm:$0xff] }
  0x54   : > { %6942 = vmatmul.mubr.msk.f32.gmra.mxu0 %vm207_vm0, %v196_v33  ;;  %v6132_v33 = vld [vmem:[%s11590_s2 + $0x1b8] sm:$0xff] }
  0x55   : > { %6944 = vmatprep.mubr.msk.f32.mxu0 %vm207_vm0, %v197_v34  ;;  %1076 = vmatprep.subr.mxu1 %v6132_v33  ;;  %v6250_v33 = vld [vmem:[%s11590_s2 + $0x3e8] sm:$0xff] }
  0x58   : > { %6945 = vmatmul.mubr.msk.f32.gmra.mxu0 %vm207_vm0, %v198_v35 }
  0x59   : > { %6947 = vmatprep.mubr.msk.f32.mxu0 %vm207_vm0, %v199_v36  ;;  %v6131_v36 = vld [vmem:[%s11590_s2 + $0x1b0] sm:$0xff] }
  0x5a   : > { %1077 = vmatpush1.msra.mxu1 %v6131_v36 }
  0x5c   : > { %6948 = vmatmul.mubr.msk.f32.gmra.mxu0 %vm207_vm0, %v200_v37  ;;  %v6128_v37 = vld [vmem:[%s11590_s2 + $0x198] sm:$0xff] }
  0x5d   : > { %1257 = vmatprep.mubr.f32.mxu0 %v7055_v44  ;;  %1078 = vmatprep.subr.mxu1 %v6128_v37 }
  0x5e   : > { %1079 = vmatpush1.msra.mxu1 %v6127_v40 }
  0x5f   : > { %1080 = vmatprep.subr.mxu1 %v6124_v41 }
  0x60   : > { %6157 = vmatmul.mubr.msk.f32.vlgmr.msra.gmra.mxu0 %vm721_vm1, %v7501_v22  ;;  %1081 = vmatpush1.msra.mxu1 %v6123_v45 }
  0x61   : > { %1263 = vmatprep.mubr.f32.mxu0 %v7055_v44  ;;  %1082 = vmatprep.subr.mxu1 %v6120_v46 }
  0x62   : > { %1083 = vmatpush1.msra.mxu1 %v6119_v49  ;;  %1501 = vmatpush1.msra.mxu0 %v6201_v7 }
  0x63   : > { %1084 = vmatprep.subr.mxu1 %v6116_v50  ;;  %1502 = vmatprep.subr.mxu0 %v6198_v9 }
  0x64   : > { %1085 = vmatpush1.msra.mxu1 %v6115_v53  ;;  %1503 = vmatpush1.msra.mxu0 %v6197_v10 }
  0x65   : > { %1086 = vmatprep.subr.mxu1 %v6112_v54  ;;  %1504 = vmatprep.subr.mxu0 %v6194_v11 }
  0x66   : > { %1087 = vmatpush1.msra.mxu1 %v6111_v56  ;;  %1505 = vmatpush1.msra.mxu0 %v6193_v12 }
  0x67   : > { %1322 = vmatprep.subr.mxu1 %v876_v6  ;;  %1506 = vmatprep.subr.mxu0 %v6190_v14 }
  0x68   : > { %1507 = vmatpush1.msra.mxu0 %v6189_v15 }
  0x69   : > { %1508 = vmatprep.subr.mxu0 %v6186_v16 }
  0x6a   : > { %1509 = vmatpush1.msra.mxu0 %v6185_v17 }
  0x6b   : > { %1510 = vmatprep.subr.mxu0 %v6182_v19 }
  0x6c   : > { %1511 = vmatpush1.msra.mxu0 %v6181_v20 }
  0x6d   : > { %1512 = vmatprep.subr.mxu0 %v6178_v25 }
  0x6e   : > { %1513 = vmatpush1.msra.mxu0 %v6177_v28 }
  0x6f   : > { %1514 = vmatprep.subr.mxu0 %v6174_v29 }
  0x70   : > { %1515 = vmatpush1.msra.mxu0 %v6173_v32 }
  0x71   : > { %1823 = vmatprep.subr.mxu0 %v6250_v33 }
  0xe0   : > { %v7435_v59 = vpop.f32.mrf.mxu0 }
  0xe2   : > { %v7437_v60 = vpop.f32.mrf.mxu0 }
  0xe4   : > { %v7439_v61 = vpop.f32.mrf.mxu0 }
  0xe6   : > { %v7441_v62 = vpop.f32.mrf.mxu0 }
  0xe8   : > { %v7443_v63 = vpop.f32.mrf.mxu0 }
  0xea   : > { %v7445_v0 = vpop.f32.mrf.mxu0 }
  0xec   : > { %v7447_v1 = vpop.f32.mrf.mxu0 }
  0xee   : > { %v7449_v2 = vpop.f32.mrf.mxu0 }
  0xf0   : > { %v7451_v3 = vpop.f32.mrf.mxu0 }
  0xf2   : > { %v7453_v4 = vpop.f32.mrf.mxu0 }
  0xf4   : > { %v7455_v5 = vpop.f32.mrf.mxu0 }
  0xf6   : > { %v7463_v8 = vpop.f32.mrf.mxu0 }
  0xf8   : > { %v7477_v13 = vpop.f32.mrf.mxu0 }
  0xfa   : > { %v7491_v18 = vpop.f32.mrf.mxu0 }
  0xfc   : > { %v7503_v23 = vpop.f32.mrf.mxu0 }
  0xfe   : > { %v7511_v24 = vpop.f32.mrf.mxu0 }
 0x100   : > { %v7516_v26 = vpop.f32.mrf.mxu0 }
 0x102   : > { %v7518_v27 = vpop.f32.mrf.mxu0 }
 0x103   : > { %593 = vrot.lane.b32.xlu0 %v7518_v27, %s7056_s17 }
 0x104   : > { %v7528_v30 = vpop.f32.mrf.mxu0 }
 0x106   : > { %v7530_v31 = vpop.f32.mrf.mxu0 }
 0x107   : > { %595 = vrot.lane.b32.xlu0 %v7516_v26, %s7056_s17  ;;  %597 = vrot.lane.b32.xlu1 %v7530_v31, %s7056_s17 }
 0x108   : > { %v7542_v34 = vpop.f32.mrf.mxu0 }
 0x10a   : > { %v7544_v35 = vpop.f32.mrf.mxu0 }
 0x10b   : > { %599 = vrot.lane.b32.xlu1 %v7528_v30, %s7056_s17  ;;  %601 = vrot.lane.b32.xlu0 %v7544_v35, %s7056_s17 }
 0x10c   : > { %v7556_v38 = vpop.f32.mrf.mxu0 }
 0x10e   : > { %v7558_v39 = vpop.f32.mrf.mxu0 }
 0x10f   : > { %603 = vrot.lane.b32.xlu1 %v7542_v34, %s7056_s17  ;;  %605 = vrot.lane.b32.xlu0 %v7558_v39, %s7056_s17 }
 0x110   : > { %v7570_v42 = vpop.f32.mrf.mxu0 }
 0x112   : > { %v7572_v43 = vpop.f32.mrf.mxu0 }
 0x113   : > { %611 = vrot.lane.b32.xlu0 %v7570_v42, %s7056_s17  ;;  %609 = vrot.lane.b32.xlu1 %v7572_v43, %s7056_s17 }
 0x114   : > { %v7584_v47 = vpop.f32.mrf.mxu0 }
 0x116   : > { %v7586_v48 = vpop.f32.mrf.mxu0 }
 0x117   : > { %615 = vrot.lane.b32.xlu0 %v7584_v47, %s7056_s17  ;;  %613 = vrot.lane.b32.xlu1 %v7586_v48, %s7056_s17 }
 0x118   : > { %v7598_v51 = vpop.f32.mrf.mxu0 }
 0x11a   : > { %v7600_v52 = vpop.f32.mrf.mxu0 }
 0x11b   : > { %619 = vrot.lane.b32.xlu0 %v7598_v51, %s7056_s17  ;;  %617 = vrot.lane.b32.xlu1 %v7600_v52, %s7056_s17 }
 0x11c   : > { %v7612_v55 = vpop.f32.mrf.mxu0 }
 0x11e   : > { %v7620_v58 = vpop.f32.mrf.mxu0 }
 0x11f   : > { %577 = vrot.lane.b32.xlu0 %v7453_v4, %s7056_s17  ;;  %621 = vrot.lane.b32.xlu1 %v7620_v58, %s7056_s17 }
 0x123   : > { %581 = vrot.lane.b32.xlu0 %v7463_v8, %s7056_s17  ;;  %579 = vrot.lane.b32.xlu1 %v7451_v3, %s7056_s17 }
 0x127   : > { %585 = vrot.lane.b32.xlu0 %v7491_v18, %s7056_s17  ;;  %583 = vrot.lane.b32.xlu1 %v7455_v5, %s7056_s17 }
 0x12b   : > { %589 = vrot.lane.b32.xlu0 %v7511_v24, %s7056_s17  ;;  %587 = vrot.lane.b32.xlu1 %v7477_v13, %s7056_s17 }
 0x12f   : > { %561 = vrot.lane.b32.xlu0 %v7437_v60, %s7056_s17  ;;  %591 = vrot.lane.b32.xlu1 %v7503_v23, %s7056_s17 }
 0x133   : > { %565 = vrot.lane.b32.xlu0 %v7441_v62, %s7056_s17  ;;  %563 = vrot.lane.b32.xlu1 %v7435_v59, %s7056_s17 }
 0x137   : > { %569 = vrot.lane.b32.xlu0 %v7445_v0, %s7056_s17  ;;  %567 = vrot.lane.b32.xlu1 %v7439_v61, %s7056_s17 }
 0x13b   : > { %573 = vrot.lane.b32.xlu0 %v7449_v2, %s7056_s17  ;;  %571 = vrot.lane.b32.xlu1 %v7443_v63, %s7056_s17 }
 0x13f   : > { %623 = vrot.lane.b32.xlu0 %v7612_v55, %s7056_s17  ;;  %575 = vrot.lane.b32.xlu1 %v7447_v1, %s7056_s17 }
 0x143   : > { %607 = vrot.lane.b32.xlu1 %v7556_v38, %s7056_s17  ;;  %s11548_s17 = scalar_lea.sflag [#allocation4], %s161_s25 }
 0x175   : > { %v594_v36 = vpop.permute.xlu0 %593 }
 0x176   : > { %v673_v37 = vmul.f32 %v594_v36, %v7518_v27 }
 0x178   : > { %v705_v40 = vadd.f32 %v673_v37, %v7518_v27 }
 0x179   : > { %v596_v41 = vpop.permute.xlu0 %595  ;;  %v598_v45 = vpop.permute.xlu1 %597 }
 0x17a   : > { %820 = vst.msk [vmem:[#allocation2 + $0x151] sm:$0xff] %vm721_vm1, %v705_v40  ;;  %v674_v46 = vmul.f32 %v7516_v26, %v596_v41  ;;  %v675_v49 = vmul.f32 %v598_v45, %v7530_v31 }
 0x17c   : > { %v706_v50 = vadd.f32 %v7516_v26, %v674_v46  ;;  %v707_v53 = vadd.f32 %v675_v49, %v7530_v31 }
 0x17d   : > { %v600_v54 = vpop.permute.xlu1 %599  ;;  %v602_v56 = vpop.permute.xlu0 %601 }
 0x17e   : > { %821 = vst.msk [vmem:[#allocation2 + $0x161] sm:$0xff] %vm721_vm1, %v706_v50  ;;  %822 = vst.msk [vmem:[#allocation2 + $0x171] sm:$0xff] %vm721_vm1, %v707_v53  ;;  %v676_v27 = vmul.f32 %v7528_v30, %v600_v54  ;;  %v677_v57 = vmul.f32 %v602_v56, %v7544_v35 }
 0x180   : > { %v708_v6 = vadd.f32 %v7528_v30, %v676_v27  ;;  %v709_v7 = vadd.f32 %v677_v57, %v7544_v35 }
 0x181   : > { %v604_v9 = vpop.permute.xlu1 %603  ;;  %v606_v10 = vpop.permute.xlu0 %605  ;;  %v7724_v11 = vld [vmem:[#allocation2 + $0x151] sm:$0xff] }
 0x182   : > { %823 = vst.msk [vmem:[#allocation2 + $0x181] sm:$0xff] %vm721_vm1, %v708_v6  ;;  %824 = vst.msk [vmem:[#allocation2 + $0x191] sm:$0xff] %vm721_vm1, %v709_v7  ;;  %v678_v26 = vmul.f32 %v7542_v34, %v604_v9  ;;  %v679_v31 = vmul.f32 %v606_v10, %v7558_v39  ;;  %6142 = vmatmul.mubr.msk.f32.gmra.mxu1 %vm721_vm1, %v7724_v11 }
 0x183   : > { %1019 = vmatprep.mubr.f32.mxu1 %v7055_v44 }
 0x184   : > { %v710_v30 = vadd.f32 %v7542_v34, %v678_v26  ;;  %v711_v35 = vadd.f32 %v679_v31, %v7558_v39 }
 0x185   : > { %v612_v12 = vpop.permute.xlu0 %611  ;;  %v610_v14 = vpop.permute.xlu1 %609  ;;  %v7735_v15 = vld [vmem:[#allocation2 + $0x161] sm:$0xff]  ;;  %v7746_v25 = vld [vmem:[#allocation2 + $0x171] sm:$0xff] }
 0x186   : > { %825 = vst.msk [vmem:[#allocation2 + $0x1a1] sm:$0xff] %vm721_vm1, %v710_v30  ;;  %826 = vst.msk [vmem:[#allocation2 + $0x1b1] sm:$0xff] %vm721_vm1, %v711_v35  ;;  %v682_v16 = vmul.f32 %v7570_v42, %v612_v12  ;;  %v681_v17 = vmul.f32 %v610_v14, %v7572_v43  ;;  %6143 = vmatmul.mubr.msk.f32.gmra.mxu1 %vm721_vm1, %v7735_v15  ;;  %v875_v12 = vld [vmem:[%s11590_s2 + $0xf0] sm:$0xff] }
 0x187   : > { %1025 = vmatprep.mubr.f32.mxu1 %v7055_v44 }
 0x188   : > { %v714_v34 = vadd.f32 %v7570_v42, %v682_v16  ;;  %v713_v39 = vadd.f32 %v681_v17, %v7572_v43 }
 0x189   : > { %v616_v19 = vpop.permute.xlu0 %615  ;;  %v614_v20 = vpop.permute.xlu1 %613  ;;  %v7757_v36 = vld [vmem:[#allocation2 + $0x181] sm:$0xff]  ;;  %v7768_v46 = vld [vmem:[#allocation2 + $0x191] sm:$0xff] }
 0x18a   : > { %829 = vst.msk [vmem:[#allocation2 + $0x201] sm:$0xff] %vm721_vm1, %v714_v34  ;;  %828 = vst.msk [vmem:[#allocation2 + $0x1f1] sm:$0xff] %vm721_vm1, %v713_v39  ;;  %v684_v28 = vmul.f32 %v7584_v47, %v616_v19  ;;  %v683_v29 = vmul.f32 %v614_v20, %v7586_v48  ;;  %6144 = vmatmul.mubr.msk.f32.gmra.mxu1 %vm721_vm1, %v7746_v25  ;;  %v872_v34 = vld [vmem:[%s11590_s2 + $0xd8] sm:$0xff]  ;;  %v871_v39 = vld [vmem:[%s11590_s2 + $0xd0] sm:$0xff] }
 0x18b   : > { %1031 = vmatprep.mubr.f32.mxu1 %v7055_v44 }
 0x18c   : > { %v716_v42 = vadd.f32 %v7584_v47, %v684_v28  ;;  %v715_v43 = vadd.f32 %v683_v29, %v7586_v48 }
 0x18d   : > { %v620_v32 = vpop.permute.xlu0 %619  ;;  %v618_v33 = vpop.permute.xlu1 %617  ;;  %v7784_v27 = vld [vmem:[#allocation2 + $0x1a1] sm:$0xff]  ;;  %v7800_v26 = vld [vmem:[#allocation2 + $0x1b1] sm:$0xff] }
 0x18e   : > { %831 = vst.msk [vmem:[#allocation2 + $0x221] sm:$0xff] %vm721_vm1, %v716_v42  ;;  %830 = vst.msk [vmem:[#allocation2 + $0x211] sm:$0xff] %vm721_vm1, %v715_v43  ;;  %v686_v37 = vmul.f32 %v7598_v51, %v620_v32  ;;  %v685_v40 = vmul.f32 %v618_v33, %v7600_v52  ;;  %6145 = vmatmul.mubr.msk.f32.gmra.mxu1 %vm721_vm1, %v7757_v36  ;;  %v867_v43 = vld [vmem:[%s11590_s2 + $0xb0] sm:$0xff]  ;;  %v864_v32 = vld [vmem:[%s11590_s2 + $0x98] sm:$0xff] }
 0x18f   : > { %1037 = vmatprep.mubr.f32.mxu1 %v7055_v44 }
 0x190   : > { %v718_v47 = vadd.f32 %v7598_v51, %v686_v37  ;;  %v717_v48 = vadd.f32 %v685_v40, %v7600_v52 }
 0x191   : > { %v578_v41 = vpop.permute.xlu0 %577  ;;  %v622_v45 = vpop.permute.xlu1 %621  ;;  %v7770_v49 = vld [vmem:[#allocation2 + $0x1f0] sm:$0xff]  ;;  %v7786_v57 = vld [vmem:[#allocation2 + $0x200] sm:$0xff] }
 0x192   : > { %833 = vst.msk [vmem:[#allocation2 + $0x241] sm:$0xff] %vm721_vm1, %v718_v47  ;;  %832 = vst.msk [vmem:[#allocation2 + $0x231] sm:$0xff] %vm721_vm1, %v717_v48  ;;  %v665_v50 = vmul.f32 %v578_v41, %v7453_v4  ;;  %v687_v53 = vmul.f32 %v622_v45, %v7620_v58  ;;  %6146 = vmatmul.mubr.msk.f32.gmra.mxu1 %vm721_vm1, %v7768_v46  ;;  %6158 = vmatmul.mubr.msk.f32.gmra.mxu0 %vm721_vm1, %v7770_v49  ;;  %v863_v48 = vld [vmem:[%s11590_s2 + $0x90] sm:$0xff]  ;;  %v860_v41 = vld [vmem:[%s11590_s2 + $0x78] sm:$0xff] }
 0x193   : > { %1043 = vmatprep.mubr.f32.mxu1 %v7055_v44  ;;  %1269 = vmatprep.mubr.f32.mxu0 %v7055_v44 }
 0x194   : > { %v697_v51 = vadd.f32 %v665_v50, %v7453_v4  ;;  %v719_v52 = vadd.f32 %v687_v53, %v7620_v58 }
 0x195   : > { %v582_v54 = vpop.permute.xlu0 %581  ;;  %v580_v56 = vpop.permute.xlu1 %579  ;;  %v7802_v31 = vld [vmem:[#allocation2 + $0x210] sm:$0xff]  ;;  %v7819_v17 = vld [vmem:[#allocation2 + $0x220] sm:$0xff] }
 0x196   : > { %812 = vst.msk [vmem:[#allocation2 + $0xb1] sm:$0xff] %vm721_vm1, %v697_v51  ;;  %834 = vst.msk [vmem:[#allocation2 + $0x251] sm:$0xff] %vm721_vm1, %v719_v52  ;;  %v667_v6 = vmul.f32 %v582_v54, %v7463_v8  ;;  %v666_v7 = vmul.f32 %v7451_v3, %v580_v56  ;;  %6147 = vmatmul.mubr.msk.f32.gmra.mxu1 %vm721_vm1, %v7784_v27  ;;  %6159 = vmatmul.mubr.msk.f32.gmra.mxu0 %vm721_vm1, %v7786_v57  ;;  %v7900_v56 = vld [vmem:[#allocation2 + $0x1e1] sm:$0xff] }
 0x197   : > { %1049 = vmatprep.mubr.f32.mxu1 %v7055_v44  ;;  %1275 = vmatprep.mubr.f32.mxu0 %v7055_v44 }
 0x198   : > { %v699_v4 = vadd.f32 %v667_v6, %v7463_v8  ;;  %v698_v58 = vadd.f32 %v7451_v3, %v666_v7 }
 0x199   : > { %v586_v9 = vpop.permute.xlu0 %585  ;;  %v584_v10 = vpop.permute.xlu1 %583  ;;  %v7842_v42 = vld [vmem:[#allocation2 + $0x230] sm:$0xff] }
 0x19a   : > { %814 = vst.msk [vmem:[#allocation2 + $0xd1] sm:$0xff] %vm721_vm1, %v699_v4  ;;  %813 = vst.msk [vmem:[#allocation2 + $0xc1] sm:$0xff] %vm721_vm1, %v698_v58  ;;  %v669_v30 = vmul.f32 %v586_v9, %v7491_v18  ;;  %v668_v35 = vmul.f32 %v7455_v5, %v584_v10  ;;  %6148 = vmatmul.mubr.msk.f32.gmra.mxu1 %vm721_vm1, %v7800_v26  ;;  %6160 = vmatmul.mubr.msk.f32.gmra.mxu0 %vm721_vm1, %v7802_v31  ;;  %v855_v58 = vld [vmem:[%s11590_s2 + $0x50] sm:$0xff]  ;;  %v6249_v9 = vld [vmem:[%s11590_s2 + $0x3e0] sm:$0xff] }
 0x19b   : > { %1120 = vmatprep.mubr.f32.mxu1 %v7055_v44  ;;  %1281 = vmatprep.mubr.f32.mxu0 %v7055_v44  ;;  %v852_v10 = vld [vmem:[%s11590_s2 + $0x38] sm:$0xff] }
 0x19c   : > { %v701_v3 = vadd.f32 %v669_v30, %v7491_v18  ;;  %v700_v8 = vadd.f32 %v7455_v5, %v668_v35  ;;  %v6246_v30 = vld [vmem:[%s11590_s2 + $0x3c8] sm:$0xff] }
 0x19d   : > { %v590_v14 = vpop.permute.xlu0 %589  ;;  %v588_v16 = vpop.permute.xlu1 %587  ;;  %v7882_v52 = vld [vmem:[#allocation2 + $0x250] sm:$0xff] }
 0x19e   : > { %816 = vst.msk [vmem:[#allocation2 + $0xf1] sm:$0xff] %vm721_vm1, %v701_v3  ;;  %815 = vst.msk [vmem:[#allocation2 + $0xe1] sm:$0xff] %vm721_vm1, %v700_v8  ;;  %v671_v18 = vmul.f32 %v590_v14, %v7511_v24  ;;  %v670_v5 = vmul.f32 %v7477_v13, %v588_v16  ;;  %6149 = vmatmul.mubr.msk.f32.vlgmr.msra.gmra.mxu1 %vm721_vm1, %v7499_v21  ;;  %6161 = vmatmul.mubr.msk.f32.gmra.mxu0 %vm721_vm1, %v7819_v17  ;;  %v868_v21 = vld [vmem:[%s11590_s2 + $0xb8] sm:$0xff]  ;;  %v851_v14 = vld [vmem:[%s11590_s2 + $0x30] sm:$0xff] }
 0x19f   : > { %1323 = vmatpush1.msra.mxu1 %v875_v12  ;;  %1126 = vmatprep.mubr.f32.mxu1 %v7055_v44  ;;  %v7928_v12 = vld [vmem:[#allocation2 + $0x1f1] sm:$0xff]  ;;  %v6245_v16 = vld [vmem:[%s11590_s2 + $0x3c0] sm:$0xff] }
 0x1a0   : > { %v703_v19 = vadd.f32 %v671_v18, %v7511_v24  ;;  %v702_v20 = vadd.f32 %v7477_v13, %v670_v5  ;;  %1287 = vmatprep.mubr.f32.mxu0 %v7055_v44  ;;  %1324 = vmatprep.subr.mxu1 %v872_v34  ;;  %v848_v34 = vld [vmem:[%s11590_s2 + $0x18] sm:$0xff]  ;;  %v6242_v18 = vld [vmem:[%s11590_s2 + $0x3a8] sm:$0xff] }
 0x1a1   : > { %v562_v28 = vpop.permute.xlu0 %561  ;;  %v592_v29 = vpop.permute.xlu1 %591  ;;  %1325 = vmatpush1.msra.mxu1 %v871_v39 }
 0x1a2   : > { %818 = vst.msk [vmem:[#allocation2 + $0x111] sm:$0xff] %vm721_vm1, %v703_v19  ;;  %817 = vst.msk [vmem:[#allocation2 + $0x101] sm:$0xff] %vm721_vm1, %v702_v20  ;;  %v657_v13 = vmul.f32 %v562_v28, %v7437_v60  ;;  %v672_v24 = vmul.f32 %v7503_v23, %v592_v29  ;;  %6150 = vmatmul.mubr.msk.f32.gmra.mxu1 %vm721_vm1, %v7724_v11  ;;  %6162 = vmatmul.mubr.msk.f32.gmra.mxu0 %vm721_vm1, %v7842_v42  ;;  %v7862_v11 = vld [vmem:[#allocation2 + $0x240] sm:$0xff]  ;;  %v847_v20 = vld [vmem:[%s11590_s2 + $0x10] sm:$0xff] }
 0x1a3   : > { %1132 = vmatprep.mubr.f32.mxu1 %v7055_v44  ;;  %1326 = vmatprep.subr.mxu1 %v868_v21  ;;  %v7954_v19 = vld [vmem:[#allocation2 + $0x201] sm:$0xff] }
 0x1a4   : > { %v689_v33 = vadd.f32 %v657_v13, %v7437_v60  ;;  %v704_v37 = vadd.f32 %v7503_v23, %v672_v24  ;;  %1293 = vmatprep.mubr.f32.mxu0 %v7055_v44  ;;  %1327 = vmatpush1.msra.mxu1 %v867_v43  ;;  %v6241_v21 = vld [vmem:[%s11590_s2 + $0x3a0] sm:$0xff]  ;;  %v6238_v28 = vld [vmem:[%s11590_s2 + $0x388] sm:$0xff]  ;;  %v6203_v13 = vld [vmem:[%s11590_s2 + $0x2f0] sm:$0xff]  ;;  %v1009_v24 = vpop.f32.mrf.mxu1 }
 0x1a5   : > { %v566_v40 = vpop.permute.xlu0 %565  ;;  %v564_v47 = vpop.permute.xlu1 %563  ;;  %1328 = vmatprep.subr.mxu1 %v864_v32  ;;  %v6237_v43 = vld [vmem:[%s11590_s2 + $0x380] sm:$0xff] }
 0x1a6   : > { %804 = vst.msk [vmem:[#allocation2 + $0x11] sm:$0xff] %vm721_vm1, %v689_v33  ;;  %819 = vst.msk [vmem:[#allocation2 + $0x121] sm:$0xff] %vm721_vm1, %v704_v37  ;;  %v659_v60 = vmul.f32 %v566_v40, %v7441_v62  ;;  %v658_v23 = vmul.f32 %v7435_v59, %v564_v47  ;;  %6151 = vmatmul.mubr.msk.f32.gmra.mxu1 %vm721_vm1, %v7735_v15  ;;  %6163 = vmatmul.mubr.msk.f32.gmra.mxu0 %vm721_vm1, %v7862_v11  ;;  %v859_v15 = vld [vmem:[%s11590_s2 + $0x70] sm:$0xff]  ;;  %v1259_v32 = vpop.f32.mrf.mxu0  ;;  %v7996_v33 = vld [vmem:[#allocation2 + $0x221] sm:$0xff] }
 0x1a7   : > { %1138 = vmatprep.mubr.f32.mxu1 %v7055_v44  ;;  %1299 = vmatprep.mubr.f32.mxu0 %v7055_v44  ;;  %v8001_v37 = vadd.f32 %v1259_v32, %v1009_v24  ;;  %v6199_v40 = vld [vmem:[%s11590_s2 + $0x2d0] sm:$0xff]  ;;  %v6233_v47 = vld [vmem:[%s11590_s2 + $0x360] sm:$0xff] }
 0x1a8   : > { %v691_v45 = vadd.f32 %v659_v60, %v7441_v62  ;;  %v690_v50 = vadd.f32 %v7435_v59, %v658_v23  ;;  %1329 = vmatpush1.msra.mxu1 %v863_v48  ;;  %v856_v59 = vld [vmem:[%s11590_s2 + $0x58] sm:$0xff]  ;;  %v6230_v60 = vld [vmem:[%s11590_s2 + $0x348] sm:$0xff]  ;;  %v6195_v23 = vld [vmem:[%s11590_s2 + $0x2b0] sm:$0xff] }
 0x1a9   : > { %v570_v53 = vpop.permute.xlu0 %569  ;;  %v568_v51 = vpop.permute.xlu1 %567  ;;  %1330 = vmatprep.subr.mxu1 %v860_v41  ;;  %v8015_v48 = vld [vmem:[#allocation2 + $0x231] sm:$0xff]  ;;  %v6229_v41 = vld [vmem:[%s11590_s2 + $0x340] sm:$0xff] }
 0x1aa   : > { %806 = vst.msk [vmem:[#allocation2 + $0x31] sm:$0xff] %vm721_vm1, %v691_v45  ;;  %805 = vst.msk [vmem:[#allocation2 + $0x21] sm:$0xff] %vm721_vm1, %v690_v50  ;;  %v661_v54 = vmul.f32 %v570_v53, %v7445_v0  ;;  %v660_v62 = vmul.f32 %v7439_v61, %v568_v51  ;;  %6152 = vmatmul.mubr.msk.f32.gmra.mxu1 %vm721_vm1, %v7746_v25  ;;  %6164 = vmatmul.mubr.msk.f32.gmra.mxu0 %vm721_vm1, %v7882_v52  ;;  %v8035_v45 = vld [vmem:[#allocation2 + $0x241] sm:$0xff]  ;;  %v6191_v53 = vld [vmem:[%s11590_s2 + $0x290] sm:$0xff] }
 0x1ab   : > { %1144 = vmatprep.mubr.f32.mxu1 %v7055_v44  ;;  %1548 = vmatprep.mubr.f32.mxu0 %v7055_v44  ;;  %v6226_v50 = vld [vmem:[%s11590_s2 + $0x328] sm:$0xff]  ;;  %v6225_v51 = vld [vmem:[%s11590_s2 + $0x320] sm:$0xff]  ;;  %v8240_v24 = vld [vmem:[#allocation2 + $0xb0] sm:$0xff] }
 0x1ac   : > { %v693_v6 = vadd.f32 %v661_v54, %v7445_v0  ;;  %v692_v7 = vadd.f32 %v7439_v61, %v660_v62  ;;  %1331 = vmatpush1.msra.mxu1 %v859_v15  ;;  %v8058_v15 = vld [vmem:[#allocation2 + $0x251] sm:$0xff]  ;;  %v6221_v62 = vld [vmem:[%s11590_s2 + $0x300] sm:$0xff] }
 0x1ad   : > { %v574_v4 = vpop.permute.xlu0 %573  ;;  %v572_v25 = vpop.permute.xlu1 %571  ;;  %1332 = vmatprep.subr.mxu1 %v856_v59  ;;  %v6188_v54 = vld [vmem:[%s11590_s2 + $0x278] sm:$0xff]  ;;  %v6187_v59 = vld [vmem:[%s11590_s2 + $0x270] sm:$0xff] }
 0x1ae   : > { %808 = vst.msk [vmem:[#allocation2 + $0x51] sm:$0xff] %vm721_vm1, %v693_v6  ;;  %807 = vst.msk [vmem:[#allocation2 + $0x41] sm:$0xff] %vm721_vm1, %v692_v7  ;;  %v663_v0 = vmul.f32 %v574_v4, %v7449_v2  ;;  %v662_v61 = vmul.f32 %v7443_v63, %v572_v25  ;;  %6153 = vmatmul.mubr.msk.f32.gmra.mxu1 %vm721_vm1, %v7757_v36  ;;  %6205 = vmatmul.mubr.msk.f32.vlgmr.msra.gmra.mxu0 %vm721_vm1, %v7900_v56  ;;  %v8074_v6 = vld [vmem:[#allocation2 + $0x142] sm:$0xff]  ;;  %v6184_v7 = vld [vmem:[%s11590_s2 + $0x258] sm:$0xff] }
 0x1af   : > { %1150 = vmatprep.mubr.f32.mxu1 %v7055_v44  ;;  %1554 = vmatprep.mubr.f32.mxu0 %v7055_v44  ;;  %v6180_v4 = vld [vmem:[%s11590_s2 + $0x238] sm:$0xff]  ;;  %v6298_v25 = vld [vmem:[%s11590_s2 + $0x4e8] sm:$0xff]  ;;  %v6231_v32 = vld [vmem:[%s11590_s2 + $0x350] sm:$0xff] }
 0x1b0   : > { %v695_v35 = vadd.f32 %v663_v0, %v7449_v2  ;;  %v694_v3 = vadd.f32 %v7443_v63, %v662_v61  ;;  %1333 = vmatpush1.msra.mxu1 %v855_v58  ;;  %1824 = vmatpush1.msra.mxu0 %v6249_v9  ;;  %v8095_v58 = vld [vmem:[#allocation2 + $0x152] sm:$0xff]  ;;  %v6297_v9 = vld [vmem:[%s11590_s2 + $0x4e0] sm:$0xff]  ;;  %v6294_v61 = vld [vmem:[%s11590_s2 + $0x4c8] sm:$0xff] }
 0x1b1   : > { %v624_v36 = vpop.permute.xlu0 %623  ;;  %v576_v8 = vpop.permute.xlu1 %575  ;;  %1334 = vmatprep.subr.mxu1 %v852_v10  ;;  %1825 = vmatprep.subr.mxu0 %v6246_v30  ;;  %v6176_v0 = vld [vmem:[%s11590_s2 + $0x218] sm:$0xff]  ;;  %v8115_v10 = vld [vmem:[#allocation2 + $0x162] sm:$0xff] }
 0x1b2   : > { %810 = vst.msk [vmem:[#allocation2 + $0x71] sm:$0xff] %vm721_vm1, %v695_v35  ;;  %809 = vst.msk [vmem:[#allocation2 + $0x61] sm:$0xff] %vm721_vm1, %v694_v3  ;;  %v688_v63 = vmul.f32 %v7612_v55, %v624_v36  ;;  %v664_v2 = vmul.f32 %v7447_v1, %v576_v8  ;;  %6154 = vmatmul.mubr.msk.f32.gmra.mxu1 %vm721_vm1, %v7768_v46  ;;  %6206 = vmatmul.mubr.msk.f32.gmra.mxu0 %vm721_vm1, %v7928_v12  ;;  %v6293_v30 = vld [vmem:[%s11590_s2 + $0x4c0] sm:$0xff]  ;;  %v6252_v35 = vld [vmem:[%s11590_s2 + $0x3f8] sm:$0xff] }
 0x1b3   : > { %1156 = vmatprep.mubr.f32.mxu1 %v7055_v44  ;;  %1560 = vmatprep.mubr.f32.mxu0 %v7055_v44  ;;  %v6290_v3 = vld [vmem:[%s11590_s2 + $0x4a8] sm:$0xff]  ;;  %v8135_v36 = vld [vmem:[#allocation2 + $0x172] sm:$0xff] }
 0x1b4   : > { %v720_v5 = vadd.f32 %v7612_v55, %v688_v63  ;;  %v696_v39 = vadd.f32 %v7447_v1, %v664_v2  ;;  %1335 = vmatpush1.msra.mxu1 %v851_v14  ;;  %1826 = vmatpush1.msra.mxu0 %v6245_v16  ;;  %v6204_v55 = vld [vmem:[%s11590_s2 + $0x2f8] sm:$0xff]  ;;  %v6286_v8 = vld [vmem:[%s11590_s2 + $0x488] sm:$0xff]  ;;  %v6251_v14 = vld [vmem:[%s11590_s2 + $0x3f0] sm:$0xff] }
 0x1b5   : > { %v608_v46 = vpop.permute.xlu1 %607  ;;  %1336 = vmatprep.subr.mxu1 %v848_v34  ;;  %1827 = vmatprep.subr.mxu0 %v6242_v18  ;;  %v8152_v16 = vld [vmem:[#allocation2 + $0x182] sm:$0xff]  ;;  %v6247_v63 = vld [vmem:[%s11590_s2 + $0x3d0] sm:$0xff] }
 0x1b6   : > { %835 = vst.msk [vmem:[#allocation2 + $0x261] sm:$0xff] %vm721_vm1, %v720_v5  ;;  %811 = vst.msk [vmem:[#allocation2 + $0x81] sm:$0xff] %vm721_vm1, %v696_v39  ;;  %v680_v1 = vmul.f32 %v7556_v38, %v608_v46  ;;  %6155 = vmatmul.mubr.msk.f32.gmra.mxu1 %vm721_vm1, %v7784_v27  ;;  %6207 = vmatmul.mubr.msk.f32.gmra.mxu0 %vm721_vm1, %v7954_v19  ;;  %v7978_v27 = vld [vmem:[#allocation2 + $0x211] sm:$0xff]  ;;  %v6285_v2 = vld [vmem:[%s11590_s2 + $0x480] sm:$0xff] }
 0x1b7   : > { %1162 = vmatprep.mubr.f32.mxu1 %v7055_v44  ;;  %1566 = vmatprep.mubr.f32.mxu0 %v7055_v44  ;;  %v8169_v34 = vld [vmem:[#allocation2 + $0x192] sm:$0xff]  ;;  %v6282_v18 = vld [vmem:[%s11590_s2 + $0x468] sm:$0xff]  ;;  %v6281_v39 = vld [vmem:[%s11590_s2 + $0x460] sm:$0xff] }
 0x1b8   : > { %v712_v29 = vadd.f32 %v7556_v38, %v680_v1  ;;  %1337 = vmatpush1.msra.mxu1 %v847_v20  ;;  %1828 = vmatpush1.msra.mxu0 %v6241_v21  ;;  %v6234_v38 = vld [vmem:[%s11590_s2 + $0x368] sm:$0xff]  ;;  %v6243_v5 = vld [vmem:[%s11590_s2 + $0x3b0] sm:$0xff]  ;;  %v6240_v20 = vld [vmem:[%s11590_s2 + $0x398] sm:$0xff] }
 0x1b9   : > { %1613 = vmatprep.subr.mxu1 %v6204_v55  ;;  %1829 = vmatprep.subr.mxu0 %v6238_v28  ;;  %v8192_v46 = vld [vmem:[#allocation2 + $0x1a2] sm:$0xff]  ;;  %v6239_v1 = vld [vmem:[%s11590_s2 + $0x390] sm:$0xff] }
 0x1ba   : > { %827 = vst.msk [vmem:[#allocation2 + $0x1c1] sm:$0xff] %vm721_vm1, %v712_v29  ;;  %6156 = vmatmul.mubr.msk.f32.gmra.mxu1 %vm721_vm1, %v7800_v26  ;;  %6208 = vmatmul.mubr.msk.f32.gmra.mxu0 %vm721_vm1, %v7978_v27  ;;  %v6200_v26 = vld [vmem:[%s11590_s2 + $0x2d8] sm:$0xff]  ;;  %v6277_v21 = vld [vmem:[%s11590_s2 + $0x440] sm:$0xff] }
 0x1bb   : > { %1370 = vmatprep.mubr.f32.mxu1 %v7055_v44  ;;  %1572 = vmatprep.mubr.f32.mxu0 %v7055_v44  ;;  %v8212_v55 = vld [vmem:[#allocation2 + $0x1b2] sm:$0xff]  ;;  %v6273_v28 = vld [vmem:[%s11590_s2 + $0x420] sm:$0xff] }
 0x1bc   : > { %1830 = vmatpush1.msra.mxu0 %v6237_v43  ;;  %v6236_v29 = vld [vmem:[%s11590_s2 + $0x378] sm:$0xff]  ;;  %v6270_v43 = vld [vmem:[%s11590_s2 + $0x408] sm:$0xff] }
 0x1bd   : > { %1831 = vmatprep.subr.mxu0 %v6234_v38  ;;  %v6269_v38 = vld [vmem:[%s11590_s2 + $0x400] sm:$0xff] }
 0x1be   : > { %6165 = vmatmul.mubr.msk.f32.vlgmr.msra.gmra.mxu1 %vm721_vm1, %v7501_v22  ;;  %6209 = vmatmul.mubr.msk.f32.gmra.mxu0 %vm721_vm1, %v7996_v33  ;;  %v6196_v22 = vld [vmem:[%s11590_s2 + $0x2b8] sm:$0xff] }
 0x1bf   : > { %1614 = vmatpush1.msra.mxu1 %v6203_v13  ;;  %1376 = vmatprep.mubr.f32.mxu1 %v7055_v44  ;;  %v6232_v13 = vld [vmem:[%s11590_s2 + $0x358] sm:$0xff] }
 0x1c0   : > { %1578 = vmatprep.mubr.f32.mxu0 %v7055_v44  ;;  %1615 = vmatprep.subr.mxu1 %v6200_v26  ;;  %v6228_v26 = vld [vmem:[%s11590_s2 + $0x338] sm:$0xff] }
 0x1c1   : > { %1616 = vmatpush1.msra.mxu1 %v6199_v40  ;;  %1832 = vmatpush1.msra.mxu0 %v6233_v47  ;;  %v8257_v40 = vld [vmem:[#allocation2 + $0xc0] sm:$0xff]  ;;  %v6224_v47 = vld [vmem:[%s11590_s2 + $0x318] sm:$0xff] }
 0x1c2   : > { %6166 = vmatmul.mubr.msk.f32.gmra.mxu1 %vm721_vm1, %v7770_v49  ;;  %6210 = vmatmul.mubr.msk.f32.gmra.mxu0 %vm721_vm1, %v8015_v48  ;;  %v6192_v49 = vld [vmem:[%s11590_s2 + $0x298] sm:$0xff] }
 0x1c3   : > { %1382 = vmatprep.mubr.f32.mxu1 %v7055_v44  ;;  %1584 = vmatprep.mubr.f32.mxu0 %v7055_v44 }
 0x1c4   : > { %1617 = vmatprep.subr.mxu1 %v6196_v22  ;;  %1833 = vmatprep.subr.mxu0 %v6230_v60  ;;  %v6346_v22 = vld [vmem:[%s11590_s2 + $0x5e8] sm:$0xff]  ;;  %v6223_v60 = vld [vmem:[%s11590_s2 + $0x310] sm:$0xff] }
 0x1c5   : > { %1618 = vmatpush1.msra.mxu1 %v6195_v23  ;;  %1834 = vmatpush1.msra.mxu0 %v6229_v41  ;;  %v8277_v23 = vld [vmem:[#allocation2 + $0xd0] sm:$0xff]  ;;  %v6300_v41 = vld [vmem:[%s11590_s2 + $0x4f8] sm:$0xff] }
 0x1c6   : > { %6167 = vmatmul.mubr.msk.f32.gmra.mxu1 %vm721_vm1, %v7786_v57  ;;  %6211 = vmatmul.mubr.msk.f32.gmra.mxu0 %vm721_vm1, %v8035_v45  ;;  %v6222_v57 = vld [vmem:[%s11590_s2 + $0x308] sm:$0xff] }
 0x1c7   : > { %1388 = vmatprep.mubr.f32.mxu1 %v7055_v44  ;;  %1590 = vmatprep.mubr.f32.mxu0 %v7055_v44 }
 0x1c8   : > { %1619 = vmatprep.subr.mxu1 %v6192_v49  ;;  %1835 = vmatprep.subr.mxu0 %v6226_v50  ;;  %v6342_v49 = vld [vmem:[%s11590_s2 + $0x5c8] sm:$0xff] }
 0x1c9   : > { %1620 = vmatpush1.msra.mxu1 %v6191_v53  ;;  %1836 = vmatpush1.msra.mxu0 %v6225_v51  ;;  %v6338_v50 = vld [vmem:[%s11590_s2 + $0x5a8] sm:$0xff]  ;;  %v8297_v53 = vld [vmem:[#allocation2 + $0xe0] sm:$0xff] }
 0x1ca   : > { %6168 = vmatmul.mubr.msk.f32.gmra.mxu1 %vm721_vm1, %v7802_v31  ;;  %6212 = vmatmul.mubr.msk.f32.gmra.mxu0 %vm721_vm1, %v8058_v15  ;;  %v6183_v31 = vld [vmem:[%s11590_s2 + $0x250] sm:$0xff]  ;;  %v6337_v51 = vld [vmem:[%s11590_s2 + $0x5a0] sm:$0xff] }
 0x1cb   : > { %1837 = vmatprep.subr.mxu0 %v6222_v57  ;;  %1394 = vmatprep.mubr.f32.mxu1 %v7055_v44  ;;  %v6334_v57 = vld [vmem:[%s11590_s2 + $0x588] sm:$0xff] }
 0x1cc   : > { %1621 = vmatprep.subr.mxu1 %v6188_v54  ;;  %1838 = vmatpush1.msra.mxu0 %v6221_v62  ;;  %v8314_v54 = vld [vmem:[#allocation2 + $0xf0] sm:$0xff]  ;;  %v6296_v62 = vld [vmem:[%s11590_s2 + $0x4d8] sm:$0xff] }
 0x1cd   : > { %1871 = vmatprep.mubr.f32.mxu0 %v7055_v44  ;;  %1622 = vmatpush1.msra.mxu1 %v6187_v59  ;;  %v6333_v59 = vld [vmem:[%s11590_s2 + $0x580] sm:$0xff] }
 0x1ce   : > { %6169 = vmatmul.mubr.msk.f32.gmra.mxu1 %vm721_vm1, %v7819_v17  ;;  %6253 = vmatmul.mubr.msk.f32.vlgmr.msra.gmra.mxu0 %vm721_vm1, %v8074_v6  ;;  %v6179_v17 = vld [vmem:[%s11590_s2 + $0x230] sm:$0xff] }
 0x1cf   : > { %1400 = vmatprep.mubr.f32.mxu1 %v7055_v44  ;;  %1623 = vmatprep.subr.mxu1 %v6184_v7  ;;  %v6330_v7 = vld [vmem:[%s11590_s2 + $0x568] sm:$0xff] }
 0x1d0   : > { %1877 = vmatprep.mubr.f32.mxu0 %v7055_v44  ;;  %1624 = vmatpush1.msra.mxu1 %v6183_v31  ;;  %v8334_v31 = vld [vmem:[#allocation2 + $0x100] sm:$0xff] }
 0x1d1   : > { %1625 = vmatprep.subr.mxu1 %v6180_v4  ;;  %2147 = vmatprep.subr.mxu0 %v6298_v25  ;;  %v6292_v4 = vld [vmem:[%s11590_s2 + $0x4b8] sm:$0xff]  ;;  %v6329_v25 = vld [vmem:[%s11590_s2 + $0x560] sm:$0xff] }
 0x1d2   : > { %6170 = vmatmul.mubr.msk.f32.gmra.mxu1 %vm721_vm1, %v7842_v42  ;;  %6254 = vmatmul.mubr.msk.f32.gmra.mxu0 %vm721_vm1, %v8095_v58  ;;  %v6175_v42 = vld [vmem:[%s11590_s2 + $0x210] sm:$0xff] }
 0x1d3   : > { %1406 = vmatprep.mubr.f32.mxu1 %v7055_v44  ;;  %1883 = vmatprep.mubr.f32.mxu0 %v7055_v44 }
 0x1d4   : > { %1626 = vmatpush1.msra.mxu1 %v6179_v17  ;;  %2148 = vmatpush1.msra.mxu0 %v6297_v9  ;;  %v6326_v17 = vld [vmem:[%s11590_s2 + $0x548] sm:$0xff]  ;;  %v8354_v9 = vld [vmem:[#allocation2 + $0x110] sm:$0xff] }
 0x1d5   : > { %1627 = vmatprep.subr.mxu1 %v6176_v0  ;;  %2149 = vmatprep.subr.mxu0 %v6294_v61  ;;  %v6288_v0 = vld [vmem:[%s11590_s2 + $0x498] sm:$0xff]  ;;  %v6325_v61 = vld [vmem:[%s11590_s2 + $0x540] sm:$0xff] }
 0x1d6   : > { %6171 = vmatmul.mubr.msk.f32.gmra.mxu1 %vm721_vm1, %v7862_v11  ;;  %6255 = vmatmul.mubr.msk.f32.gmra.mxu0 %vm721_vm1, %v8115_v10  ;;  %v6289_v11 = vld [vmem:[%s11590_s2 + $0x4a0] sm:$0xff] }
 0x1d7   : > { %1412 = vmatprep.mubr.f32.mxu1 %v7055_v44  ;;  %1889 = vmatprep.mubr.f32.mxu0 %v7055_v44 }
 0x1d8   : > { %1628 = vmatpush1.msra.mxu1 %v6175_v42  ;;  %2150 = vmatpush1.msra.mxu0 %v6293_v30  ;;  %v6322_v42 = vld [vmem:[%s11590_s2 + $0x528] sm:$0xff]  ;;  %v6321_v30 = vld [vmem:[%s11590_s2 + $0x520] sm:$0xff] }
 0x1d9   : > { %1936 = vmatprep.subr.mxu1 %v6252_v35  ;;  %2151 = vmatprep.subr.mxu0 %v6290_v3  ;;  %v8377_v35 = vld [vmem:[#allocation2 + $0x120] sm:$0xff]  ;;  %v6318_v3 = vld [vmem:[%s11590_s2 + $0x508] sm:$0xff] }
 0x1da   : > { %6172 = vmatmul.mubr.msk.f32.gmra.mxu1 %vm721_vm1, %v7882_v52  ;;  %6256 = vmatmul.mubr.msk.f32.gmra.mxu0 %vm721_vm1, %v8135_v36  ;;  %v6248_v52 = vld [vmem:[%s11590_s2 + $0x3d8] sm:$0xff] }
 0x1db   : > { %1661 = vmatprep.mubr.f32.mxu1 %v7055_v44  ;;  %1895 = vmatprep.mubr.f32.mxu0 %v7055_v44 }
 0x1dc   : > { %2152 = vmatpush1.msra.mxu0 %v6289_v11  ;;  %v6284_v11 = vld [vmem:[%s11590_s2 + $0x478] sm:$0xff] }
 0x1dd   : > { %2153 = vmatprep.subr.mxu0 %v6286_v8  ;;  %v6317_v8 = vld [vmem:[%s11590_s2 + $0x500] sm:$0xff] }
 0x1de   : > { %6213 = vmatmul.mubr.msk.f32.vlgmr.msra.gmra.mxu1 %vm721_vm1, %v7900_v56  ;;  %6257 = vmatmul.mubr.msk.f32.gmra.mxu0 %vm721_vm1, %v8152_v16  ;;  %v6244_v56 = vld [vmem:[%s11590_s2 + $0x3b8] sm:$0xff] }
 0x1df   : > { %1937 = vmatpush1.msra.mxu1 %v6251_v14  ;;  %1667 = vmatprep.mubr.f32.mxu1 %v7055_v44  ;;  %v8395_v14 = vld [vmem:[#allocation2 + $0x11] sm:$0xff] }
 0x1e0   : > { %1901 = vmatprep.mubr.f32.mxu0 %v7055_v44  ;;  %1938 = vmatprep.subr.mxu1 %v6248_v52  ;;  %v6280_v52 = vld [vmem:[%s11590_s2 + $0x458] sm:$0xff] }
 0x1e1   : > { %1939 = vmatpush1.msra.mxu1 %v6247_v63  ;;  %2154 = vmatpush1.msra.mxu0 %v6285_v2  ;;  %v6279_v63 = vld [vmem:[%s11590_s2 + $0x450] sm:$0xff]  ;;  %v6394_v2 = vld [vmem:[%s11590_s2 + $0x6e8] sm:$0xff] }
 0x1e2   : > { %6214 = vmatmul.mubr.msk.f32.gmra.mxu1 %vm721_vm1, %v7928_v12  ;;  %6258 = vmatmul.mubr.msk.f32.gmra.mxu0 %vm721_vm1, %v8169_v34  ;;  %v6278_v12 = vld [vmem:[%s11590_s2 + $0x448] sm:$0xff] }
 0x1e3   : > { %1673 = vmatprep.mubr.f32.mxu1 %v7055_v44  ;;  %1907 = vmatprep.mubr.f32.mxu0 %v7055_v44 }
 0x1e4   : > { %1940 = vmatprep.subr.mxu1 %v6244_v56  ;;  %2155 = vmatprep.subr.mxu0 %v6282_v18  ;;  %v8415_v56 = vld [vmem:[#allocation2 + $0x21] sm:$0xff]  ;;  %v6275_v18 = vld [vmem:[%s11590_s2 + $0x430] sm:$0xff] }
 0x1e5   : > { %1941 = vmatpush1.msra.mxu1 %v6243_v5  ;;  %2156 = vmatpush1.msra.mxu0 %v6281_v39  ;;  %v6272_v5 = vld [vmem:[%s11590_s2 + $0x418] sm:$0xff]  ;;  %v6393_v39 = vld [vmem:[%s11590_s2 + $0x6e0] sm:$0xff] }
 0x1e6   : > { %6215 = vmatmul.mubr.msk.f32.gmra.mxu1 %vm721_vm1, %v7954_v19  ;;  %6259 = vmatmul.mubr.msk.f32.gmra.mxu0 %vm721_vm1, %v8192_v46  ;;  %v6274_v19 = vld [vmem:[%s11590_s2 + $0x428] sm:$0xff] }
 0x1e7   : > { %2157 = vmatprep.subr.mxu0 %v6278_v12  ;;  %1679 = vmatprep.mubr.f32.mxu1 %v7055_v44  ;;  %v8432_v12 = vld [vmem:[#allocation2 + $0x31] sm:$0xff] }
 0x1e8   : > { %1913 = vmatprep.mubr.f32.mxu0 %v7055_v44  ;;  %1942 = vmatprep.subr.mxu1 %v6240_v20  ;;  %v6390_v20 = vld [vmem:[%s11590_s2 + $0x6c8] sm:$0xff] }
 0x1e9   : > { %2158 = vmatpush1.msra.mxu0 %v6277_v21  ;;  %1943 = vmatpush1.msra.mxu1 %v6239_v1  ;;  %v6348_v21 = vld [vmem:[%s11590_s2 + $0x5f8] sm:$0xff]  ;;  %v6389_v1 = vld [vmem:[%s11590_s2 + $0x6c0] sm:$0xff] }
 0x1ea   : > { %6216 = vmatmul.mubr.msk.f32.gmra.mxu1 %vm721_vm1, %v7978_v27  ;;  %6260 = vmatmul.mubr.msk.f32.gmra.mxu0 %vm721_vm1, %v8212_v55  ;;  %v6235_v27 = vld [vmem:[%s11590_s2 + $0x370] sm:$0xff] }
 0x1eb   : > { %2159 = vmatprep.subr.mxu0 %v6274_v19  ;;  %1685 = vmatprep.mubr.f32.mxu1 %v7055_v44  ;;  %v8452_v19 = vld [vmem:[#allocation2 + $0x41] sm:$0xff] }
 0x1ec   : > { %2160 = vmatpush1.msra.mxu0 %v6273_v28  ;;  %1944 = vmatprep.subr.mxu1 %v6236_v29  ;;  %v6385_v28 = vld [vmem:[%s11590_s2 + $0x6a0] sm:$0xff]  ;;  %v6347_v29 = vld [vmem:[%s11590_s2 + $0x5f0] sm:$0xff] }
 0x1ed   : > { %2161 = vmatprep.subr.mxu0 %v6270_v43  ;;  %2195 = vmatprep.mubr.f32.mxu0 %v7055_v44  ;;  %v8469_v43 = vld [vmem:[#allocation2 + $0x51] sm:$0xff] }
 0x1ee   : > { %2162 = vmatpush1.msra.mxu0 %v6269_v38  ;;  %6217 = vmatmul.mubr.msk.f32.gmra.mxu1 %vm721_vm1, %v7996_v33  ;;  %v6227_v33 = vld [vmem:[%s11590_s2 + $0x330] sm:$0xff] }
 0x1ef   : > { %1945 = vmatpush1.msra.mxu1 %v6235_v27  ;;  %6301 = vmatmul.mubr.msk.f32.vlgmr.msra.gmra.mxu0 %vm721_vm1, %v8240_v24  ;;  %v6343_v38 = vld [vmem:[%s11590_s2 + $0x5d0] sm:$0xff]  ;;  %v6382_v27 = vld [vmem:[%s11590_s2 + $0x688] sm:$0xff] }
 0x1f0   : > { %1691 = vmatprep.mubr.f32.mxu1 %v7055_v44  ;;  %1946 = vmatprep.subr.mxu1 %v6232_v13  ;;  %v8486_v13 = vld [vmem:[#allocation2 + $0x61] sm:$0xff] }
 0x1f1   : > { %2201 = vmatprep.mubr.f32.mxu0 %v7055_v44  ;;  %1947 = vmatpush1.msra.mxu1 %v6231_v32  ;;  %v6381_v32 = vld [vmem:[%s11590_s2 + $0x680] sm:$0xff] }
 0x1f2   : > { %6218 = vmatmul.mubr.msk.f32.gmra.mxu1 %vm721_vm1, %v8015_v48  ;;  %1948 = vmatprep.subr.mxu1 %v6228_v26  ;;  %v6345_v48 = vld [vmem:[%s11590_s2 + $0x5e0] sm:$0xff]  ;;  %v6339_v26 = vld [vmem:[%s11590_s2 + $0x5b0] sm:$0xff] }
 0x1f3   : > { %6302 = vmatmul.mubr.msk.f32.gmra.mxu0 %vm721_vm1, %v8257_v40  ;;  %1697 = vmatprep.mubr.f32.mxu1 %v7055_v44 }
 0x1f4   : > { %2207 = vmatprep.mubr.f32.mxu0 %v7055_v44  ;;  %1949 = vmatpush1.msra.mxu1 %v6227_v33  ;;  %v6378_v33 = vld [vmem:[%s11590_s2 + $0x668] sm:$0xff] }
 0x1f5   : > { %1950 = vmatprep.subr.mxu1 %v6224_v47  ;;  %2470 = vmatprep.subr.mxu0 %v6346_v22  ;;  %v8509_v47 = vld [vmem:[#allocation2 + $0x71] sm:$0xff]  ;;  %v6374_v22 = vld [vmem:[%s11590_s2 + $0x648] sm:$0xff] }
 0x1f6   : > { %6219 = vmatmul.mubr.msk.f32.gmra.mxu1 %vm721_vm1, %v8035_v45  ;;  %2471 = vmatpush1.msra.mxu0 %v6345_v48  ;;  %v6341_v45 = vld [vmem:[%s11590_s2 + $0x5c0] sm:$0xff]  ;;  %v6336_v48 = vld [vmem:[%s11590_s2 + $0x598] sm:$0xff] }
 0x1f7   : > { %6303 = vmatmul.mubr.msk.f32.gmra.mxu0 %vm721_vm1, %v8277_v23  ;;  %1703 = vmatprep.mubr.f32.mxu1 %v7055_v44 }
 0x1f8   : > { %2213 = vmatprep.mubr.f32.mxu0 %v7055_v44  ;;  %1951 = vmatpush1.msra.mxu1 %v6223_v60  ;;  %v6373_v60 = vld [vmem:[%s11590_s2 + $0x640] sm:$0xff] }
 0x1f9   : > { %2260 = vmatprep.subr.mxu1 %v6300_v41  ;;  %2472 = vmatprep.subr.mxu0 %v6342_v49  ;;  %v6370_v41 = vld [vmem:[%s11590_s2 + $0x628] sm:$0xff] }
 0x1fa   : > { %6220 = vmatmul.mubr.msk.f32.gmra.mxu1 %vm721_vm1, %v8058_v15  ;;  %2473 = vmatpush1.msra.mxu0 %v6341_v45  ;;  %v6299_v15 = vld [vmem:[%s11590_s2 + $0x4f0] sm:$0xff]  ;;  %v8532_v49 = vld [vmem:[#allocation2 + $0x81] sm:$0xff] }
 0x1fb   : > { %6304 = vmatmul.mubr.msk.f32.gmra.mxu0 %vm721_vm1, %v8297_v53  ;;  %1984 = vmatprep.mubr.f32.mxu1 %v7055_v44  ;;  %v6369_v45 = vld [vmem:[%s11590_s2 + $0x620] sm:$0xff] }
 0x1fc   : > { %2219 = vmatprep.mubr.f32.mxu0 %v7055_v44  ;;  %2474 = vmatprep.subr.mxu0 %v6338_v50  ;;  %v6366_v50 = vld [vmem:[%s11590_s2 + $0x608] sm:$0xff] }
 0x1fd   : > { %2475 = vmatpush1.msra.mxu0 %v6337_v51  ;;  %v6332_v51 = vld [vmem:[%s11590_s2 + $0x578] sm:$0xff] }
 0x1fe   : > { %6261 = vmatmul.mubr.msk.f32.vlgmr.msra.gmra.mxu1 %vm721_vm1, %v8074_v6  ;;  %2476 = vmatprep.subr.mxu0 %v6334_v57  ;;  %v6295_v6 = vld [vmem:[%s11590_s2 + $0x4d0] sm:$0xff]  ;;  %v6365_v57 = vld [vmem:[%s11590_s2 + $0x600] sm:$0xff] }
 0x1ff   : > { %6305 = vmatmul.mubr.msk.f32.gmra.mxu0 %vm721_vm1, %v8314_v54  ;;  %2261 = vmatpush1.msra.mxu1 %v6299_v15  ;;  %v8555_v15 = vld [vmem:[#allocation2 + $0xb1] sm:$0xff] }
 0x200   : > { %1990 = vmatprep.mubr.f32.mxu1 %v7055_v44  ;;  %2225 = vmatprep.mubr.f32.mxu0 %v7055_v44 }
 0x201   : > { %2262 = vmatprep.subr.mxu1 %v6296_v62  ;;  %2477 = vmatpush1.msra.mxu0 %v6333_v59  ;;  %v6328_v62 = vld [vmem:[%s11590_s2 + $0x558] sm:$0xff]  ;;  %v6327_v59 = vld [vmem:[%s11590_s2 + $0x550] sm:$0xff] }
 0x202   : > { %6262 = vmatmul.mubr.msk.f32.gmra.mxu1 %vm721_vm1, %v8095_v58  ;;  %2478 = vmatprep.subr.mxu0 %v6330_v7  ;;  %v6291_v58 = vld [vmem:[%s11590_s2 + $0x4b0] sm:$0xff]  ;;  %v6442_v7 = vld [vmem:[%s11590_s2 + $0x7e8] sm:$0xff] }
 0x203   : > { %6306 = vmatmul.mubr.msk.f32.gmra.mxu0 %vm721_vm1, %v8334_v31  ;;  %2263 = vmatpush1.msra.mxu1 %v6295_v6  ;;  %v8575_v6 = vld [vmem:[#allocation2 + $0xc1] sm:$0xff] }
 0x204   : > { %1996 = vmatprep.mubr.f32.mxu1 %v7055_v44  ;;  %2231 = vmatprep.mubr.f32.mxu0 %v7055_v44 }
 0x205   : > { %2264 = vmatprep.subr.mxu1 %v6292_v4  ;;  %2479 = vmatpush1.msra.mxu0 %v6329_v25  ;;  %v6323_v4 = vld [vmem:[%s11590_s2 + $0x530] sm:$0xff]  ;;  %v6320_v25 = vld [vmem:[%s11590_s2 + $0x518] sm:$0xff] }
 0x206   : > { %6263 = vmatmul.mubr.msk.f32.gmra.mxu1 %vm721_vm1, %v8115_v10  ;;  %2480 = vmatprep.subr.mxu0 %v6326_v17  ;;  %v6287_v10 = vld [vmem:[%s11590_s2 + $0x490] sm:$0xff]  ;;  %v6441_v17 = vld [vmem:[%s11590_s2 + $0x7e0] sm:$0xff] }
 0x207   : > { %6307 = vmatmul.mubr.msk.f32.gmra.mxu0 %vm721_vm1, %v8354_v9  ;;  %2265 = vmatpush1.msra.mxu1 %v6291_v58  ;;  %v8592_v58 = vld [vmem:[#allocation2 + $0xd1] sm:$0xff] }
 0x208   : > { %2002 = vmatprep.mubr.f32.mxu1 %v7055_v44  ;;  %2237 = vmatprep.mubr.f32.mxu0 %v7055_v44 }
 0x209   : > { %2266 = vmatprep.subr.mxu1 %v6288_v0  ;;  %2481 = vmatpush1.msra.mxu0 %v6325_v61  ;;  %v6438_v0 = vld [vmem:[%s11590_s2 + $0x7c8] sm:$0xff]  ;;  %v6396_v61 = vld [vmem:[%s11590_s2 + $0x6f8] sm:$0xff] }
 0x20a   : > { %6264 = vmatmul.mubr.msk.f32.gmra.mxu1 %vm721_vm1, %v8135_v36  ;;  %2482 = vmatprep.subr.mxu0 %v6322_v42  ;;  %v6283_v36 = vld [vmem:[%s11590_s2 + $0x470] sm:$0xff]  ;;  %v6437_v42 = vld [vmem:[%s11590_s2 + $0x7c0] sm:$0xff] }
 0x20b   : > { %6308 = vmatmul.mubr.msk.f32.gmra.mxu0 %vm721_vm1, %v8377_v35  ;;  %2267 = vmatpush1.msra.mxu1 %v6287_v10  ;;  %v8612_v10 = vld [vmem:[#allocation2 + $0xe1] sm:$0xff] }
 0x20c   : > { %2483 = vmatpush1.msra.mxu0 %v6321_v30  ;;  %2008 = vmatprep.mubr.f32.mxu1 %v7055_v44  ;;  %v6433_v30 = vld [vmem:[%s11590_s2 + $0x7a0] sm:$0xff] }
 0x20d   : > { %2484 = vmatprep.subr.mxu0 %v6318_v3  ;;  %2268 = vmatprep.subr.mxu1 %v6284_v11  ;;  %v6395_v3 = vld [vmem:[%s11590_s2 + $0x6f0] sm:$0xff] }
 0x20e   : > { %2485 = vmatpush1.msra.mxu0 %v6317_v8  ;;  %2518 = vmatprep.mubr.f32.mxu0 %v7055_v44  ;;  %v8629_v11 = vld [vmem:[#allocation2 + $0xf1] sm:$0xff]  ;;  %v8634_v8 = vpop.f32.mrf.mxu1 }
 0x20f   : > { %6265 = vmatmul.mubr.msk.f32.gmra.mxu1 %vm721_vm1, %v8152_v16  ;;  %6349 = vmatmul.mubr.msk.f32.vlgmr.msra.gmra.mxu0 %vm721_vm1, %v8395_v14  ;;  %v6276_v16 = vld [vmem:[%s11590_s2 + $0x438] sm:$0xff] }
 0x210   : > { %2269 = vmatpush1.msra.mxu1 %v6283_v36  ;;  %2014 = vmatprep.mubr.f32.mxu1 %v7055_v44  ;;  %v6391_v36 = vld [vmem:[%s11590_s2 + $0x6d0] sm:$0xff] }
 0x211   : > { %2270 = vmatprep.subr.mxu1 %v6280_v52  ;;  %2524 = vmatprep.mubr.f32.mxu0 %v7055_v44  ;;  %v6430_v52 = vld [vmem:[%s11590_s2 + $0x788] sm:$0xff] }
 0x212   : > { %2271 = vmatpush1.msra.mxu1 %v6279_v63  ;;  %2793 = vmatprep.subr.mxu0 %v6394_v2  ;;  %v6388_v2 = vld [vmem:[%s11590_s2 + $0x6b8] sm:$0xff] }
 0x213   : > { %6266 = vmatmul.mubr.msk.f32.gmra.mxu1 %vm721_vm1, %v8169_v34  ;;  %6350 = vmatmul.mubr.msk.f32.gmra.mxu0 %vm721_vm1, %v8415_v56  ;;  %v6271_v34 = vld [vmem:[%s11590_s2 + $0x410] sm:$0xff] }
 0x214   : > { %2020 = vmatprep.mubr.f32.mxu1 %v7055_v44  ;;  %2272 = vmatprep.subr.mxu1 %v6276_v16  ;;  %v6429_v16 = vld [vmem:[%s11590_s2 + $0x780] sm:$0xff] }
 0x215   : > { %2530 = vmatprep.mubr.f32.mxu0 %v7055_v44  ;;  %2273 = vmatpush1.msra.mxu1 %v6275_v18 }
 0x216   : > { %2274 = vmatprep.subr.mxu1 %v6272_v5  ;;  %2794 = vmatpush1.msra.mxu0 %v6393_v39  ;;  %v6387_v5 = vld [vmem:[%s11590_s2 + $0x6b0] sm:$0xff]  ;;  %v6426_v39 = vld [vmem:[%s11590_s2 + $0x768] sm:$0xff] }
 0x217   : > { %6267 = vmatmul.mubr.msk.f32.gmra.mxu1 %vm721_vm1, %v8192_v46  ;;  %6351 = vmatmul.mubr.msk.f32.gmra.mxu0 %vm721_vm1, %v8432_v12  ;;  %v6386_v46 = vld [vmem:[%s11590_s2 + $0x6a8] sm:$0xff] }
 0x218   : > { %2026 = vmatprep.mubr.f32.mxu1 %v7055_v44  ;;  %2536 = vmatprep.mubr.f32.mxu0 %v7055_v44 }
 0x219   : > { %2275 = vmatpush1.msra.mxu1 %v6271_v34  ;;  %2795 = vmatprep.subr.mxu0 %v6390_v20  ;;  %v6425_v34 = vld [vmem:[%s11590_s2 + $0x760] sm:$0xff]  ;;  %v8677_v20 = vld [vmem:[#allocation2 + $0x111] sm:$0xff] }
 0x21a   : > { %2583 = vmatprep.subr.mxu1 %v6348_v21  ;;  %2796 = vmatpush1.msra.mxu0 %v6389_v1  ;;  %v6422_v21 = vld [vmem:[%s11590_s2 + $0x748] sm:$0xff] }
 0x21b   : > { %6268 = vmatmul.mubr.msk.f32.gmra.mxu1 %vm721_vm1, %v8212_v55  ;;  %6352 = vmatmul.mubr.msk.f32.gmra.mxu0 %vm721_vm1, %v8452_v19  ;;  %v6344_v55 = vld [vmem:[%s11590_s2 + $0x5d8] sm:$0xff] }
 0x21c   : > { %2308 = vmatprep.mubr.f32.mxu1 %v7055_v44  ;;  %2542 = vmatprep.mubr.f32.mxu0 %v7055_v44 }
 0x21d   : > { %2797 = vmatprep.subr.mxu0 %v6386_v46  ;;  %v6384_v46 = vld [vmem:[%s11590_s2 + $0x698] sm:$0xff] }
 0x21e   : > { %2798 = vmatpush1.msra.mxu0 %v6385_v28  ;;  %v6421_v28 = vld [vmem:[%s11590_s2 + $0x740] sm:$0xff] }
 0x21f   : > { %6309 = vmatmul.mubr.msk.f32.vlgmr.msra.gmra.mxu1 %vm721_vm1, %v8240_v24  ;;  %6353 = vmatmul.mubr.msk.f32.gmra.mxu0 %vm721_vm1, %v8469_v43  ;;  %v6340_v24 = vld [vmem:[%s11590_s2 + $0x5b8] sm:$0xff] }
 0x220   : > { %2584 = vmatpush1.msra.mxu1 %v6347_v29  ;;  %2314 = vmatprep.mubr.f32.mxu1 %v7055_v44  ;;  %v6383_v29 = vld [vmem:[%s11590_s2 + $0x690] sm:$0xff] }
 0x221   : > { %2548 = vmatprep.mubr.f32.mxu0 %v7055_v44  ;;  %2585 = vmatprep.subr.mxu1 %v6344_v55  ;;  %v6418_v55 = vld [vmem:[%s11590_s2 + $0x728] sm:$0xff] }
 0x222   : > { %2586 = vmatpush1.msra.mxu1 %v6343_v38  ;;  %2799 = vmatprep.subr.mxu0 %v6382_v27  ;;  %v8704_v38 = vld [vmem:[#allocation2 + $0x121] sm:$0xff] }
 0x223   : > { %6310 = vmatmul.mubr.msk.f32.gmra.mxu1 %vm721_vm1, %v8257_v40  ;;  %6354 = vmatmul.mubr.msk.f32.gmra.mxu0 %vm721_vm1, %v8486_v13  ;;  %v6377_v40 = vld [vmem:[%s11590_s2 + $0x660] sm:$0xff] }
 0x224   : > { %2320 = vmatprep.mubr.f32.mxu1 %v7055_v44  ;;  %2554 = vmatprep.mubr.f32.mxu0 %v7055_v44  ;;  %v6417_v27 = vld [vmem:[%s11590_s2 + $0x720] sm:$0xff] }
 0x225   : > { %2587 = vmatprep.subr.mxu1 %v6340_v24  ;;  %2800 = vmatpush1.msra.mxu0 %v6381_v32  ;;  %v6414_v32 = vld [vmem:[%s11590_s2 + $0x708] sm:$0xff] }
 0x226   : > { %2588 = vmatpush1.msra.mxu1 %v6339_v26  ;;  %2801 = vmatprep.subr.mxu0 %v6378_v33  ;;  %v6380_v26 = vld [vmem:[%s11590_s2 + $0x678] sm:$0xff]  ;;  %v6413_v33 = vld [vmem:[%s11590_s2 + $0x700] sm:$0xff] }
 0x227   : > { %6311 = vmatmul.mubr.msk.f32.gmra.mxu1 %vm721_vm1, %v8277_v23  ;;  %6355 = vmatmul.mubr.msk.f32.gmra.mxu0 %vm721_vm1, %v8509_v47  ;;  %v6335_v23 = vld [vmem:[%s11590_s2 + $0x590] sm:$0xff] }
 0x228   : > { %2802 = vmatpush1.msra.mxu0 %v6377_v40  ;;  %2326 = vmatprep.mubr.f32.mxu1 %v7055_v44  ;;  %v6379_v40 = vld [vmem:[%s11590_s2 + $0x670] sm:$0xff] }
 0x229   : > { %2803 = vmatprep.subr.mxu0 %v6374_v22  ;;  %2560 = vmatprep.mubr.f32.mxu0 %v7055_v44  ;;  %v8730_v22 = vpop.f32.mrf.mxu0 }
 0x22a   : > { %2589 = vmatprep.subr.mxu1 %v6336_v48  ;;  %2804 = vmatpush1.msra.mxu0 %v6373_v60  ;;  %v8733_v48 = vld [vmem:[#allocation2 + $0x12] sm:$0xff] }
 0x22b   : > { %6312 = vmatmul.mubr.msk.f32.gmra.mxu1 %vm721_vm1, %v8297_v53  ;;  %6356 = vmatmul.mubr.msk.f32.gmra.mxu0 %vm721_vm1, %v8532_v49  ;;  %v6331_v53 = vld [vmem:[%s11590_s2 + $0x570] sm:$0xff] }
 0x22c   : > { %2590 = vmatpush1.msra.mxu1 %v6335_v23  ;;  %2805 = vmatprep.subr.mxu0 %v6370_v41  ;;  %v6376_v23 = vld [vmem:[%s11590_s2 + $0x658] sm:$0xff]  ;;  %v6375_v41 = vld [vmem:[%s11590_s2 + $0x650] sm:$0xff] }
 0x22d   : > { %2806 = vmatpush1.msra.mxu0 %v6369_v45  ;;  %2332 = vmatprep.mubr.f32.mxu1 %v7055_v44  ;;  %v6490_v45 = vld [vmem:[%s11590_s2 + $0x8e8] sm:$0xff] }
 0x22e   : > { %2807 = vmatprep.subr.mxu0 %v6366_v50  ;;  %2591 = vmatprep.subr.mxu1 %v6332_v51 }
 0x22f   : > { %2808 = vmatpush1.msra.mxu0 %v6365_v57  ;;  %2841 = vmatprep.mubr.f32.mxu0 %v7055_v44  ;;  %v6372_v57 = vld [vmem:[%s11590_s2 + $0x638] sm:$0xff] }
 0x230   : > { %6313 = vmatmul.mubr.msk.f32.gmra.mxu1 %vm721_vm1, %v8314_v54  ;;  %6397 = vmatmul.mubr.msk.f32.vlgmr.msra.gmra.mxu0 %vm721_vm1, %v8555_v15  ;;  %v6324_v54 = vld [vmem:[%s11590_s2 + $0x538] sm:$0xff] }
 0x231   : > { %2592 = vmatpush1.msra.mxu1 %v6331_v53  ;;  %2338 = vmatprep.mubr.f32.mxu1 %v7055_v44  ;;  %v8760_v53 = vld [vmem:[#allocation2 + $0x22] sm:$0xff] }
 0x232   : > { %2593 = vmatprep.subr.mxu1 %v6328_v62  ;;  %2847 = vmatprep.mubr.f32.mxu0 %v7055_v44 }
 0x233   : > { %2594 = vmatpush1.msra.mxu1 %v6327_v59  ;;  %3116 = vmatprep.subr.mxu0 %v6442_v7  ;;  %v6371_v7 = vld [vmem:[%s11590_s2 + $0x630] sm:$0xff] }
 0x234   : > { %6314 = vmatmul.mubr.msk.f32.gmra.mxu1 %vm721_vm1, %v8334_v31  ;;  %6398 = vmatmul.mubr.msk.f32.gmra.mxu0 %vm721_vm1, %v8575_v6  ;;  %v6319_v31 = vld [vmem:[%s11590_s2 + $0x510] sm:$0xff] }
 0x235   : > { %2344 = vmatprep.mubr.f32.mxu1 %v7055_v44  ;;  %2595 = vmatprep.subr.mxu1 %v6324_v54 }
 0x236   : > { %2853 = vmatprep.mubr.f32.mxu0 %v7055_v44  ;;  %2596 = vmatpush1.msra.mxu1 %v6323_v4  ;;  %v6368_v4 = vld [vmem:[%s11590_s2 + $0x618] sm:$0xff] }
 0x237   : > { %2597 = vmatprep.subr.mxu1 %v6320_v25  ;;  %3117 = vmatpush1.msra.mxu0 %v6441_v17  ;;  %v6489_v25 = vld [vmem:[%s11590_s2 + $0x8e0] sm:$0xff] }
 0x238   : > { %6315 = vmatmul.mubr.msk.f32.gmra.mxu1 %vm721_vm1, %v8354_v9  ;;  %6399 = vmatmul.mubr.msk.f32.gmra.mxu0 %vm721_vm1, %v8592_v58  ;;  %v6434_v9 = vld [vmem:[%s11590_s2 + $0x7a8] sm:$0xff] }
 0x239   : > { %2350 = vmatprep.mubr.f32.mxu1 %v7055_v44  ;;  %2859 = vmatprep.mubr.f32.mxu0 %v7055_v44 }
 0x23a   : > { %2598 = vmatpush1.msra.mxu1 %v6319_v31  ;;  %3118 = vmatprep.subr.mxu0 %v6438_v0  ;;  %v8787_v0 = vld [vmem:[#allocation2 + $0x32] sm:$0xff] }
 0x23b   : > { %2906 = vmatprep.subr.mxu1 %v6396_v61  ;;  %3119 = vmatpush1.msra.mxu0 %v6437_v42 }
 0x23c   : > { %6316 = vmatmul.mubr.msk.f32.gmra.mxu1 %vm721_vm1, %v8377_v35  ;;  %6400 = vmatmul.mubr.msk.f32.gmra.mxu0 %vm721_vm1, %v8612_v10  ;;  %v6392_v35 = vld [vmem:[%s11590_s2 + $0x6d8] sm:$0xff] }
 0x23d   : > { %2631 = vmatprep.mubr.f32.mxu1 %v7055_v44  ;;  %2865 = vmatprep.mubr.f32.mxu0 %v7055_v44 }
 0x23e   : > { %3120 = vmatprep.subr.mxu0 %v6434_v9  ;;  %v6367_v9 = vld [vmem:[%s11590_s2 + $0x610] sm:$0xff] }
 0x23f   : > { %3121 = vmatpush1.msra.mxu0 %v6433_v30  ;;  %v6486_v30 = vld [vmem:[%s11590_s2 + $0x8c8] sm:$0xff] }
 0x240   : > { %6357 = vmatmul.mubr.msk.f32.vlgmr.msra.gmra.mxu1 %vm721_vm1, %v8395_v14  ;;  %6401 = vmatmul.mubr.msk.f32.gmra.mxu0 %vm721_vm1, %v8629_v11  ;;  %v8650_v14 = vld [vmem:[#allocation2 + $0x101] sm:$0xff] }
 0x241   : > { %2907 = vmatpush1.msra.mxu1 %v6395_v3  ;;  %2637 = vmatprep.mubr.f32.mxu1 %v7055_v44 }
 0x242   : > { %2871 = vmatprep.mubr.f32.mxu0 %v7055_v44  ;;  %2908 = vmatprep.subr.mxu1 %v6392_v35  ;;  %v8648_v63 = vpop.f32.mrf.mxu1  ;;  %v6444_v35 = vld [vmem:[%s11590_s2 + $0x7f8] sm:$0xff] }
 0x243   : > { %2909 = vmatpush1.msra.mxu1 %v6391_v36  ;;  %3122 = vmatprep.subr.mxu0 %v6430_v52  ;;  %v6485_v36 = vld [vmem:[%s11590_s2 + $0x8c0] sm:$0xff] }
 0x244   : > { %6358 = vmatmul.mubr.msk.f32.gmra.mxu1 %vm721_vm1, %v8415_v56  ;;  %6402 = vmatmul.mubr.msk.f32.gmra.mxu0 %vm721_vm1, %v8650_v14  ;;  %v8662_v18 = vpop.f32.mrf.mxu1 }
 0x245   : > { %2643 = vmatprep.mubr.f32.mxu1 %v7055_v44  ;;  %2877 = vmatprep.mubr.f32.mxu0 %v7055_v44 }
 0x246   : > { %2910 = vmatprep.subr.mxu1 %v6388_v2  ;;  %3123 = vmatpush1.msra.mxu0 %v6429_v16  ;;  %v8672_v56 = vpop.f32.mrf.mxu1  ;;  %v8817_v2 = vld [vmem:[#allocation2 + $0x42] sm:$0xff] }
 0x247   : > { %2911 = vmatpush1.msra.mxu1 %v6387_v5  ;;  %3124 = vmatprep.subr.mxu0 %v6426_v39  ;;  %v6482_v5 = vld [vmem:[%s11590_s2 + $0x8a8] sm:$0xff] }
 0x248   : > { %6359 = vmatmul.mubr.msk.f32.gmra.mxu1 %vm721_vm1, %v8432_v12  ;;  %6403 = vmatmul.mubr.msk.f32.gmra.mxu0 %vm721_vm1, %v8677_v20  ;;  %v8686_v1 = vpop.f32.mrf.mxu1 }
 0x249   : > { %3125 = vmatpush1.msra.mxu0 %v6425_v34  ;;  %2649 = vmatprep.mubr.f32.mxu1 %v7055_v44 }
 0x24a   : > { %3126 = vmatprep.subr.mxu0 %v6422_v21  ;;  %2883 = vmatprep.mubr.f32.mxu0 %v7055_v44  ;;  %v8696_v12 = vpop.f32.mrf.mxu1 }
 0x24b   : > { %2912 = vmatprep.subr.mxu1 %v6384_v46  ;;  %3127 = vmatpush1.msra.mxu0 %v6421_v28  ;;  %v8844_v46 = vld [vmem:[#allocation2 + $0x52] sm:$0xff] }
 0x24c   : > { %6360 = vmatmul.mubr.msk.f32.gmra.mxu1 %vm721_vm1, %v8452_v19  ;;  %6404 = vmatmul.mubr.msk.f32.gmra.mxu0 %vm721_vm1, %v8704_v38  ;;  %v8713_v24 = vpop.f32.mrf.mxu1 }
 0x24d   : > { %2913 = vmatpush1.msra.mxu1 %v6383_v29  ;;  %3128 = vmatprep.subr.mxu0 %v6418_v55  ;;  %v6440_v29 = vld [vmem:[%s11590_s2 + $0x7d8] sm:$0xff] }
 0x24e   : > { %3129 = vmatpush1.msra.mxu0 %v6417_v27  ;;  %2655 = vmatprep.mubr.f32.mxu1 %v7055_v44  ;;  %v8725_v19 = vpop.f32.mrf.mxu1  ;;  %v6439_v27 = vld [vmem:[%s11590_s2 + $0x7d0] sm:$0xff] }
 0x24f   : > { %3130 = vmatprep.subr.mxu0 %v6414_v32  ;;  %2914 = vmatprep.subr.mxu1 %v6380_v26 }
 0x250   : > { %3131 = vmatpush1.msra.mxu0 %v6413_v33  ;;  %3164 = vmatprep.mubr.f32.mxu0 %v7055_v44  ;;  %v8735_v60 = vpop.f32.mrf.mxu1  ;;  %v8871_v33 = vld [vmem:[#allocation2 + $0x62] sm:$0xff] }
 0x251   : > { %6361 = vmatmul.mubr.msk.f32.gmra.mxu1 %vm721_vm1, %v8469_v43  ;;  %6445 = vmatmul.mubr.msk.f32.vlgmr.msra.gmra.mxu0 %vm721_vm1, %v8733_v48 }
 0x252   : > { %2915 = vmatpush1.msra.mxu1 %v6379_v40  ;;  %2661 = vmatprep.mubr.f32.mxu1 %v7055_v44  ;;  %v8751_v50 = vpop.f32.mrf.mxu1  ;;  %v1265_v51 = vpop.f32.mrf.mxu0 }
 0x253   : > { %2916 = vmatprep.subr.mxu1 %v6376_v23  ;;  %3170 = vmatprep.mubr.f32.mxu0 %v7055_v44  ;;  %v8755_v43 = vadd.f32 %v1265_v51, %v8648_v63  ;;  %v6477_v23 = vld [vmem:[%s11590_s2 + $0x880] sm:$0xff] }
 0x254   : > { %2917 = vmatpush1.msra.mxu1 %v6375_v41  ;;  %v8762_v62 = vpop.f32.mrf.mxu1  ;;  %v1267_v59 = vpop.f32.mrf.mxu0  ;;  %3440 = vmatprep.subr.mxu0 %v6490_v45  ;;  %v6435_v45 = vld [vmem:[%s11590_s2 + $0x7b0] sm:$0xff] }
 0x255   : > { %6362 = vmatmul.mubr.msk.f32.gmra.mxu1 %vm721_vm1, %v8486_v13  ;;  %6446 = vmatmul.mubr.msk.f32.gmra.mxu0 %vm721_vm1, %v8760_v53  ;;  %v8772_v54 = vadd.f32 %v1267_v59, %v8662_v18  ;;  %v8904_v59 = vld [vmem:[#allocation2 + $0x72] sm:$0xff] }
 0x256   : > { %2667 = vmatprep.mubr.f32.mxu1 %v7055_v44  ;;  %2918 = vmatprep.subr.mxu1 %v6372_v57  ;;  %v8781_v17 = vpop.f32.mrf.mxu1  ;;  %v1271_v13 = vpop.f32.mrf.mxu0 }
 0x257   : > { %3176 = vmatprep.mubr.f32.mxu0 %v7055_v44  ;;  %v8785_v31 = vadd.f32 %v1271_v13, %v8672_v56  ;;  %2919 = vmatpush1.msra.mxu1 %v6371_v7  ;;  %v6481_v56 = vld [vmem:[%s11590_s2 + $0x8a0] sm:$0xff]  ;;  %v6432_v13 = vld [vmem:[%s11590_s2 + $0x798] sm:$0xff] }
 0x258   : > { %v8789_v61 = vpop.f32.mrf.mxu1  ;;  %v1273_v42 = vpop.f32.mrf.mxu0  ;;  %2920 = vmatprep.subr.mxu1 %v6368_v4  ;;  %3441 = vmatpush1.msra.mxu0 %v6489_v25  ;;  %v6470_v25 = vld [vmem:[%s11590_s2 + $0x848] sm:$0xff] }
 0x259   : > { %6363 = vmatmul.mubr.msk.f32.gmra.mxu1 %vm721_vm1, %v8509_v47  ;;  %6447 = vmatmul.mubr.msk.f32.gmra.mxu0 %vm721_vm1, %v8787_v0  ;;  %v8802_v3 = vadd.f32 %v1273_v42, %v8686_v1  ;;  %v6469_v42 = vld [vmem:[%s11590_s2 + $0x840] sm:$0xff] }
 0x25a   : > { %2673 = vmatprep.mubr.f32.mxu1 %v7055_v44  ;;  %3182 = vmatprep.mubr.f32.mxu0 %v7055_v44  ;;  %v8812_v52 = vpop.f32.mrf.mxu1  ;;  %v1277_v47 = vpop.f32.mrf.mxu0 }
 0x25b   : > { %v8815_v63 = vadd.f32 %v1277_v47, %v8696_v12  ;;  %2921 = vmatpush1.msra.mxu1 %v6367_v9  ;;  %3442 = vmatprep.subr.mxu0 %v6486_v30  ;;  %v6431_v30 = vld [vmem:[%s11590_s2 + $0x790] sm:$0xff]  ;;  %v6465_v47 = vld [vmem:[%s11590_s2 + $0x820] sm:$0xff] }
 0x25c   : > { %v8819_v16 = vpop.f32.mrf.mxu1  ;;  %v1279_v18 = vpop.f32.mrf.mxu0  ;;  %3229 = vmatprep.subr.mxu1 %v6444_v35  ;;  %3443 = vmatpush1.msra.mxu0 %v6485_v36  ;;  %v6466_v35 = vld [vmem:[%s11590_s2 + $0x828] sm:$0xff] }
 0x25d   : > { %6364 = vmatmul.mubr.msk.f32.gmra.mxu1 %vm721_vm1, %v8532_v49  ;;  %6448 = vmatmul.mubr.msk.f32.gmra.mxu0 %vm721_vm1, %v8817_v2  ;;  %v8829_v39 = vadd.f32 %v1279_v18, %v8713_v24  ;;  %v6443_v49 = vld [vmem:[%s11590_s2 + $0x7f0] sm:$0xff]  ;;  %v6478_v24 = vld [vmem:[%s11590_s2 + $0x888] sm:$0xff] }
 0x25e   : > { %2954 = vmatprep.mubr.f32.mxu1 %v7055_v44  ;;  %3188 = vmatprep.mubr.f32.mxu0 %v7055_v44  ;;  %v8836_v34 = vpop.f32.mrf.mxu1  ;;  %v1283_v21 = vpop.f32.mrf.mxu0  ;;  %v8937_v36 = vld [vmem:[#allocation2 + $0x82] sm:$0xff] }
 0x25f   : > { %v8839_v1 = vadd.f32 %v1283_v21, %v8725_v19  ;;  %3444 = vmatprep.subr.mxu0 %v6482_v5  ;;  %v6428_v21 = vld [vmem:[%s11590_s2 + $0x778] sm:$0xff] }
 0x260   : > { %v8846_v28 = vpop.f32.mrf.mxu1  ;;  %v1285_v12 = vpop.f32.mrf.mxu0  ;;  %3445 = vmatpush1.msra.mxu0 %v6481_v56  ;;  %v6462_v56 = vld [vmem:[%s11590_s2 + $0x808] sm:$0xff] }
 0x261   : > { %6405 = vmatmul.mubr.msk.f32.vlgmr.msra.gmra.mxu1 %vm721_vm1, %v8555_v15  ;;  %6449 = vmatmul.mubr.msk.f32.gmra.mxu0 %vm721_vm1, %v8844_v46  ;;  %v8856_v55 = vadd.f32 %v1285_v12, %v8735_v60  ;;  %v6436_v60 = vld [vmem:[%s11590_s2 + $0x7b8] sm:$0xff] }
 0x262   : > { %3230 = vmatpush1.msra.mxu1 %v6443_v49  ;;  %2960 = vmatprep.mubr.f32.mxu1 %v7055_v44  ;;  %v8865_v32 = vpop.f32.mrf.mxu1  ;;  %v1289_v15 = vpop.f32.mrf.mxu0 }
 0x263   : > { %3194 = vmatprep.mubr.f32.mxu0 %v7055_v44  ;;  %3231 = vmatprep.subr.mxu1 %v6440_v29  ;;  %v8869_v26 = vadd.f32 %v1289_v15, %v8751_v50  ;;  %v6474_v50 = vld [vmem:[%s11590_s2 + $0x868] sm:$0xff]  ;;  %v6427_v29 = vld [vmem:[%s11590_s2 + $0x770] sm:$0xff] }
 0x264   : > { %3232 = vmatpush1.msra.mxu1 %v6439_v27  ;;  %v8873_v19 = vpop.f32.mrf.mxu1  ;;  %v1291_v40 = vpop.f32.mrf.mxu0  ;;  %3446 = vmatprep.subr.mxu0 %v6478_v24  ;;  %v8974_v15 = vld [vmem:[#allocation2 + $0x1f0] sm:$0xff] }
 0x265   : > { %6406 = vmatmul.mubr.msk.f32.gmra.mxu1 %vm721_vm1, %v8575_v6  ;;  %6450 = vmatmul.mubr.msk.f32.gmra.mxu0 %vm721_vm1, %v8871_v33  ;;  %v8886_v41 = vadd.f32 %v1291_v40, %v8762_v62  ;;  %v6473_v62 = vld [vmem:[%s11590_s2 + $0x860] sm:$0xff] }
 0x266   : > { %2966 = vmatprep.mubr.f32.mxu1 %v7055_v44  ;;  %3200 = vmatprep.mubr.f32.mxu0 %v7055_v44  ;;  %v8896_v51 = vpop.f32.mrf.mxu1  ;;  %v1295_v6 = vpop.f32.mrf.mxu0 }
 0x267   : > { %3233 = vmatprep.subr.mxu1 %v6436_v60  ;;  %3447 = vmatpush1.msra.mxu0 %v6477_v23  ;;  %v8899_v57 = vadd.f32 %v1295_v6, %v8781_v17  ;;  %v6423_v23 = vld [vmem:[%s11590_s2 + $0x750] sm:$0xff] }
 0x268   : > { %3234 = vmatpush1.msra.mxu1 %v6435_v45  ;;  %3448 = vmatprep.subr.mxu0 %v6474_v50  ;;  %v8906_v7 = vpop.f32.mrf.mxu1  ;;  %v1297_v4 = vpop.f32.mrf.mxu0  ;;  %v6538_v45 = vld [vmem:[%s11590_s2 + $0x9e8] sm:$0xff] }
 0x269   : > { %6407 = vmatmul.mubr.msk.f32.gmra.mxu1 %vm721_vm1, %v8592_v58  ;;  %6451 = vmatmul.mubr.msk.f32.gmra.mxu0 %vm721_vm1, %v8904_v59  ;;  %v8916_v17 = vadd.f32 %v1297_v4, %v8789_v61  ;;  %v9001_v4 = vld [vmem:[#allocation2 + $0x200] sm:$0xff] }
 0x26a   : > { %3449 = vmatpush1.msra.mxu0 %v6473_v62  ;;  %2972 = vmatprep.mubr.f32.mxu1 %v7055_v44  ;;  %v8925_v9 = vpop.f32.mrf.mxu1  ;;  %v1301_v58 = vpop.f32.mrf.mxu0  ;;  %v6420_v62 = vld [vmem:[%s11590_s2 + $0x738] sm:$0xff] }
 0x26b   : > { %3450 = vmatprep.subr.mxu0 %v6470_v25  ;;  %3206 = vmatprep.mubr.f32.mxu0 %v7055_v44  ;;  %v8929_v61 = vadd.f32 %v1301_v58, %v8812_v52  ;;  %v6416_v58 = vld [vmem:[%s11590_s2 + $0x718] sm:$0xff] }
 0x26c   : > { %3235 = vmatprep.subr.mxu1 %v6432_v13  ;;  %3451 = vmatpush1.msra.mxu0 %v6469_v42  ;;  %v8942_v18 = vpop.f32.mrf.mxu1  ;;  %v1303_v52 = vpop.f32.mrf.mxu0 }
 0x26d   : > { %6408 = vmatmul.mubr.msk.f32.gmra.mxu1 %vm721_vm1, %v8612_v10  ;;  %6452 = vmatmul.mubr.msk.f32.gmra.mxu0 %vm721_vm1, %v8937_v36  ;;  %v8949_v5 = vadd.f32 %v1303_v52, %v8819_v16  ;;  %v6461_v10 = vld [vmem:[%s11590_s2 + $0x800] sm:$0xff] }
 0x26e   : > { %3236 = vmatpush1.msra.mxu1 %v6431_v30  ;;  %3452 = vmatprep.subr.mxu0 %v6466_v35  ;;  %v8960_v49 = vpop.f32.mrf.mxu1  ;;  %v1550_v12 = vpop.f32.mrf.mxu0 }
 0x26f   : > { %3453 = vmatpush1.msra.mxu0 %v6465_v47  ;;  %2978 = vmatprep.mubr.f32.mxu1 %v7055_v44  ;;  %v8964_v16 = vadd.f32 %v1550_v12, %v8001_v37  ;;  %v6424_v37 = vld [vmem:[%s11590_s2 + $0x758] sm:$0xff]  ;;  %v9028_v47 = vld [vmem:[#allocation2 + $0x210] sm:$0xff]  ;;  %v6533_v12 = vld [vmem:[%s11590_s2 + $0x9c0] sm:$0xff] }
 0x270   : > { %3454 = vmatprep.subr.mxu0 %v6462_v56  ;;  %3237 = vmatprep.subr.mxu1 %v6428_v21  ;;  %v8969_v27 = vpop.f32.mrf.mxu1  ;;  %v8971_v24 = vpop.f32.mrf.mxu0  ;;  %v6415_v56 = vld [vmem:[%s11590_s2 + $0x710] sm:$0xff] }
 0x271   : > { %3455 = vmatpush1.msra.mxu0 %v6461_v10  ;;  %3488 = vmatprep.mubr.f32.mxu0 %v7055_v44  ;;  %v6492_v10 = vld [vmem:[%s11590_s2 + $0x8f8] sm:$0xff] }
 0x272   : > { %6409 = vmatmul.mubr.msk.f32.gmra.mxu1 %vm721_vm1, %v8629_v11  ;;  %6493 = vmatmul.mubr.msk.f32.vlgmr.msra.gmra.mxu0 %vm721_vm1, %v8974_v15  ;;  %v8983_v40 = vpop.f32.mrf.mxu1  ;;  %v1556_v60 = vpop.f32.mrf.mxu0 }
 0x273   : > { %3238 = vmatpush1.msra.mxu1 %v6427_v29  ;;  %2984 = vmatprep.mubr.f32.mxu1 %v7055_v44  ;;  %v8993_v50 = vadd.f32 %v1556_v60, %v8755_v43  ;;  %v6419_v43 = vld [vmem:[%s11590_s2 + $0x730] sm:$0xff]  ;;  %v9058_v60 = vld [vmem:[#allocation2 + $0x220] sm:$0xff] }
 0x274   : > { %3239 = vmatprep.subr.mxu1 %v6424_v37  ;;  %3494 = vmatprep.mubr.f32.mxu0 %v7055_v44  ;;  %v8996_v11 = vpop.f32.mrf.mxu1  ;;  %v1558_v6 = vpop.f32.mrf.mxu0 }
 0x275   : > { %3240 = vmatpush1.msra.mxu1 %v6423_v23  ;;  %v9004_v25 = vadd.f32 %v1558_v6, %v8772_v54  ;;  %3764 = vmatprep.subr.mxu0 %v6538_v45  ;;  %v6537_v54 = vld [vmem:[%s11590_s2 + $0x9e0] sm:$0xff]  ;;  %v6530_v45 = vld [vmem:[%s11590_s2 + $0x9a8] sm:$0xff] }
 0x276   : > { %6410 = vmatmul.mubr.msk.f32.gmra.mxu1 %vm721_vm1, %v8650_v14  ;;  %6494 = vmatmul.mubr.msk.f32.gmra.mxu0 %vm721_vm1, %v9001_v4  ;;  %v9013_v13 = vpop.f32.mrf.mxu1  ;;  %v1562_v42 = vpop.f32.mrf.mxu0 }
 0x277   : > { %2990 = vmatprep.mubr.f32.mxu1 %v7055_v44  ;;  %3241 = vmatprep.subr.mxu1 %v6420_v62  ;;  %v9023_v30 = vadd.f32 %v1562_v42, %v8785_v31  ;;  %v6534_v31 = vld [vmem:[%s11590_s2 + $0x9c8] sm:$0xff]  ;;  %v6529_v62 = vld [vmem:[%s11590_s2 + $0x9a0] sm:$0xff] }
 0x278   : > { %3500 = vmatprep.mubr.f32.mxu0 %v7055_v44  ;;  %3242 = vmatpush1.msra.mxu1 %v6419_v43  ;;  %v9026_v14 = vpop.f32.mrf.mxu1  ;;  %v1564_v35 = vpop.f32.mrf.mxu0 }
 0x279   : > { %v9031_v52 = vadd.f32 %v1564_v35, %v8802_v3  ;;  %3243 = vmatprep.subr.mxu1 %v6416_v58  ;;  %3765 = vmatpush1.msra.mxu0 %v6537_v54  ;;  %v9084_v54 = vld [vmem:[#allocation2 + $0x230] sm:$0xff] }
 0x27a   : > { %6411 = vmatmul.mubr.msk.f32.gmra.mxu1 %vm721_vm1, %v8677_v20  ;;  %6495 = vmatmul.mubr.msk.f32.gmra.mxu0 %vm721_vm1, %v9028_v47  ;;  %v9043_v21 = vpop.f32.mrf.mxu1  ;;  %v1568_v3 = vpop.f32.mrf.mxu0 }
 0x27b   : > { %2996 = vmatprep.mubr.f32.mxu1 %v7055_v44  ;;  %3506 = vmatprep.mubr.f32.mxu0 %v7055_v44  ;;  %v9054_v20 = vadd.f32 %v1568_v3, %v8815_v63 }
 0x27c   : > { %3244 = vmatpush1.msra.mxu1 %v6415_v56  ;;  %v9056_v29 = vpop.f32.mrf.mxu1  ;;  %v1570_v37 = vpop.f32.mrf.mxu0  ;;  %3766 = vmatprep.subr.mxu0 %v6534_v31 }
 0x27d   : > { %v9061_v23 = vadd.f32 %v1570_v37, %v8829_v39  ;;  %3553 = vmatprep.subr.mxu1 %v6492_v10  ;;  %3767 = vmatpush1.msra.mxu0 %v6533_v12  ;;  %v9113_v37 = vld [vmem:[#allocation2 + $0x240] sm:$0xff] }
 0x27e   : > { %6412 = vmatmul.mubr.msk.f32.gmra.mxu1 %vm721_vm1, %v8704_v38  ;;  %6496 = vmatmul.mubr.msk.f32.gmra.mxu0 %vm721_vm1, %v9058_v60  ;;  %v1372_v63 = vpop.f32.mrf.mxu1  ;;  %v1574_v6 = vpop.f32.mrf.mxu0  ;;  %v6491_v38 = vld [vmem:[%s11590_s2 + $0x8f0] sm:$0xff] }
 0x27f   : > { %3277 = vmatprep.mubr.f32.mxu1 %v7055_v44  ;;  %3512 = vmatprep.mubr.f32.mxu0 %v7055_v44  ;;  %v9076_v39 = vadd.f32 %v1372_v63, %v8836_v34  ;;  %v9079_v43 = vadd.f32 %v1574_v6, %v8839_v1  ;;  %v6488_v34 = vld [vmem:[%s11590_s2 + $0x8d8] sm:$0xff] }
 0x280   : > { %v1374_v42 = vpop.f32.mrf.mxu1  ;;  %v1576_v58 = vpop.f32.mrf.mxu0  ;;  %3768 = vmatprep.subr.mxu0 %v6530_v45 }
 0x281   : > { %v9087_v35 = vadd.f32 %v1374_v42, %v8846_v28  ;;  %v9090_v56 = vadd.f32 %v1576_v58, %v8856_v55  ;;  %3769 = vmatpush1.msra.mxu0 %v6529_v62  ;;  %v6487_v28 = vld [vmem:[%s11590_s2 + $0x8d0] sm:$0xff]  ;;  %v6526_v55 = vld [vmem:[%s11590_s2 + $0x988] sm:$0xff]  ;;  %v6521_v42 = vld [vmem:[%s11590_s2 + $0x960] sm:$0xff] }
 0x282   : > { %6453 = vmatmul.mubr.msk.f32.vlgmr.msra.gmra.mxu1 %vm721_vm1, %v8733_v48  ;;  %6497 = vmatmul.mubr.msk.f32.gmra.mxu0 %vm721_vm1, %v9084_v54  ;;  %v1378_v1 = vpop.f32.mrf.mxu1  ;;  %v1580_v31 = vpop.f32.mrf.mxu0  ;;  %v6522_v62 = vld [vmem:[%s11590_s2 + $0x968] sm:$0xff] }
 0x283   : > { %3554 = vmatpush1.msra.mxu1 %v6491_v38  ;;  %3283 = vmatprep.mubr.f32.mxu1 %v7055_v44  ;;  %v9107_v3 = vadd.f32 %v1378_v1, %v8865_v32  ;;  %v9110_v48 = vadd.f32 %v1580_v31, %v8869_v26  ;;  %v6484_v32 = vld [vmem:[%s11590_s2 + $0x8b8] sm:$0xff]  ;;  %v6525_v26 = vld [vmem:[%s11590_s2 + $0x980] sm:$0xff]  ;;  %v9148_v1 = vld [vmem:[#allocation2 + $0x250] sm:$0xff] }
 0x284   : > { %3518 = vmatprep.mubr.f32.mxu0 %v7055_v44  ;;  %3555 = vmatprep.subr.mxu1 %v6488_v34  ;;  %v1380_v10 = vpop.f32.mrf.mxu1  ;;  %v1582_v12 = vpop.f32.mrf.mxu0 }
 0x285   : > { %3556 = vmatpush1.msra.mxu1 %v6487_v28  ;;  %v9116_v45 = vadd.f32 %v1380_v10, %v8873_v19  ;;  %v9119_v63 = vadd.f32 %v1582_v12, %v8886_v41  ;;  %3770 = vmatprep.subr.mxu0 %v6526_v55  ;;  %v6483_v41 = vld [vmem:[%s11590_s2 + $0x8b0] sm:$0xff]  ;;  %v6480_v28 = vld [vmem:[%s11590_s2 + $0x898] sm:$0xff] }
 0x286   : > { %6454 = vmatmul.mubr.msk.f32.gmra.mxu1 %vm721_vm1, %v8760_v53  ;;  %6498 = vmatmul.mubr.msk.f32.gmra.mxu0 %vm721_vm1, %v9113_v37  ;;  %v1384_v19 = vpop.f32.mrf.mxu1  ;;  %v1586_v6 = vpop.f32.mrf.mxu0  ;;  %v6479_v12 = vld [vmem:[%s11590_s2 + $0x890] sm:$0xff] }
 0x287   : > { %3289 = vmatprep.mubr.f32.mxu1 %v7055_v44  ;;  %3524 = vmatprep.mubr.f32.mxu0 %v7055_v44  ;;  %v9140_v38 = vadd.f32 %v1384_v19, %v8896_v51  ;;  %v9143_v53 = vadd.f32 %v1586_v6, %v8899_v57  ;;  %v6518_v57 = vld [vmem:[%s11590_s2 + $0x948] sm:$0xff]  ;;  %v6513_v6 = vld [vmem:[%s11590_s2 + $0x920] sm:$0xff] }
 0x288   : > { %3557 = vmatprep.subr.mxu1 %v6484_v32  ;;  %3771 = vmatpush1.msra.mxu0 %v6525_v26  ;;  %v1386_v58 = vpop.f32.mrf.mxu1  ;;  %v1588_v34 = vpop.f32.mrf.mxu0  ;;  %v6514_v32 = vld [vmem:[%s11590_s2 + $0x928] sm:$0xff] }
 0x289   : > { %3558 = vmatpush1.msra.mxu1 %v6483_v41  ;;  %3772 = vmatprep.subr.mxu0 %v6522_v62  ;;  %v9151_v31 = vadd.f32 %v1386_v58, %v8906_v7  ;;  %v9154_v51 = vadd.f32 %v1588_v34, %v8916_v17  ;;  %v6517_v7 = vld [vmem:[%s11590_s2 + $0x940] sm:$0xff] }
 0x28a   : > { %6455 = vmatmul.mubr.msk.f32.gmra.mxu1 %vm721_vm1, %v8787_v0  ;;  %6499 = vmatmul.mubr.msk.f32.gmra.mxu0 %vm721_vm1, %v9148_v1  ;;  %v1390_v17 = vpop.f32.mrf.mxu1  ;;  %v1592_v55 = vpop.f32.mrf.mxu0 }
 0x28b   : > { %3773 = vmatpush1.msra.mxu0 %v6521_v42  ;;  %3295 = vmatprep.mubr.f32.mxu1 %v7055_v44  ;;  %v9171_v10 = vadd.f32 %v1390_v17, %v8925_v9  ;;  %v9174_v0 = vadd.f32 %v1592_v55, %v8929_v61  ;;  %v1262_v9 = vadd.f32 %v8730_v22, %v8634_v8  ;;  %v9185_v61 = vld [vmem:[#allocation2 + $0x260] sm:$0xff]  ;;  %v6510_v8 = vld [vmem:[%s11590_s2 + $0x908] sm:$0xff]  ;;  %v6476_v22 = vld [vmem:[%s11590_s2 + $0x878] sm:$0xff] }
 0x28c   : > { %3774 = vmatprep.subr.mxu0 %v6518_v57  ;;  %3530 = vmatprep.mubr.f32.mxu0 %v7055_v44  ;;  %v1392_v26 = vpop.f32.mrf.mxu1  ;;  %v1594_v19 = vpop.f32.mrf.mxu0 }
 0x28d   : > { %3559 = vmatprep.subr.mxu1 %v6480_v28  ;;  %3775 = vmatpush1.msra.mxu0 %v6517_v7  ;;  %v9191_v41 = vadd.f32 %v1392_v26, %v8942_v18  ;;  %v9194_v62 = vadd.f32 %v1594_v19, %v8949_v5  ;;  %v1711_v58 = vadd.f32 %v8971_v24, %v1262_v9  ;;  %v6475_v24 = vld [vmem:[%s11590_s2 + $0x870] sm:$0xff]  ;;  %v6586_v19 = vld [vmem:[%s11590_s2 + $0xae8] sm:$0xff] }
 0x28e   : > { %6456 = vmatmul.mubr.msk.f32.gmra.mxu1 %vm721_vm1, %v8817_v2  ;;  %6500 = vmatmul.mubr.msk.f32.gmra.mxu0 %vm721_vm1, %v9185_v61  ;;  %v1396_v42 = vpop.f32.mrf.mxu1  ;;  %v1873_v18 = vpop.f32.mrf.mxu0  ;;  %v6509_v2 = vld [vmem:[%s11590_s2 + $0x900] sm:$0xff]  ;;  %v6471_v26 = vld [vmem:[%s11590_s2 + $0x850] sm:$0xff] }
 0x28f   : > { %3560 = vmatpush1.msra.mxu1 %v6479_v12  ;;  %3776 = vmatprep.subr.mxu0 %v6514_v32  ;;  %v9211_v5 = vadd.f32 %v1396_v42, %v8960_v49  ;;  %v9214_v34 = vadd.f32 %v1873_v18, %v8964_v16  ;;  %v9226_v49 = vld [vmem:[#allocation2 + $0x151] sm:$0xff] }
 0x290   : > { %3777 = vmatpush1.msra.mxu0 %v6513_v6  ;;  %3301 = vmatprep.mubr.f32.mxu1 %v7055_v44  ;;  %v1398_v57 = vpop.f32.mrf.mxu1  ;;  %v1875_v28 = vpop.f32.mrf.mxu0  ;;  %v6472_v16 = vld [vmem:[%s11590_s2 + $0x858] sm:$0xff]  ;;  %v6467_v18 = vld [vmem:[%s11590_s2 + $0x830] sm:$0xff] }
 0x291   : > { %3778 = vmatprep.subr.mxu0 %v6510_v8  ;;  %3561 = vmatprep.subr.mxu1 %v6476_v22  ;;  %v9221_v7 = vadd.f32 %v1398_v57, %v8969_v27  ;;  %v9223_v17 = vadd.f32 %v1875_v28, %v1711_v58  ;;  %v6468_v6 = vld [vmem:[%s11590_s2 + $0x838] sm:$0xff]  ;;  %v9258_v8 = vld [vmem:[#allocation2 + $0x161] sm:$0xff] }
 0x292   : > { %3779 = vmatpush1.msra.mxu0 %v6509_v2  ;;  %3812 = vmatprep.mubr.f32.mxu0 %v7055_v44  ;;  %v1402_v55 = vpop.f32.mrf.mxu1  ;;  %v1879_v12 = vpop.f32.mrf.mxu0  ;;  %v6464_v58 = vld [vmem:[%s11590_s2 + $0x818] sm:$0xff]  ;;  %v6585_v2 = vld [vmem:[%s11590_s2 + $0xae0] sm:$0xff] }
 0x293   : > { %6457 = vmatmul.mubr.msk.f32.gmra.mxu1 %vm721_vm1, %v8844_v46  ;;  %6541 = vmatmul.mubr.msk.f32.vlgmr.msra.gmra.mxu0 %vm721_vm1, %v9226_v49  ;;  %v9236_v27 = vadd.f32 %v1402_v55, %v8983_v40  ;;  %v9239_v32 = vadd.f32 %v1879_v12, %v8993_v50  ;;  %v9287_v28 = vld [vmem:[#allocation2 + $0x171] sm:$0xff]  ;;  %v6582_v12 = vld [vmem:[%s11590_s2 + $0xac8] sm:$0xff] }
 0x294   : > { %3562 = vmatpush1.msra.mxu1 %v6475_v24  ;;  %3307 = vmatprep.mubr.f32.mxu1 %v7055_v44  ;;  %v1404_v46 = vpop.f32.mrf.mxu1  ;;  %v1881_v9 = vpop.f32.mrf.mxu0  ;;  %v6463_v55 = vld [vmem:[%s11590_s2 + $0x810] sm:$0xff] }
 0x295   : > { %3563 = vmatprep.subr.mxu1 %v6472_v16  ;;  %3818 = vmatprep.mubr.f32.mxu0 %v7055_v44  ;;  %v9250_v40 = vadd.f32 %v1404_v46, %v8996_v11  ;;  %v9253_v50 = vadd.f32 %v1881_v9, %v9004_v25  ;;  %v9319_v9 = vld [vmem:[#allocation2 + $0x181] sm:$0xff] }
 0x296   : > { %3564 = vmatpush1.msra.mxu1 %v6471_v26  ;;  %v1408_v22 = vpop.f32.mrf.mxu1  ;;  %v1885_v42 = vpop.f32.mrf.mxu0  ;;  %4087 = vmatprep.subr.mxu0 %v6586_v19  ;;  %v6540_v26 = vld [vmem:[%s11590_s2 + $0x9f8] sm:$0xff]  ;;  %v6581_v19 = vld [vmem:[%s11590_s2 + $0xac0] sm:$0xff] }
 0x297   : > { %6458 = vmatmul.mubr.msk.f32.gmra.mxu1 %vm721_vm1, %v8871_v33  ;;  %6542 = vmatmul.mubr.msk.f32.gmra.mxu0 %vm721_vm1, %v9258_v8  ;;  %v9268_v11 = vadd.f32 %v1408_v22, %v9013_v13  ;;  %v9271_v25 = vadd.f32 %v1885_v42, %v9023_v30  ;;  %v6578_v42 = vld [vmem:[%s11590_s2 + $0xaa8] sm:$0xff] }
 0x298   : > { %3313 = vmatprep.mubr.f32.mxu1 %v7055_v44  ;;  %3565 = vmatprep.subr.mxu1 %v6468_v6  ;;  %v1410_v33 = vpop.f32.mrf.mxu1  ;;  %v1887_v57 = vpop.f32.mrf.mxu0 }
 0x299   : > { %3824 = vmatprep.mubr.f32.mxu0 %v7055_v44  ;;  %3566 = vmatpush1.msra.mxu1 %v6467_v18  ;;  %v9282_v13 = vadd.f32 %v1410_v33, %v9026_v14  ;;  %v9285_v30 = vadd.f32 %v1887_v57, %v9031_v52  ;;  %v6577_v18 = vld [vmem:[%s11590_s2 + $0xaa0] sm:$0xff]  ;;  %v9348_v33 = vld [vmem:[#allocation2 + $0x191] sm:$0xff] }
 0x29a   : > { %3567 = vmatprep.subr.mxu1 %v6464_v58  ;;  %v1414_v24 = vpop.f32.mrf.mxu1  ;;  %v1891_v16 = vpop.f32.mrf.mxu0  ;;  %4088 = vmatpush1.msra.mxu0 %v6585_v2  ;;  %v6536_v57 = vld [vmem:[%s11590_s2 + $0x9d8] sm:$0xff] }
 0x29b   : > { %6459 = vmatmul.mubr.msk.f32.gmra.mxu1 %vm721_vm1, %v8904_v59  ;;  %6543 = vmatmul.mubr.msk.f32.gmra.mxu0 %vm721_vm1, %v9287_v28  ;;  %v9300_v14 = vadd.f32 %v1414_v24, %v9043_v21  ;;  %v9303_v52 = vadd.f32 %v1891_v16, %v9054_v20 }
 0x29c   : > { %3319 = vmatprep.mubr.f32.mxu1 %v7055_v44  ;;  %3830 = vmatprep.mubr.f32.mxu0 %v7055_v44  ;;  %v1416_v59 = vpop.f32.mrf.mxu1  ;;  %v1893_v46 = vpop.f32.mrf.mxu0 }
 0x29d   : > { %3568 = vmatpush1.msra.mxu1 %v6463_v55  ;;  %v9314_v21 = vadd.f32 %v1416_v59, %v9056_v29  ;;  %v9317_v20 = vadd.f32 %v1893_v46, %v9061_v23  ;;  %4089 = vmatprep.subr.mxu0 %v6582_v12  ;;  %v6535_v55 = vld [vmem:[%s11590_s2 + $0x9d0] sm:$0xff]  ;;  %v6574_v12 = vld [vmem:[%s11590_s2 + $0xa88] sm:$0xff]  ;;  %v6532_v59 = vld [vmem:[%s11590_s2 + $0x9b8] sm:$0xff] }
 0x29e   : > { %3877 = vmatprep.subr.mxu1 %v6540_v26  ;;  %v1663_v6 = vpop.f32.mrf.mxu1  ;;  %v1897_v22 = vpop.f32.mrf.mxu0  ;;  %4090 = vmatpush1.msra.mxu0 %v6581_v19  ;;  %v9377_v19 = vld [vmem:[#allocation2 + $0x1a1] sm:$0xff] }
 0x29f   : > { %6460 = vmatmul.mubr.msk.f32.gmra.mxu1 %vm721_vm1, %v8937_v36  ;;  %6544 = vmatmul.mubr.msk.f32.gmra.mxu0 %vm721_vm1, %v9319_v9  ;;  %v9329_v29 = vadd.f32 %v1663_v6, %v9076_v39  ;;  %v9332_v23 = vadd.f32 %v1897_v22, %v9079_v43  ;;  %v6539_v36 = vld [vmem:[%s11590_s2 + $0x9f0] sm:$0xff]  ;;  %v6573_v46 = vld [vmem:[%s11590_s2 + $0xa80] sm:$0xff] }
 0x2a0   : > { %3601 = vmatprep.mubr.f32.mxu1 %v7055_v44  ;;  %3836 = vmatprep.mubr.f32.mxu0 %v7055_v44  ;;  %v1665_v58 = vpop.f32.mrf.mxu1  ;;  %v1899_v2 = vpop.f32.mrf.mxu0 }
 0x2a1   : > { %v9343_v39 = vadd.f32 %v1665_v58, %v9087_v35  ;;  %v9346_v43 = vadd.f32 %v1899_v2, %v9090_v56  ;;  %4091 = vmatprep.subr.mxu0 %v6578_v42  ;;  %v6531_v42 = vld [vmem:[%s11590_s2 + $0x9b0] sm:$0xff] }
 0x2a2   : > { %v1669_v24 = vpop.f32.mrf.mxu1  ;;  %v1903_v16 = vpop.f32.mrf.mxu0  ;;  %4092 = vmatpush1.msra.mxu0 %v6577_v18  ;;  %v6570_v18 = vld [vmem:[%s11590_s2 + $0xa68] sm:$0xff] }
 0x2a3   : > { %6501 = vmatmul.mubr.msk.f32.vlgmr.msra.gmra.mxu1 %vm721_vm1, %v8974_v15  ;;  %6545 = vmatmul.mubr.msk.f32.gmra.mxu0 %vm721_vm1, %v9348_v33  ;;  %v9358_v35 = vadd.f32 %v1669_v24, %v9107_v3  ;;  %v9361_v56 = vadd.f32 %v1903_v16, %v9110_v48 }
 0x2a4   : > { %3878 = vmatpush1.msra.mxu1 %v6539_v36  ;;  %3607 = vmatprep.mubr.f32.mxu1 %v7055_v44  ;;  %v1671_v15 = vpop.f32.mrf.mxu1  ;;  %v1905_v26 = vpop.f32.mrf.mxu0  ;;  %v9412_v36 = vld [vmem:[#allocation2 + $0x1b1] sm:$0xff] }
 0x2a5   : > { %3842 = vmatprep.mubr.f32.mxu0 %v7055_v44  ;;  %3879 = vmatprep.subr.mxu1 %v6536_v57  ;;  %v9372_v3 = vadd.f32 %v1671_v15, %v9116_v45  ;;  %v9375_v48 = vadd.f32 %v1905_v26, %v9119_v63  ;;  %v6566_v57 = vld [vmem:[%s11590_s2 + $0xa48] sm:$0xff]  ;;  %v6527_v26 = vld [vmem:[%s11590_s2 + $0x990] sm:$0xff] }
 0x2a6   : > { %3880 = vmatpush1.msra.mxu1 %v6535_v55  ;;  %4093 = vmatprep.subr.mxu0 %v6574_v12  ;;  %v1675_v6 = vpop.f32.mrf.mxu1  ;;  %v1909_v22 = vpop.f32.mrf.mxu0 }
 0x2a7   : > { %6502 = vmatmul.mubr.msk.f32.gmra.mxu1 %vm721_vm1, %v9001_v4  ;;  %6546 = vmatmul.mubr.msk.f32.gmra.mxu0 %vm721_vm1, %v9377_v19  ;;  %v9390_v45 = vadd.f32 %v1675_v6, %v9140_v38  ;;  %v9393_v63 = vadd.f32 %v1909_v22, %v9143_v53  ;;  %v6569_v38 = vld [vmem:[%s11590_s2 + $0xa60] sm:$0xff] }
 0x2a8   : > { %3613 = vmatprep.mubr.f32.mxu1 %v7055_v44  ;;  %3848 = vmatprep.mubr.f32.mxu0 %v7055_v44  ;;  %v1677_v4 = vpop.f32.mrf.mxu1  ;;  %v1911_v58 = vpop.f32.mrf.mxu0  ;;  %v6561_v6 = vld [vmem:[%s11590_s2 + $0xa20] sm:$0xff] }
 0x2a9   : > { %3881 = vmatprep.subr.mxu1 %v6532_v59  ;;  %4094 = vmatpush1.msra.mxu0 %v6573_v46  ;;  %v9407_v53 = vadd.f32 %v1677_v4, %v9151_v31  ;;  %v9410_v2 = vadd.f32 %v1911_v58, %v9154_v51  ;;  %v6528_v31 = vld [vmem:[%s11590_s2 + $0x998] sm:$0xff]  ;;  %v6565_v51 = vld [vmem:[%s11590_s2 + $0xa40] sm:$0xff] }
 0x2aa   : > { %3882 = vmatpush1.msra.mxu1 %v6531_v42  ;;  %4095 = vmatprep.subr.mxu0 %v6570_v18  ;;  %v1681_v24 = vpop.f32.mrf.mxu1  ;;  %v1915_v16 = vpop.f32.mrf.mxu0  ;;  %v9447_v46 = vld [vmem:[#allocation2 + $0x1c1] sm:$0xff] }
 0x2ab   : > { %6503 = vmatmul.mubr.msk.f32.gmra.mxu1 %vm721_vm1, %v9028_v47  ;;  %6547 = vmatmul.mubr.msk.f32.gmra.mxu0 %vm721_vm1, %v9412_v36  ;;  %v9428_v55 = vadd.f32 %v1681_v24, %v9171_v10  ;;  %v9431_v12 = vadd.f32 %v1915_v16, %v9174_v0  ;;  %v6562_v10 = vld [vmem:[%s11590_s2 + $0xa28] sm:$0xff] }
 0x2ac   : > { %4096 = vmatpush1.msra.mxu0 %v6569_v38  ;;  %3619 = vmatprep.mubr.f32.mxu1 %v7055_v44  ;;  %v1683_v47 = vpop.f32.mrf.mxu1  ;;  %v1917_v15 = vpop.f32.mrf.mxu0 }
 0x2ad   : > { %4097 = vmatprep.subr.mxu0 %v6566_v57  ;;  %3854 = vmatprep.mubr.f32.mxu0 %v7055_v44  ;;  %v9442_v59 = vadd.f32 %v1683_v47, %v9191_v41  ;;  %v9445_v0 = vadd.f32 %v1917_v15, %v9194_v62  ;;  %v6558_v41 = vld [vmem:[%s11590_s2 + $0xa08] sm:$0xff]  ;;  %v6524_v62 = vld [vmem:[%s11590_s2 + $0x978] sm:$0xff]  ;;  %v6519_v47 = vld [vmem:[%s11590_s2 + $0x950] sm:$0xff] }
 0x2ae   : > { %3883 = vmatprep.subr.mxu1 %v6528_v31  ;;  %4098 = vmatpush1.msra.mxu0 %v6565_v51  ;;  %v1687_v22 = vpop.f32.mrf.mxu1 }
 0x2af   : > { %6504 = vmatmul.mubr.msk.f32.gmra.mxu1 %vm721_vm1, %v9058_v60  ;;  %6548 = vmatmul.mubr.msk.f32.gmra.mxu0 %vm721_vm1, %v9447_v46  ;;  %v9463_v42 = vadd.f32 %v1687_v22, %v9211_v5  ;;  %v2197_v18 = vpop.f32.mrf.mxu0  ;;  %v6557_v60 = vld [vmem:[%s11590_s2 + $0xa00] sm:$0xff]  ;;  %v6523_v5 = vld [vmem:[%s11590_s2 + $0x970] sm:$0xff] }
 0x2b0   : > { %3884 = vmatpush1.msra.mxu1 %v6527_v26  ;;  %4099 = vmatprep.subr.mxu0 %v6562_v10  ;;  %v9469_v4 = vadd.f32 %v2197_v18, %v9214_v34  ;;  %v1689_v58 = vpop.f32.mrf.mxu1  ;;  %v9482_v34 = vld [vmem:[#allocation2 + $0x1f1] sm:$0xff]  ;;  %v9514_v22 = vld [vmem:[#allocation2 + $0x201] sm:$0xff] }
 0x2b1   : > { %4100 = vmatpush1.msra.mxu0 %v6561_v6  ;;  %3625 = vmatprep.mubr.f32.mxu1 %v7055_v44  ;;  %v9473_v38 = vadd.f32 %v1689_v58, %v9221_v7  ;;  %v2199_v57 = vpop.f32.mrf.mxu0  ;;  %v6520_v7 = vld [vmem:[%s11590_s2 + $0x958] sm:$0xff] }
 0x2b2   : > { %4101 = vmatprep.subr.mxu0 %v6558_v41  ;;  %3885 = vmatprep.subr.mxu1 %v6524_v62  ;;  %v9479_v24 = vadd.f32 %v2199_v57, %v9223_v17  ;;  %v1693_v16 = vpop.f32.mrf.mxu1  ;;  %v6516_v10 = vld [vmem:[%s11590_s2 + $0x938] sm:$0xff]  ;;  %v6515_v62 = vld [vmem:[%s11590_s2 + $0x930] sm:$0xff] }
 0x2b3   : > { %4102 = vmatpush1.msra.mxu0 %v6557_v60  ;;  %4135 = vmatprep.mubr.f32.mxu0 %v7055_v44  ;;  %v9488_v31 = vadd.f32 %v1693_v16, %v9236_v27  ;;  %v2203_v51 = vpop.f32.mrf.mxu0  ;;  %v6634_v27 = vld [vmem:[%s11590_s2 + $0xbe8] sm:$0xff]  ;;  %v6633_v60 = vld [vmem:[%s11590_s2 + $0xbe0] sm:$0xff] }
 0x2b4   : > { %6505 = vmatmul.mubr.msk.f32.gmra.mxu1 %vm721_vm1, %v9084_v54  ;;  %6589 = vmatmul.mubr.msk.f32.vlgmr.msra.gmra.mxu0 %vm721_vm1, %v9482_v34  ;;  %v9495_v17 = vadd.f32 %v2203_v51, %v9239_v32  ;;  %v1695_v15 = vpop.f32.mrf.mxu1  ;;  %v6630_v51 = vld [vmem:[%s11590_s2 + $0xbc8] sm:$0xff] }
 0x2b5   : > { %3886 = vmatpush1.msra.mxu1 %v6523_v5  ;;  %3631 = vmatprep.mubr.f32.mxu1 %v7055_v44  ;;  %v9505_v54 = vadd.f32 %v1695_v15, %v9250_v40  ;;  %v2205_v26 = vpop.f32.mrf.mxu0  ;;  %v9543_v5 = vld [vmem:[#allocation2 + $0x211] sm:$0xff]  ;;  %v6629_v15 = vld [vmem:[%s11590_s2 + $0xbc0] sm:$0xff] }
 0x2b6   : > { %3887 = vmatprep.subr.mxu1 %v6520_v7  ;;  %4141 = vmatprep.mubr.f32.mxu0 %v7055_v44  ;;  %v9509_v32 = vadd.f32 %v2205_v26, %v9253_v50  ;;  %v1699_v6 = vpop.f32.mrf.mxu1 }
 0x2b7   : > { %3888 = vmatpush1.msra.mxu1 %v6519_v47  ;;  %v9517_v41 = vadd.f32 %v1699_v6, %v9268_v11  ;;  %v2209_v40 = vpop.f32.mrf.mxu0  ;;  %4410 = vmatprep.subr.mxu0 %v6634_v27  ;;  %v6512_v11 = vld [vmem:[%s11590_s2 + $0x918] sm:$0xff] }
 0x2b8   : > { %6506 = vmatmul.mubr.msk.f32.gmra.mxu1 %vm721_vm1, %v9113_v37  ;;  %6590 = vmatmul.mubr.msk.f32.gmra.mxu0 %vm721_vm1, %v9514_v22  ;;  %v9527_v50 = vadd.f32 %v2209_v40, %v9271_v25  ;;  %v1701_v18 = vpop.f32.mrf.mxu1  ;;  %v6588_v47 = vld [vmem:[%s11590_s2 + $0xaf8] sm:$0xff] }
 0x2b9   : > { %3637 = vmatprep.mubr.f32.mxu1 %v7055_v44  ;;  %3889 = vmatprep.subr.mxu1 %v6516_v10  ;;  %v9537_v37 = vadd.f32 %v1701_v18, %v9282_v13  ;;  %v2211_v58 = vpop.f32.mrf.mxu0  ;;  %v6511_v13 = vld [vmem:[%s11590_s2 + $0x910] sm:$0xff]  ;;  %v9575_v10 = vld [vmem:[#allocation2 + $0x221] sm:$0xff] }
 0x2ba   : > { %4147 = vmatprep.mubr.f32.mxu0 %v7055_v44  ;;  %3890 = vmatpush1.msra.mxu1 %v6515_v62  ;;  %v9541_v25 = vadd.f32 %v2211_v58, %v9285_v30  ;;  %v1705_v57 = vpop.f32.mrf.mxu1  ;;  %v9604_v58 = vld [vmem:[#allocation2 + $0x231] sm:$0xff] }
 0x2bb   : > { %3891 = vmatprep.subr.mxu1 %v6512_v11  ;;  %v9546_v16 = vadd.f32 %v1705_v57, %v9300_v14  ;;  %v2215_v7 = vpop.f32.mrf.mxu0  ;;  %4411 = vmatpush1.msra.mxu0 %v6633_v60  ;;  %v6584_v57 = vld [vmem:[%s11590_s2 + $0xad8] sm:$0xff] }
 0x2bc   : > { %6507 = vmatmul.mubr.msk.f32.gmra.mxu1 %vm721_vm1, %v9148_v1  ;;  %6591 = vmatmul.mubr.msk.f32.gmra.mxu0 %vm721_vm1, %v9543_v5  ;;  %v9559_v30 = vadd.f32 %v2215_v7, %v9303_v52  ;;  %v1707_v14 = vpop.f32.mrf.mxu1 }
 0x2bd   : > { %3643 = vmatprep.mubr.f32.mxu1 %v7055_v44  ;;  %4153 = vmatprep.mubr.f32.mxu0 %v7055_v44  ;;  %v9570_v1 = vadd.f32 %v1707_v14, %v9314_v21  ;;  %v2217_v27 = vpop.f32.mrf.mxu0  ;;  %v6626_v21 = vld [vmem:[%s11590_s2 + $0xba8] sm:$0xff] }
 0x2be   : > { %3892 = vmatpush1.msra.mxu1 %v6511_v13  ;;  %v9573_v52 = vadd.f32 %v2217_v27, %v9317_v20  ;;  %v1986_v26 = vpop.f32.mrf.mxu1  ;;  %4412 = vmatprep.subr.mxu0 %v6630_v51  ;;  %v6583_v13 = vld [vmem:[%s11590_s2 + $0xad0] sm:$0xff]  ;;  %v6580_v27 = vld [vmem:[%s11590_s2 + $0xab8] sm:$0xff] }
 0x2bf   : > { %4200 = vmatprep.subr.mxu1 %v6588_v47  ;;  %v9578_v6 = vadd.f32 %v1986_v26, %v9329_v29  ;;  %v2221_v40 = vpop.f32.mrf.mxu0  ;;  %4413 = vmatpush1.msra.mxu0 %v6629_v15  ;;  %v6625_v29 = vld [vmem:[%s11590_s2 + $0xba0] sm:$0xff] }
 0x2c0   : > { %6508 = vmatmul.mubr.msk.f32.gmra.mxu1 %vm721_vm1, %v9185_v61  ;;  %6592 = vmatmul.mubr.msk.f32.gmra.mxu0 %vm721_vm1, %v9575_v10  ;;  %v9588_v20 = vadd.f32 %v2221_v40, %v9332_v23  ;;  %v1988_v62 = vpop.f32.mrf.mxu1  ;;  %v6587_v61 = vld [vmem:[%s11590_s2 + $0xaf0] sm:$0xff]  ;;  %v9633_v15 = vld [vmem:[#allocation2 + $0x241] sm:$0xff] }
 0x2c1   : > { %3925 = vmatprep.mubr.f32.mxu1 %v7055_v44  ;;  %4159 = vmatprep.mubr.f32.mxu0 %v7055_v44  ;;  %v9596_v18 = vadd.f32 %v1988_v62, %v9343_v39  ;;  %v2223_v11 = vpop.f32.mrf.mxu0  ;;  %v6618_v62 = vld [vmem:[%s11590_s2 + $0xb68] sm:$0xff] }
 0x2c2   : > { %v9602_v23 = vadd.f32 %v2223_v11, %v9346_v43  ;;  %v1992_v60 = vpop.f32.mrf.mxu1  ;;  %4414 = vmatprep.subr.mxu0 %v6626_v21  ;;  %v6579_v21 = vld [vmem:[%s11590_s2 + $0xab0] sm:$0xff] }
 0x2c3   : > { %v9610_v7 = vadd.f32 %v1992_v60, %v9358_v35  ;;  %v2227_v39 = vpop.f32.mrf.mxu0  ;;  %4415 = vmatpush1.msra.mxu0 %v6625_v29  ;;  %v6622_v35 = vld [vmem:[%s11590_s2 + $0xb88] sm:$0xff]  ;;  %v9668_v60 = vld [vmem:[#allocation2 + $0x251] sm:$0xff] }
 0x2c4   : > { %6549 = vmatmul.mubr.msk.f32.vlgmr.msra.gmra.mxu1 %vm721_vm1, %v9226_v49  ;;  %6593 = vmatmul.mubr.msk.f32.gmra.mxu0 %vm721_vm1, %v9604_v58  ;;  %v9617_v43 = vadd.f32 %v2227_v39, %v9361_v56  ;;  %v1994_v51 = vpop.f32.mrf.mxu1 }
 0x2c5   : > { %4201 = vmatpush1.msra.mxu1 %v6587_v61  ;;  %3931 = vmatprep.mubr.f32.mxu1 %v7055_v44  ;;  %v9627_v49 = vadd.f32 %v1994_v51, %v9372_v3  ;;  %v2229_v14 = vpop.f32.mrf.mxu0  ;;  %v6621_v3 = vld [vmem:[%s11590_s2 + $0xb80] sm:$0xff] }
 0x2c6   : > { %4165 = vmatprep.mubr.f32.mxu0 %v7055_v44  ;;  %4202 = vmatprep.subr.mxu1 %v6584_v57  ;;  %v9631_v56 = vadd.f32 %v2229_v14, %v9375_v48  ;;  %v1998_v47 = vpop.f32.mrf.mxu1  ;;  %v6575_v14 = vld [vmem:[%s11590_s2 + $0xa90] sm:$0xff] }
 0x2c7   : > { %4203 = vmatpush1.msra.mxu1 %v6583_v13  ;;  %4416 = vmatprep.subr.mxu0 %v6622_v35  ;;  %v9642_v26 = vadd.f32 %v1998_v47, %v9390_v45  ;;  %v2233_v40 = vpop.f32.mrf.mxu0  ;;  %v6613_v13 = vld [vmem:[%s11590_s2 + $0xb40] sm:$0xff] }
 0x2c8   : > { %6550 = vmatmul.mubr.msk.f32.gmra.mxu1 %vm721_vm1, %v9258_v8  ;;  %6594 = vmatmul.mubr.msk.f32.gmra.mxu0 %vm721_vm1, %v9633_v15  ;;  %v9649_v48 = vadd.f32 %v2233_v40, %v9393_v63  ;;  %v2000_v45 = vpop.f32.mrf.mxu1  ;;  %v6617_v63 = vld [vmem:[%s11590_s2 + $0xb60] sm:$0xff] }
 0x2c9   : > { %3937 = vmatprep.mubr.f32.mxu1 %v7055_v44  ;;  %4171 = vmatprep.mubr.f32.mxu0 %v7055_v44  ;;  %v9660_v8 = vadd.f32 %v2000_v45, %v9407_v53  ;;  %v2235_v29 = vpop.f32.mrf.mxu0  ;;  %v6614_v53 = vld [vmem:[%s11590_s2 + $0xb48] sm:$0xff] }
 0x2ca   : > { %4204 = vmatprep.subr.mxu1 %v6580_v27  ;;  %4417 = vmatpush1.msra.mxu0 %v6621_v3  ;;  %v9666_v11 = vadd.f32 %v2235_v29, %v9410_v2  ;;  %v2004_v61 = vpop.f32.mrf.mxu1  ;;  %v6576_v2 = vld [vmem:[%s11590_s2 + $0xa98] sm:$0xff]  ;;  %v9703_v27 = vld [vmem:[#allocation2 + $0x261] sm:$0xff] }
 0x2cb   : > { %4205 = vmatpush1.msra.mxu1 %v6579_v21  ;;  %4418 = vmatprep.subr.mxu0 %v6618_v62  ;;  %v9674_v57 = vadd.f32 %v2004_v61, %v9428_v55  ;;  %v2239_v39 = vpop.f32.mrf.mxu0  ;;  %v6572_v21 = vld [vmem:[%s11590_s2 + $0xa78] sm:$0xff] }
 0x2cc   : > { %6551 = vmatmul.mubr.msk.f32.gmra.mxu1 %vm721_vm1, %v9287_v28  ;;  %6595 = vmatmul.mubr.msk.f32.gmra.mxu0 %vm721_vm1, %v9668_v60  ;;  %v9687_v51 = vadd.f32 %v2239_v39, %v9431_v12  ;;  %v2006_v55 = vpop.f32.mrf.mxu1  ;;  %v6610_v12 = vld [vmem:[%s11590_s2 + $0xb28] sm:$0xff] }
 0x2cd   : > { %4419 = vmatpush1.msra.mxu0 %v6617_v63  ;;  %3943 = vmatprep.mubr.f32.mxu1 %v7055_v44  ;;  %v9691_v28 = vadd.f32 %v2006_v55, %v9442_v59  ;;  %v2241_v35 = vpop.f32.mrf.mxu0  ;;  %v6609_v59 = vld [vmem:[%s11590_s2 + $0xb20] sm:$0xff]  ;;  %v6567_v55 = vld [vmem:[%s11590_s2 + $0xa50] sm:$0xff] }
 0x2ce   : > { %4420 = vmatprep.subr.mxu0 %v6614_v53  ;;  %4177 = vmatprep.mubr.f32.mxu0 %v7055_v44  ;;  %v9701_v47 = vadd.f32 %v2241_v35, %v9445_v0  ;;  %v6606_v0 = vld [vmem:[%s11590_s2 + $0xb08] sm:$0xff] }
 0x2cf   : > { %4206 = vmatprep.subr.mxu1 %v6576_v2  ;;  %4421 = vmatpush1.msra.mxu0 %v6613_v13  ;;  %v2010_v3 = vpop.f32.mrf.mxu1  ;;  %v2520_v40 = vpop.f32.mrf.mxu0  ;;  %v9738_v2 = vld [vmem:[#allocation2 + $0x152] sm:$0xff] }
 0x2d0   : > { %6552 = vmatmul.mubr.msk.f32.gmra.mxu1 %vm721_vm1, %v9319_v9  ;;  %6596 = vmatmul.mubr.msk.f32.gmra.mxu0 %vm721_vm1, %v9703_v27  ;;  %v9719_v62 = vadd.f32 %v2010_v3, %v9463_v42  ;;  %v9722_v45 = vadd.f32 %v2520_v40, %v9469_v4  ;;  %v6605_v9 = vld [vmem:[%s11590_s2 + $0xb00] sm:$0xff]  ;;  %v6571_v4 = vld [vmem:[%s11590_s2 + $0xa70] sm:$0xff] }
 0x2d1   : > { %4207 = vmatpush1.msra.mxu1 %v6575_v14  ;;  %4422 = vmatprep.subr.mxu0 %v6610_v12  ;;  %v2012_v29 = vpop.f32.mrf.mxu1  ;;  %v2522_v63 = vpop.f32.mrf.mxu0  ;;  %v6564_v12 = vld [vmem:[%s11590_s2 + $0xa38] sm:$0xff]  ;;  %v9770_v40 = vld [vmem:[#allocation2 + $0x162] sm:$0xff] }
 0x2d2   : > { %4423 = vmatpush1.msra.mxu0 %v6609_v59  ;;  %3949 = vmatprep.mubr.f32.mxu1 %v7055_v44  ;;  %v9729_v61 = vadd.f32 %v2012_v29, %v9473_v38  ;;  %v9732_v42 = vadd.f32 %v2522_v63, %v9479_v24  ;;  %v6568_v38 = vld [vmem:[%s11590_s2 + $0xa58] sm:$0xff] }
 0x2d3   : > { %4424 = vmatprep.subr.mxu0 %v6606_v0  ;;  %4208 = vmatprep.subr.mxu1 %v6572_v21  ;;  %v2016_v53 = vpop.f32.mrf.mxu1  ;;  %v2526_v39 = vpop.f32.mrf.mxu0 }
 0x2d4   : > { %4425 = vmatpush1.msra.mxu0 %v6605_v9  ;;  %4458 = vmatprep.mubr.f32.mxu0 %v7055_v44  ;;  %v9744_v24 = vadd.f32 %v2016_v53, %v9488_v31  ;;  %v9747_v13 = vadd.f32 %v2526_v39, %v9495_v17  ;;  %v6682_v31 = vld [vmem:[%s11590_s2 + $0xce8] sm:$0xff]  ;;  %v9799_v53 = vld [vmem:[#allocation2 + $0x172] sm:$0xff] }
 0x2d5   : > { %6553 = vmatmul.mubr.msk.f32.gmra.mxu1 %vm721_vm1, %v9348_v33  ;;  %6637 = vmatmul.mubr.msk.f32.vlgmr.msra.gmra.mxu0 %vm721_vm1, %v9738_v2  ;;  %v2018_v35 = vpop.f32.mrf.mxu1  ;;  %v2528_v14 = vpop.f32.mrf.mxu0 }
 0x2d6   : > { %4209 = vmatpush1.msra.mxu1 %v6571_v4  ;;  %3955 = vmatprep.mubr.f32.mxu1 %v7055_v44  ;;  %v9761_v17 = vadd.f32 %v2018_v35, %v9505_v54  ;;  %v9764_v33 = vadd.f32 %v2528_v14, %v9509_v32  ;;  %v6563_v32 = vld [vmem:[%s11590_s2 + $0xa30] sm:$0xff]  ;;  %v6677_v35 = vld [vmem:[%s11590_s2 + $0xcc0] sm:$0xff] }
 0x2d7   : > { %4210 = vmatprep.subr.mxu1 %v6568_v38  ;;  %4464 = vmatprep.mubr.f32.mxu0 %v7055_v44  ;;  %v2022_v59 = vpop.f32.mrf.mxu1  ;;  %v2532_v3 = vpop.f32.mrf.mxu0 }
 0x2d8   : > { %4211 = vmatpush1.msra.mxu1 %v6567_v55  ;;  %v9773_v0 = vadd.f32 %v2022_v59, %v9517_v41  ;;  %v9776_v54 = vadd.f32 %v2532_v3, %v9527_v50  ;;  %4734 = vmatprep.subr.mxu0 %v6682_v31  ;;  %v6560_v41 = vld [vmem:[%s11590_s2 + $0xa18] sm:$0xff]  ;;  %v6681_v50 = vld [vmem:[%s11590_s2 + $0xce0] sm:$0xff] }
 0x2d9   : > { %6554 = vmatmul.mubr.msk.f32.gmra.mxu1 %vm721_vm1, %v9377_v19  ;;  %6638 = vmatmul.mubr.msk.f32.gmra.mxu0 %vm721_vm1, %v9770_v40  ;;  %v2024_v21 = vpop.f32.mrf.mxu1  ;;  %v2534_v9 = vpop.f32.mrf.mxu0  ;;  %v9831_v59 = vld [vmem:[#allocation2 + $0x182] sm:$0xff] }
 0x2da   : > { %3961 = vmatprep.mubr.f32.mxu1 %v7055_v44  ;;  %4212 = vmatprep.subr.mxu1 %v6564_v12  ;;  %v9793_v29 = vadd.f32 %v2024_v21, %v9537_v37  ;;  %v9796_v19 = vadd.f32 %v2534_v9, %v9541_v25  ;;  %v6559_v37 = vld [vmem:[%s11590_s2 + $0xa10] sm:$0xff]  ;;  %v6678_v25 = vld [vmem:[%s11590_s2 + $0xcc8] sm:$0xff] }
 0x2db   : > { %4470 = vmatprep.mubr.f32.mxu0 %v7055_v44  ;;  %4213 = vmatpush1.msra.mxu1 %v6563_v32  ;;  %v2028_v63 = vpop.f32.mrf.mxu1  ;;  %v2538_v4 = vpop.f32.mrf.mxu0 }
 0x2dc   : > { %4214 = vmatprep.subr.mxu1 %v6560_v41  ;;  %v9802_v39 = vadd.f32 %v2028_v63, %v9546_v16  ;;  %v9805_v38 = vadd.f32 %v2538_v4, %v9559_v30  ;;  %4735 = vmatpush1.msra.mxu0 %v6681_v50  ;;  %v6636_v30 = vld [vmem:[%s11590_s2 + $0xbf8] sm:$0xff] }
 0x2dd   : > { %6555 = vmatmul.mubr.msk.f32.gmra.mxu1 %vm721_vm1, %v9412_v36  ;;  %6639 = vmatmul.mubr.msk.f32.gmra.mxu0 %vm721_vm1, %v9799_v53  ;;  %v2030_v16 = vpop.f32.mrf.mxu1  ;;  %v2540_v55 = vpop.f32.mrf.mxu0  ;;  %v9860_v63 = vld [vmem:[#allocation2 + $0x192] sm:$0xff] }
 0x2de   : > { %3967 = vmatprep.mubr.f32.mxu1 %v7055_v44  ;;  %4476 = vmatprep.mubr.f32.mxu0 %v7055_v44  ;;  %v9826_v14 = vadd.f32 %v2030_v16, %v9570_v1  ;;  %v9829_v36 = vadd.f32 %v2540_v55, %v9573_v52  ;;  %v6674_v1 = vld [vmem:[%s11590_s2 + $0xca8] sm:$0xff]  ;;  %v6632_v4 = vld [vmem:[%s11590_s2 + $0xbd8] sm:$0xff] }
 0x2df   : > { %4215 = vmatpush1.msra.mxu1 %v6559_v37  ;;  %v2310_v31 = vpop.f32.mrf.mxu1  ;;  %v2544_v12 = vpop.f32.mrf.mxu0  ;;  %4736 = vmatprep.subr.mxu0 %v6678_v25 }
 0x2e0   : > { %4523 = vmatprep.subr.mxu1 %v6636_v30  ;;  %v9834_v3 = vadd.f32 %v2310_v31, %v9578_v6  ;;  %v9837_v32 = vadd.f32 %v2544_v12, %v9588_v20  ;;  %4737 = vmatpush1.msra.mxu0 %v6677_v35  ;;  %v6673_v6 = vld [vmem:[%s11590_s2 + $0xca0] sm:$0xff]  ;;  %v6628_v31 = vld [vmem:[%s11590_s2 + $0xbb8] sm:$0xff] }
 0x2e1   : > { %6556 = vmatmul.mubr.msk.f32.gmra.mxu1 %vm721_vm1, %v9447_v46  ;;  %6640 = vmatmul.mubr.msk.f32.gmra.mxu0 %vm721_vm1, %v9831_v59  ;;  %v2312_v52 = vpop.f32.mrf.mxu1  ;;  %v2546_v21 = vpop.f32.mrf.mxu0  ;;  %v6635_v46 = vld [vmem:[%s11590_s2 + $0xbf0] sm:$0xff]  ;;  %v9889_v35 = vld [vmem:[#allocation2 + $0x1a2] sm:$0xff] }
 0x2e2   : > { %4248 = vmatprep.mubr.f32.mxu1 %v7055_v44  ;;  %4482 = vmatprep.mubr.f32.mxu0 %v7055_v44  ;;  %v9852_v20 = vadd.f32 %v2312_v52, %v9596_v18  ;;  %v9855_v9 = vadd.f32 %v2546_v21, %v9602_v23  ;;  %v6631_v23 = vld [vmem:[%s11590_s2 + $0xbd0] sm:$0xff]  ;;  %v6666_v52 = vld [vmem:[%s11590_s2 + $0xc68] sm:$0xff] }
 0x2e3   : > { %v2316_v41 = vpop.f32.mrf.mxu1  ;;  %v2550_v50 = vpop.f32.mrf.mxu0  ;;  %4738 = vmatprep.subr.mxu0 %v6674_v1  ;;  %v6627_v1 = vld [vmem:[%s11590_s2 + $0xbb0] sm:$0xff] }
 0x2e4   : > { %v9866_v37 = vadd.f32 %v2316_v41, %v9610_v7  ;;  %v9869_v18 = vadd.f32 %v2550_v50, %v9617_v43  ;;  %4739 = vmatpush1.msra.mxu0 %v6673_v6  ;;  %v6670_v7 = vld [vmem:[%s11590_s2 + $0xc88] sm:$0xff]  ;;  %v6665_v6 = vld [vmem:[%s11590_s2 + $0xc60] sm:$0xff]  ;;  %v9924_v50 = vld [vmem:[#allocation2 + $0x1b2] sm:$0xff] }
 0x2e5   : > { %6597 = vmatmul.mubr.msk.f32.vlgmr.msra.gmra.mxu1 %vm721_vm1, %v9482_v34  ;;  %6641 = vmatmul.mubr.msk.f32.gmra.mxu0 %vm721_vm1, %v9860_v63  ;;  %v2318_v25 = vpop.f32.mrf.mxu1  ;;  %v2552_v16 = vpop.f32.mrf.mxu0 }
 0x2e6   : > { %4524 = vmatpush1.msra.mxu1 %v6635_v46  ;;  %4254 = vmatprep.mubr.f32.mxu1 %v7055_v44  ;;  %v9883_v43 = vadd.f32 %v2318_v25, %v9627_v49  ;;  %v9886_v34 = vadd.f32 %v2552_v16, %v9631_v56  ;;  %v6669_v49 = vld [vmem:[%s11590_s2 + $0xc80] sm:$0xff] }
 0x2e7   : > { %4488 = vmatprep.mubr.f32.mxu0 %v7055_v44  ;;  %4525 = vmatprep.subr.mxu1 %v6632_v4  ;;  %v2322_v55 = vpop.f32.mrf.mxu1  ;;  %v2556_v30 = vpop.f32.mrf.mxu0  ;;  %v6661_v25 = vld [vmem:[%s11590_s2 + $0xc40] sm:$0xff] }
 0x2e8   : > { %4526 = vmatpush1.msra.mxu1 %v6631_v23  ;;  %4740 = vmatprep.subr.mxu0 %v6670_v7  ;;  %v9898_v56 = vadd.f32 %v2322_v55, %v9642_v26  ;;  %v9901_v12 = vadd.f32 %v2556_v30, %v9649_v48  ;;  %v6624_v23 = vld [vmem:[%s11590_s2 + $0xb98] sm:$0xff]  ;;  %v6623_v7 = vld [vmem:[%s11590_s2 + $0xb90] sm:$0xff]  ;;  %v6658_v55 = vld [vmem:[%s11590_s2 + $0xc28] sm:$0xff] }
 0x2e9   : > { %6598 = vmatmul.mubr.msk.f32.gmra.mxu1 %vm721_vm1, %v9514_v22  ;;  %6642 = vmatmul.mubr.msk.f32.gmra.mxu0 %vm721_vm1, %v9889_v35  ;;  %v2324_v21 = vpop.f32.mrf.mxu1  ;;  %v2558_v26 = vpop.f32.mrf.mxu0  ;;  %v9959_v30 = vld [vmem:[#allocation2 + $0x1c2] sm:$0xff] }
 0x2ea   : > { %4260 = vmatprep.mubr.f32.mxu1 %v7055_v44  ;;  %4494 = vmatprep.mubr.f32.mxu0 %v7055_v44  ;;  %v9916_v48 = vadd.f32 %v2324_v21, %v9660_v8  ;;  %v9919_v22 = vadd.f32 %v2558_v26, %v9666_v11  ;;  %v6662_v8 = vld [vmem:[%s11590_s2 + $0xc48] sm:$0xff] }
 0x2eb   : > { %4527 = vmatprep.subr.mxu1 %v6628_v31  ;;  %4741 = vmatpush1.msra.mxu0 %v6669_v49  ;;  %v2328_v46 = vpop.f32.mrf.mxu1  ;;  %v2562_v41 = vpop.f32.mrf.mxu0  ;;  %v6654_v49 = vld [vmem:[%s11590_s2 + $0xc08] sm:$0xff] }
 0x2ec   : > { %4528 = vmatpush1.msra.mxu1 %v6627_v1  ;;  %4742 = vmatprep.subr.mxu0 %v6666_v52  ;;  %v9930_v4 = vadd.f32 %v2328_v46, %v9674_v57  ;;  %v9933_v11 = vadd.f32 %v2562_v41, %v9687_v51  ;;  %v6620_v1 = vld [vmem:[%s11590_s2 + $0xb78] sm:$0xff] }
 0x2ed   : > { %6599 = vmatmul.mubr.msk.f32.gmra.mxu1 %vm721_vm1, %v9543_v5  ;;  %6643 = vmatmul.mubr.msk.f32.gmra.mxu0 %vm721_vm1, %v9924_v50  ;;  %v2330_v16 = vpop.f32.mrf.mxu1  ;;  %v2564_v57 = vpop.f32.mrf.mxu0 }
 0x2ee   : > { %4743 = vmatpush1.msra.mxu0 %v6665_v6  ;;  %4266 = vmatprep.mubr.f32.mxu1 %v7055_v44  ;;  %v9947_v51 = vadd.f32 %v2330_v16, %v9691_v28  ;;  %v9950_v5 = vadd.f32 %v2564_v57, %v9701_v47  ;;  %v6657_v28 = vld [vmem:[%s11590_s2 + $0xc20] sm:$0xff]  ;;  %v6615_v16 = vld [vmem:[%s11590_s2 + $0xb50] sm:$0xff] }
 0x2ef   : > { %4744 = vmatprep.subr.mxu0 %v6662_v8  ;;  %4500 = vmatprep.mubr.f32.mxu0 %v7055_v44 }
 0x2f0   : > { %4529 = vmatprep.subr.mxu1 %v6624_v23  ;;  %4745 = vmatpush1.msra.mxu0 %v6661_v25  ;;  %v2334_v47 = vpop.f32.mrf.mxu1  ;;  %v2843_v31 = vpop.f32.mrf.mxu0  ;;  %v9994_v23 = vld [vmem:[#allocation2 + $0xc0] sm:$0xff] }
 0x2f1   : > { %6600 = vmatmul.mubr.msk.f32.gmra.mxu1 %vm721_vm1, %v9575_v10  ;;  %6644 = vmatmul.mubr.msk.f32.gmra.mxu0 %vm721_vm1, %v9959_v30  ;;  %v9975_v52 = vadd.f32 %v2334_v47, %v9719_v62  ;;  %v9978_v21 = vadd.f32 %v2843_v31, %v9722_v45  ;;  %v6653_v10 = vld [vmem:[%s11590_s2 + $0xc00] sm:$0xff]  ;;  %v6619_v45 = vld [vmem:[%s11590_s2 + $0xb70] sm:$0xff] }
 0x2f2   : > { %4530 = vmatpush1.msra.mxu1 %v6623_v7  ;;  %4746 = vmatprep.subr.mxu0 %v6658_v55  ;;  %v2336_v26 = vpop.f32.mrf.mxu1  ;;  %v2845_v6 = vpop.f32.mrf.mxu0  ;;  %v6612_v55 = vld [vmem:[%s11590_s2 + $0xb38] sm:$0xff]  ;;  %v10026_v31 = vld [vmem:[#allocation2 + $0xd0] sm:$0xff] }
 0x2f3   : > { %4747 = vmatpush1.msra.mxu0 %v6657_v28  ;;  %4272 = vmatprep.mubr.f32.mxu1 %v7055_v44  ;;  %v9985_v46 = vadd.f32 %v2336_v26, %v9729_v61  ;;  %v9988_v62 = vadd.f32 %v2845_v6, %v9732_v42  ;;  %v6616_v61 = vld [vmem:[%s11590_s2 + $0xb58] sm:$0xff] }
 0x2f4   : > { %4748 = vmatprep.subr.mxu0 %v6654_v49  ;;  %4531 = vmatprep.subr.mxu1 %v6620_v1  ;;  %v2340_v41 = vpop.f32.mrf.mxu1  ;;  %v2849_v8 = vpop.f32.mrf.mxu0 }
 0x2f5   : > { %4749 = vmatpush1.msra.mxu0 %v6653_v10  ;;  %4782 = vmatprep.mubr.f32.mxu0 %v7055_v44  ;;  %v10000_v42 = vadd.f32 %v2340_v41, %v9744_v24  ;;  %v10003_v25 = vadd.f32 %v2849_v8, %v9747_v13  ;;  %v6730_v24 = vld [vmem:[%s11590_s2 + $0xde8] sm:$0xff]  ;;  %v10055_v41 = vld [vmem:[#allocation2 + $0xe0] sm:$0xff] }
 0x2f6   : > { %6601 = vmatmul.mubr.msk.f32.gmra.mxu1 %vm721_vm1, %v9604_v58  ;;  %6685 = vmatmul.mubr.msk.f32.vlgmr.msra.gmra.mxu0 %vm721_vm1, %v9994_v23  ;;  %v2342_v57 = vpop.f32.mrf.mxu1  ;;  %v2851_v7 = vpop.f32.mrf.mxu0 }
 0x2f7   : > { %4532 = vmatpush1.msra.mxu1 %v6619_v45  ;;  %4278 = vmatprep.mubr.f32.mxu1 %v7055_v44  ;;  %v10017_v13 = vadd.f32 %v2342_v57, %v9761_v17  ;;  %v10020_v58 = vadd.f32 %v2851_v7, %v9764_v33  ;;  %v6611_v33 = vld [vmem:[%s11590_s2 + $0xb30] sm:$0xff]  ;;  %v6725_v57 = vld [vmem:[%s11590_s2 + $0xdc0] sm:$0xff] }
 0x2f8   : > { %4533 = vmatprep.subr.mxu1 %v6616_v61  ;;  %4788 = vmatprep.mubr.f32.mxu0 %v7055_v44  ;;  %v2346_v28 = vpop.f32.mrf.mxu1  ;;  %v2855_v47 = vpop.f32.mrf.mxu0 }
 0x2f9   : > { %4534 = vmatpush1.msra.mxu1 %v6615_v16  ;;  %v10029_v49 = vadd.f32 %v2346_v28, %v9773_v0  ;;  %v10032_v17 = vadd.f32 %v2855_v47, %v9776_v54  ;;  %5058 = vmatprep.subr.mxu0 %v6730_v24  ;;  %v6608_v0 = vld [vmem:[%s11590_s2 + $0xb18] sm:$0xff]  ;;  %v6729_v54 = vld [vmem:[%s11590_s2 + $0xde0] sm:$0xff]  ;;  %v10087_v28 = vld [vmem:[#allocation2 + $0xf0] sm:$0xff] }
 0x2fa   : > { %6602 = vmatmul.mubr.msk.f32.gmra.mxu1 %vm721_vm1, %v9633_v15  ;;  %6686 = vmatmul.mubr.msk.f32.gmra.mxu0 %vm721_vm1, %v10026_v31  ;;  %v2348_v1 = vpop.f32.mrf.mxu1  ;;  %v2857_v10 = vpop.f32.mrf.mxu0 }
 0x2fb   : > { %4284 = vmatprep.mubr.f32.mxu1 %v7055_v44  ;;  %4535 = vmatprep.subr.mxu1 %v6612_v55  ;;  %v10049_v26 = vadd.f32 %v2348_v1, %v9793_v29  ;;  %v10052_v15 = vadd.f32 %v2857_v10, %v9796_v19  ;;  %v6607_v29 = vld [vmem:[%s11590_s2 + $0xb10] sm:$0xff]  ;;  %v6726_v19 = vld [vmem:[%s11590_s2 + $0xdc8] sm:$0xff] }
 0x2fc   : > { %4794 = vmatprep.mubr.f32.mxu0 %v7055_v44  ;;  %4536 = vmatpush1.msra.mxu1 %v6611_v33  ;;  %v2352_v6 = vpop.f32.mrf.mxu1  ;;  %v2861_v45 = vpop.f32.mrf.mxu0 }
 0x2fd   : > { %4537 = vmatprep.subr.mxu1 %v6608_v0  ;;  %v10058_v8 = vadd.f32 %v2352_v6, %v9802_v39  ;;  %v10061_v61 = vadd.f32 %v2861_v45, %v9805_v38  ;;  %5059 = vmatpush1.msra.mxu0 %v6729_v54  ;;  %v6684_v38 = vld [vmem:[%s11590_s2 + $0xcf8] sm:$0xff]  ;;  %v10116_v6 = vld [vmem:[#allocation2 + $0x100] sm:$0xff] }
 0x2fe   : > { %6603 = vmatmul.mubr.msk.f32.gmra.mxu1 %vm721_vm1, %v9668_v60  ;;  %6687 = vmatmul.mubr.msk.f32.gmra.mxu0 %vm721_vm1, %v10055_v41  ;;  %v2354_v39 = vpop.f32.mrf.mxu1  ;;  %v2863_v16 = vpop.f32.mrf.mxu0  ;;  %v6680_v45 = vld [vmem:[%s11590_s2 + $0xcd8] sm:$0xff] }
 0x2ff   : > { %4290 = vmatprep.mubr.f32.mxu1 %v7055_v44  ;;  %4800 = vmatprep.mubr.f32.mxu0 %v7055_v44  ;;  %v10082_v7 = vadd.f32 %v2354_v39, %v9826_v14  ;;  %v10085_v60 = vadd.f32 %v2863_v16, %v9829_v36  ;;  %v6722_v14 = vld [vmem:[%s11590_s2 + $0xda8] sm:$0xff] }
 0x300   : > { %4538 = vmatpush1.msra.mxu1 %v6607_v29  ;;  %v2633_v24 = vpop.f32.mrf.mxu1  ;;  %v2867_v55 = vpop.f32.mrf.mxu0  ;;  %5060 = vmatprep.subr.mxu0 %v6726_v19 }
 0x301   : > { %4847 = vmatprep.subr.mxu1 %v6684_v38  ;;  %v10090_v47 = vadd.f32 %v2633_v24, %v9834_v3  ;;  %v10093_v33 = vadd.f32 %v2867_v55, %v9837_v32  ;;  %5061 = vmatpush1.msra.mxu0 %v6725_v57  ;;  %v6721_v3 = vld [vmem:[%s11590_s2 + $0xda0] sm:$0xff]  ;;  %v10145_v57 = vld [vmem:[#allocation2 + $0x110] sm:$0xff]  ;;  %v6676_v24 = vld [vmem:[%s11590_s2 + $0xcb8] sm:$0xff] }
 0x302   : > { %6604 = vmatmul.mubr.msk.f32.gmra.mxu1 %vm721_vm1, %v9703_v27  ;;  %6688 = vmatmul.mubr.msk.f32.gmra.mxu0 %vm721_vm1, %v10087_v28  ;;  %v2635_v36 = vpop.f32.mrf.mxu1  ;;  %v2869_v1 = vpop.f32.mrf.mxu0  ;;  %v6683_v27 = vld [vmem:[%s11590_s2 + $0xcf0] sm:$0xff] }
 0x303   : > { %4571 = vmatprep.mubr.f32.mxu1 %v7055_v44  ;;  %4806 = vmatprep.mubr.f32.mxu0 %v7055_v44  ;;  %v10108_v32 = vadd.f32 %v2635_v36, %v9852_v20  ;;  %v10111_v10 = vadd.f32 %v2869_v1, %v9855_v9  ;;  %v6679_v9 = vld [vmem:[%s11590_s2 + $0xcd0] sm:$0xff]  ;;  %v6714_v36 = vld [vmem:[%s11590_s2 + $0xd68] sm:$0xff] }
 0x304   : > { %v2639_v0 = vpop.f32.mrf.mxu1  ;;  %v2873_v54 = vpop.f32.mrf.mxu0  ;;  %5062 = vmatprep.subr.mxu0 %v6722_v14  ;;  %v6675_v14 = vld [vmem:[%s11590_s2 + $0xcb0] sm:$0xff] }
 0x305   : > { %v10122_v29 = vadd.f32 %v2639_v0, %v9866_v37  ;;  %v10125_v20 = vadd.f32 %v2873_v54, %v9869_v18  ;;  %5063 = vmatpush1.msra.mxu0 %v6721_v3  ;;  %v6718_v37 = vld [vmem:[%s11590_s2 + $0xd88] sm:$0xff]  ;;  %v6713_v3 = vld [vmem:[%s11590_s2 + $0xd60] sm:$0xff] }
 0x306   : > { %6645 = vmatmul.mubr.msk.f32.vlgmr.msra.gmra.mxu1 %vm721_vm1, %v9738_v2  ;;  %6689 = vmatmul.mubr.msk.f32.gmra.mxu0 %vm721_vm1, %v10116_v6  ;;  %v2641_v19 = vpop.f32.mrf.mxu1  ;;  %v2875_v39 = vpop.f32.mrf.mxu0  ;;  %v10180_v54 = vld [vmem:[#allocation2 + $0x120] sm:$0xff] }
 0x307   : > { %4848 = vmatpush1.msra.mxu1 %v6683_v27  ;;  %4577 = vmatprep.mubr.f32.mxu1 %v7055_v44  ;;  %v10139_v18 = vadd.f32 %v2641_v19, %v9883_v43  ;;  %v10142_v2 = vadd.f32 %v2875_v39, %v9886_v34  ;;  %v6717_v43 = vld [vmem:[%s11590_s2 + $0xd80] sm:$0xff] }
 0x308   : > { %4812 = vmatprep.mubr.f32.mxu0 %v7055_v44  ;;  %4849 = vmatprep.subr.mxu1 %v6680_v45  ;;  %v2645_v16 = vpop.f32.mrf.mxu1  ;;  %v2879_v38 = vpop.f32.mrf.mxu0  ;;  %v6709_v19 = vld [vmem:[%s11590_s2 + $0xd40] sm:$0xff] }
 0x309   : > { %4850 = vmatpush1.msra.mxu1 %v6679_v9  ;;  %5064 = vmatprep.subr.mxu0 %v6718_v37  ;;  %v10154_v34 = vadd.f32 %v2645_v16, %v9898_v56  ;;  %v10157_v55 = vadd.f32 %v2879_v38, %v9901_v12  ;;  %v6672_v9 = vld [vmem:[%s11590_s2 + $0xc98] sm:$0xff]  ;;  %v6671_v16 = vld [vmem:[%s11590_s2 + $0xc90] sm:$0xff]  ;;  %v6706_v38 = vld [vmem:[%s11590_s2 + $0xd28] sm:$0xff] }
 0x30a   : > { %6646 = vmatmul.mubr.msk.f32.gmra.mxu1 %vm721_vm1, %v9770_v40  ;;  %6690 = vmatmul.mubr.msk.f32.gmra.mxu0 %vm721_vm1, %v10145_v57  ;;  %v2647_v1 = vpop.f32.mrf.mxu1  ;;  %v2881_v56 = vpop.f32.mrf.mxu0 }
 0x30b   : > { %4583 = vmatprep.mubr.f32.mxu1 %v7055_v44  ;;  %4818 = vmatprep.mubr.f32.mxu0 %v7055_v44  ;;  %v10172_v12 = vadd.f32 %v2647_v1, %v9916_v48  ;;  %v10175_v40 = vadd.f32 %v2881_v56, %v9919_v22  ;;  %v6710_v48 = vld [vmem:[%s11590_s2 + $0xd48] sm:$0xff] }
 0x30c   : > { %4851 = vmatprep.subr.mxu1 %v6676_v24  ;;  %5065 = vmatpush1.msra.mxu0 %v6717_v43  ;;  %v2651_v27 = vpop.f32.mrf.mxu1  ;;  %v2885_v0 = vpop.f32.mrf.mxu0  ;;  %v6702_v43 = vld [vmem:[%s11590_s2 + $0xd08] sm:$0xff] }
 0x30d   : > { %4852 = vmatpush1.msra.mxu1 %v6675_v14  ;;  %5066 = vmatprep.subr.mxu0 %v6714_v36  ;;  %v10186_v45 = vadd.f32 %v2651_v27, %v9930_v4  ;;  %v10189_v22 = vadd.f32 %v2885_v0, %v9933_v11  ;;  %v10202_v11 = vld [vmem:[#allocation2 + $0x130] sm:$0xff]  ;;  %v6668_v14 = vld [vmem:[%s11590_s2 + $0xc78] sm:$0xff] }
 0x30e   : > { %6647 = vmatmul.mubr.msk.f32.gmra.mxu1 %vm721_vm1, %v9799_v53  ;;  %6691 = vmatmul.mubr.msk.f32.gmra.mxu0 %vm721_vm1, %v10180_v54  ;;  %v2653_v39 = vpop.f32.mrf.mxu1  ;;  %v2887_v4 = vpop.f32.mrf.mxu0 }
 0x30f   : > { %5067 = vmatpush1.msra.mxu0 %v6713_v3  ;;  %4589 = vmatprep.mubr.f32.mxu1 %v7055_v44  ;;  %v10205_v53 = vadd.f32 %v2653_v39, %v9947_v51  ;;  %v10208_v37 = vadd.f32 %v2887_v4, %v9950_v5  ;;  %v6705_v51 = vld [vmem:[%s11590_s2 + $0xd20] sm:$0xff]  ;;  %v6663_v39 = vld [vmem:[%s11590_s2 + $0xc50] sm:$0xff] }
 0x310   : > { %5068 = vmatprep.subr.mxu0 %v6710_v48  ;;  %4824 = vmatprep.mubr.f32.mxu0 %v7055_v44 }
 0x311   : > { %4853 = vmatprep.subr.mxu1 %v6672_v9  ;;  %5069 = vmatpush1.msra.mxu0 %v6709_v19  ;;  %v2657_v24 = vpop.f32.mrf.mxu1  ;;  %v3166_v5 = vpop.f32.mrf.mxu0  ;;  %v10250_v9 = vld [vmem:[#allocation2 + $0x21] sm:$0xff] }
 0x312   : > { %6648 = vmatmul.mubr.msk.f32.gmra.mxu1 %vm721_vm1, %v9831_v59  ;;  %6692 = vmatmul.mubr.msk.f32.gmra.mxu0 %vm721_vm1, %v10202_v11  ;;  %v10231_v36 = vadd.f32 %v2657_v24, %v9975_v52  ;;  %v10234_v1 = vadd.f32 %v3166_v5, %v9978_v21  ;;  %v6701_v59 = vld [vmem:[%s11590_s2 + $0xd00] sm:$0xff]  ;;  %v6667_v21 = vld [vmem:[%s11590_s2 + $0xc70] sm:$0xff] }
 0x313   : > { %4854 = vmatpush1.msra.mxu1 %v6671_v16  ;;  %5070 = vmatprep.subr.mxu0 %v6706_v38  ;;  %v2659_v56 = vpop.f32.mrf.mxu1  ;;  %v3168_v3 = vpop.f32.mrf.mxu0  ;;  %v6660_v38 = vld [vmem:[%s11590_s2 + $0xc38] sm:$0xff] }
 0x314   : > { %5071 = vmatpush1.msra.mxu0 %v6705_v51  ;;  %4595 = vmatprep.mubr.f32.mxu1 %v7055_v44  ;;  %v10241_v27 = vadd.f32 %v2659_v56, %v9985_v46  ;;  %v10244_v52 = vadd.f32 %v3168_v3, %v9988_v62  ;;  %v6664_v46 = vld [vmem:[%s11590_s2 + $0xc58] sm:$0xff] }
 0x315   : > { %5072 = vmatprep.subr.mxu0 %v6702_v43  ;;  %4855 = vmatprep.subr.mxu1 %v6668_v14  ;;  %v2663_v0 = vpop.f32.mrf.mxu1  ;;  %v3172_v48 = vpop.f32.mrf.mxu0  ;;  %v10282_v5 = vld [vmem:[#allocation2 + $0x31] sm:$0xff] }
 0x316   : > { %5073 = vmatpush1.msra.mxu0 %v6701_v59  ;;  %5106 = vmatprep.mubr.f32.mxu0 %v7055_v44  ;;  %v10256_v62 = vadd.f32 %v2663_v0, %v10000_v42  ;;  %v10259_v19 = vadd.f32 %v3172_v48, %v10003_v25  ;;  %v6778_v42 = vld [vmem:[%s11590_s2 + $0xee8] sm:$0xff] }
 0x317   : > { %6649 = vmatmul.mubr.msk.f32.gmra.mxu1 %vm721_vm1, %v9860_v63  ;;  %6733 = vmatmul.mubr.msk.f32.vlgmr.msra.gmra.mxu0 %vm721_vm1, %v10250_v9  ;;  %v2665_v4 = vpop.f32.mrf.mxu1  ;;  %v3174_v16 = vpop.f32.mrf.mxu0  ;;  %v10311_v0 = vld [vmem:[#allocation2 + $0x41] sm:$0xff] }
 0x318   : > { %4856 = vmatpush1.msra.mxu1 %v6667_v21  ;;  %4601 = vmatprep.mubr.f32.mxu1 %v7055_v44  ;;  %v10273_v25 = vadd.f32 %v2665_v4, %v10017_v13  ;;  %v10276_v63 = vadd.f32 %v3174_v16, %v10020_v58  ;;  %v6659_v58 = vld [vmem:[%s11590_s2 + $0xc30] sm:$0xff]  ;;  %v6773_v4 = vld [vmem:[%s11590_s2 + $0xec0] sm:$0xff] }
 0x319   : > { %4857 = vmatprep.subr.mxu1 %v6664_v46  ;;  %5112 = vmatprep.mubr.f32.mxu0 %v7055_v44  ;;  %v2669_v51 = vpop.f32.mrf.mxu1  ;;  %v3178_v24 = vpop.f32.mrf.mxu0 }
 0x31a   : > { %4858 = vmatpush1.msra.mxu1 %v6663_v39  ;;  %v10285_v43 = vadd.f32 %v2669_v51, %v10029_v49  ;;  %v10288_v13 = vadd.f32 %v3178_v24, %v10032_v17  ;;  %5381 = vmatprep.subr.mxu0 %v6778_v42  ;;  %v6656_v49 = vld [vmem:[%s11590_s2 + $0xc18] sm:$0xff]  ;;  %v6777_v17 = vld [vmem:[%s11590_s2 + $0xee0] sm:$0xff] }
 0x31b   : > { %6650 = vmatmul.mubr.msk.f32.gmra.mxu1 %vm721_vm1, %v9889_v35  ;;  %6734 = vmatmul.mubr.msk.f32.gmra.mxu0 %vm721_vm1, %v10282_v5  ;;  %v2671_v14 = vpop.f32.mrf.mxu1  ;;  %v3180_v59 = vpop.f32.mrf.mxu0  ;;  %v10343_v51 = vld [vmem:[#allocation2 + $0x51] sm:$0xff] }
 0x31c   : > { %4607 = vmatprep.mubr.f32.mxu1 %v7055_v44  ;;  %4859 = vmatprep.subr.mxu1 %v6660_v38  ;;  %v10305_v56 = vadd.f32 %v2671_v14, %v10049_v26  ;;  %v10308_v35 = vadd.f32 %v3180_v59, %v10052_v15  ;;  %v6655_v26 = vld [vmem:[%s11590_s2 + $0xc10] sm:$0xff]  ;;  %v6774_v15 = vld [vmem:[%s11590_s2 + $0xec8] sm:$0xff] }
 0x31d   : > { %5118 = vmatprep.mubr.f32.mxu0 %v7055_v44  ;;  %4860 = vmatpush1.msra.mxu1 %v6659_v58  ;;  %v2675_v3 = vpop.f32.mrf.mxu1  ;;  %v3184_v21 = vpop.f32.mrf.mxu0 }
 0x31e   : > { %4861 = vmatprep.subr.mxu1 %v6656_v49  ;;  %v10314_v48 = vadd.f32 %v2675_v3, %v10058_v8  ;;  %v10317_v46 = vadd.f32 %v3184_v21, %v10061_v61  ;;  %5382 = vmatpush1.msra.mxu0 %v6777_v17  ;;  %v6732_v61 = vld [vmem:[%s11590_s2 + $0xdf8] sm:$0xff]  ;;  %v10372_v3 = vld [vmem:[#allocation2 + $0x61] sm:$0xff] }
 0x31f   : > { %6651 = vmatmul.mubr.msk.f32.gmra.mxu1 %vm721_vm1, %v9924_v50  ;;  %6735 = vmatmul.mubr.msk.f32.gmra.mxu0 %vm721_vm1, %v10311_v0  ;;  %v2677_v8 = vpop.f32.mrf.mxu1  ;;  %v3186_v39 = vpop.f32.mrf.mxu0  ;;  %v6728_v21 = vld [vmem:[%s11590_s2 + $0xdd8] sm:$0xff] }
 0x320   : > { %4613 = vmatprep.mubr.f32.mxu1 %v7055_v44  ;;  %5124 = vmatprep.mubr.f32.mxu0 %v7055_v44  ;;  %v10338_v16 = vadd.f32 %v2677_v8, %v10082_v7  ;;  %v10341_v50 = vadd.f32 %v3186_v39, %v10085_v60  ;;  %v6770_v7 = vld [vmem:[%s11590_s2 + $0xea8] sm:$0xff] }
 0x321   : > { %4862 = vmatpush1.msra.mxu1 %v6655_v26  ;;  %v2956_v42 = vpop.f32.mrf.mxu1  ;;  %v3190_v38 = vpop.f32.mrf.mxu0  ;;  %5383 = vmatprep.subr.mxu0 %v6774_v15 }
 0x322   : > { %5171 = vmatprep.subr.mxu1 %v6732_v61  ;;  %v10346_v24 = vadd.f32 %v2956_v42, %v10090_v47  ;;  %v10349_v58 = vadd.f32 %v3190_v38, %v10093_v33  ;;  %5384 = vmatpush1.msra.mxu0 %v6773_v4  ;;  %v6769_v47 = vld [vmem:[%s11590_s2 + $0xea0] sm:$0xff]  ;;  %v10401_v4 = vld [vmem:[#allocation2 + $0x71] sm:$0xff] }
 0x323   : > { %6652 = vmatmul.mubr.msk.f32.gmra.mxu1 %vm721_vm1, %v9959_v30  ;;  %6736 = vmatmul.mubr.msk.f32.gmra.mxu0 %vm721_vm1, %v10343_v51  ;;  %v2958_v60 = vpop.f32.mrf.mxu1  ;;  %v3192_v14 = vpop.f32.mrf.mxu0  ;;  %v6731_v30 = vld [vmem:[%s11590_s2 + $0xdf0] sm:$0xff]  ;;  %v6724_v42 = vld [vmem:[%s11590_s2 + $0xdb8] sm:$0xff] }
 0x324   : > { %4895 = vmatprep.mubr.f32.mxu1 %v7055_v44  ;;  %5130 = vmatprep.mubr.f32.mxu0 %v7055_v44  ;;  %v10364_v33 = vadd.f32 %v2958_v60, %v10108_v32  ;;  %v10367_v59 = vadd.f32 %v3192_v14, %v10111_v10  ;;  %v6727_v10 = vld [vmem:[%s11590_s2 + $0xdd0] sm:$0xff]  ;;  %v6762_v60 = vld [vmem:[%s11590_s2 + $0xe68] sm:$0xff] }
 0x325   : > { %v2962_v49 = vpop.f32.mrf.mxu1  ;;  %v3196_v17 = vpop.f32.mrf.mxu0  ;;  %5385 = vmatprep.subr.mxu0 %v6770_v7  ;;  %v6723_v7 = vld [vmem:[%s11590_s2 + $0xdb0] sm:$0xff] }
 0x326   : > { %v10378_v26 = vadd.f32 %v2962_v49, %v10122_v29  ;;  %v10381_v32 = vadd.f32 %v3196_v17, %v10125_v20  ;;  %5386 = vmatpush1.msra.mxu0 %v6769_v47  ;;  %v6766_v29 = vld [vmem:[%s11590_s2 + $0xe88] sm:$0xff]  ;;  %v6761_v47 = vld [vmem:[%s11590_s2 + $0xe60] sm:$0xff] }
 0x327   : > { %6693 = vmatmul.mubr.msk.f32.vlgmr.msra.gmra.mxu1 %vm721_vm1, %v9994_v23  ;;  %6737 = vmatmul.mubr.msk.f32.gmra.mxu0 %vm721_vm1, %v10372_v3  ;;  %v2964_v15 = vpop.f32.mrf.mxu1  ;;  %v3198_v8 = vpop.f32.mrf.mxu0  ;;  %v10436_v17 = vld [vmem:[#allocation2 + $0x81] sm:$0xff] }
 0x328   : > { %5172 = vmatpush1.msra.mxu1 %v6731_v30  ;;  %4901 = vmatprep.mubr.f32.mxu1 %v7055_v44  ;;  %v10395_v20 = vadd.f32 %v2964_v15, %v10139_v18  ;;  %v10398_v23 = vadd.f32 %v3198_v8, %v10142_v2  ;;  %v6765_v18 = vld [vmem:[%s11590_s2 + $0xe80] sm:$0xff] }
 0x329   : > { %5136 = vmatprep.mubr.f32.mxu0 %v7055_v44  ;;  %5173 = vmatprep.subr.mxu1 %v6728_v21  ;;  %v2968_v39 = vpop.f32.mrf.mxu1  ;;  %v3202_v61 = vpop.f32.mrf.mxu0  ;;  %v6757_v15 = vld [vmem:[%s11590_s2 + $0xe40] sm:$0xff] }
 0x32a   : > { %5174 = vmatpush1.msra.mxu1 %v6727_v10  ;;  %5387 = vmatprep.subr.mxu0 %v6766_v29  ;;  %v10410_v2 = vadd.f32 %v2968_v39, %v10154_v34  ;;  %v10413_v38 = vadd.f32 %v3202_v61, %v10157_v55  ;;  %v6720_v10 = vld [vmem:[%s11590_s2 + $0xd98] sm:$0xff]  ;;  %v6719_v39 = vld [vmem:[%s11590_s2 + $0xd90] sm:$0xff]  ;;  %v6754_v61 = vld [vmem:[%s11590_s2 + $0xe28] sm:$0xff] }
 0x32b   : > { %6694 = vmatmul.mubr.msk.f32.gmra.mxu1 %vm721_vm1, %v10026_v31  ;;  %6738 = vmatmul.mubr.msk.f32.gmra.mxu0 %vm721_vm1, %v10401_v4  ;;  %v2970_v14 = vpop.f32.mrf.mxu1  ;;  %v3204_v34 = vpop.f32.mrf.mxu0 }
 0x32c   : > { %4907 = vmatprep.mubr.f32.mxu1 %v7055_v44  ;;  %5142 = vmatprep.mubr.f32.mxu0 %v7055_v44  ;;  %v10428_v55 = vadd.f32 %v2970_v14, %v10172_v12  ;;  %v10431_v31 = vadd.f32 %v3204_v34, %v10175_v40  ;;  %v6758_v12 = vld [vmem:[%s11590_s2 + $0xe48] sm:$0xff] }
 0x32d   : > { %5175 = vmatprep.subr.mxu1 %v6724_v42  ;;  %5388 = vmatpush1.msra.mxu0 %v6765_v18  ;;  %v2974_v30 = vpop.f32.mrf.mxu1  ;;  %v3208_v49 = vpop.f32.mrf.mxu0  ;;  %v6750_v18 = vld [vmem:[%s11590_s2 + $0xe08] sm:$0xff] }
 0x32e   : > { %5176 = vmatpush1.msra.mxu1 %v6723_v7  ;;  %5389 = vmatprep.subr.mxu0 %v6762_v60  ;;  %v10442_v21 = vadd.f32 %v2974_v30, %v10186_v45  ;;  %v10445_v40 = vadd.f32 %v3208_v49, %v10189_v22  ;;  %v10458_v22 = vld [vmem:[#allocation2 + $0x91] sm:$0xff] }
 0x32f   : > { %6695 = vmatmul.mubr.msk.f32.gmra.mxu1 %vm721_vm1, %v10055_v41  ;;  %6739 = vmatmul.mubr.msk.f32.gmra.mxu0 %vm721_vm1, %v10436_v17  ;;  %v2976_v8 = vpop.f32.mrf.mxu1  ;;  %v3210_v45 = vpop.f32.mrf.mxu0  ;;  %v6716_v7 = vld [vmem:[%s11590_s2 + $0xd78] sm:$0xff] }
 0x330   : > { %5390 = vmatpush1.msra.mxu0 %v6761_v47  ;;  %4913 = vmatprep.mubr.f32.mxu1 %v7055_v44  ;;  %v10461_v41 = vadd.f32 %v2976_v8, %v10205_v53  ;;  %v10464_v29 = vadd.f32 %v3210_v45, %v10208_v37  ;;  %v6753_v53 = vld [vmem:[%s11590_s2 + $0xe20] sm:$0xff]  ;;  %v6711_v8 = vld [vmem:[%s11590_s2 + $0xd50] sm:$0xff] }
 0x331   : > { %5391 = vmatprep.subr.mxu0 %v6758_v12  ;;  %5148 = vmatprep.mubr.f32.mxu0 %v7055_v44 }
 0x332   : > { %5177 = vmatprep.subr.mxu1 %v6720_v10  ;;  %5392 = vmatpush1.msra.mxu0 %v6757_v15  ;;  %v2980_v42 = vpop.f32.mrf.mxu1  ;;  %v3490_v37 = vpop.f32.mrf.mxu0  ;;  %v10506_v10 = vld [vmem:[#allocation2 + $0xc1] sm:$0xff] }
 0x333   : > { %6696 = vmatmul.mubr.msk.f32.gmra.mxu1 %vm721_vm1, %v10087_v28  ;;  %6740 = vmatmul.mubr.msk.f32.gmra.mxu0 %vm721_vm1, %v10458_v22  ;;  %v10487_v60 = vadd.f32 %v2980_v42, %v10231_v36  ;;  %v10490_v14 = vadd.f32 %v3490_v37, %v10234_v1  ;;  %v6749_v28 = vld [vmem:[%s11590_s2 + $0xe00] sm:$0xff]  ;;  %v6715_v1 = vld [vmem:[%s11590_s2 + $0xd70] sm:$0xff] }
 0x334   : > { %5178 = vmatpush1.msra.mxu1 %v6719_v39  ;;  %5393 = vmatprep.subr.mxu0 %v6754_v61  ;;  %v2982_v34 = vpop.f32.mrf.mxu1  ;;  %v3492_v47 = vpop.f32.mrf.mxu0  ;;  %v6708_v61 = vld [vmem:[%s11590_s2 + $0xd38] sm:$0xff] }
 0x335   : > { %5394 = vmatpush1.msra.mxu0 %v6753_v53  ;;  %4919 = vmatprep.mubr.f32.mxu1 %v7055_v44  ;;  %v10497_v30 = vadd.f32 %v2982_v34, %v10241_v27  ;;  %v10500_v36 = vadd.f32 %v3492_v47, %v10244_v52  ;;  %v6712_v27 = vld [vmem:[%s11590_s2 + $0xd58] sm:$0xff] }
 0x336   : > { %5395 = vmatprep.subr.mxu0 %v6750_v18  ;;  %5179 = vmatprep.subr.mxu1 %v6716_v7  ;;  %v2986_v49 = vpop.f32.mrf.mxu1  ;;  %v3496_v12 = vpop.f32.mrf.mxu0  ;;  %v10538_v37 = vld [vmem:[#allocation2 + $0xd1] sm:$0xff] }
 0x337   : > { %5396 = vmatpush1.msra.mxu0 %v6749_v28  ;;  %5429 = vmatprep.mubr.f32.mxu0 %v7055_v44  ;;  %v10512_v52 = vadd.f32 %v2986_v49, %v10256_v62  ;;  %v10515_v15 = vadd.f32 %v3496_v12, %v10259_v19  ;;  %v6826_v62 = vld [vmem:[%s11590_s2 + $0xfe8] sm:$0xff] }
 0x338   : > { %6697 = vmatmul.mubr.msk.f32.gmra.mxu1 %vm721_vm1, %v10116_v6  ;;  %6781 = vmatmul.mubr.msk.f32.vlgmr.msra.gmra.mxu0 %vm721_vm1, %v10506_v10  ;;  %v2988_v45 = vpop.f32.mrf.mxu1  ;;  %v3498_v39 = vpop.f32.mrf.mxu0  ;;  %v10567_v49 = vld [vmem:[#allocation2 + $0xe1] sm:$0xff] }
 0x339   : > { %5180 = vmatpush1.msra.mxu1 %v6715_v1  ;;  %4925 = vmatprep.mubr.f32.mxu1 %v7055_v44  ;;  %v10529_v19 = vadd.f32 %v2988_v45, %v10273_v25  ;;  %v10532_v6 = vadd.f32 %v3498_v39, %v10276_v63  ;;  %v6707_v63 = vld [vmem:[%s11590_s2 + $0xd30] sm:$0xff]  ;;  %v6821_v45 = vld [vmem:[%s11590_s2 + $0xfc0] sm:$0xff] }
 0x33a   : > { %5181 = vmatprep.subr.mxu1 %v6712_v27  ;;  %5435 = vmatprep.mubr.f32.mxu0 %v7055_v44  ;;  %v2992_v53 = vpop.f32.mrf.mxu1  ;;  %v3502_v42 = vpop.f32.mrf.mxu0 }
 0x33b   : > { %5182 = vmatpush1.msra.mxu1 %v6711_v8  ;;  %v10541_v18 = vadd.f32 %v2992_v53, %v10285_v43  ;;  %v10544_v25 = vadd.f32 %v3502_v42, %v10288_v13  ;;  %5704 = vmatprep.subr.mxu0 %v6826_v62  ;;  %v6704_v43 = vld [vmem:[%s11590_s2 + $0xd18] sm:$0xff]  ;;  %v6825_v13 = vld [vmem:[%s11590_s2 + $0xfe0] sm:$0xff] }
 0x33c   : > { %6698 = vmatmul.mubr.msk.f32.gmra.mxu1 %vm721_vm1, %v10145_v57  ;;  %6782 = vmatmul.mubr.msk.f32.gmra.mxu0 %vm721_vm1, %v10538_v37  ;;  %v2994_v7 = vpop.f32.mrf.mxu1  ;;  %v3504_v28 = vpop.f32.mrf.mxu0  ;;  %v10599_v53 = vld [vmem:[#allocation2 + $0xf1] sm:$0xff] }
 0x33d   : > { %4931 = vmatprep.mubr.f32.mxu1 %v7055_v44  ;;  %5183 = vmatprep.subr.mxu1 %v6708_v61  ;;  %v10561_v34 = vadd.f32 %v2994_v7, %v10305_v56  ;;  %v10564_v57 = vadd.f32 %v3504_v28, %v10308_v35  ;;  %v6703_v56 = vld [vmem:[%s11590_s2 + $0xd10] sm:$0xff]  ;;  %v6822_v35 = vld [vmem:[%s11590_s2 + $0xfc8] sm:$0xff] }
 0x33e   : > { %5441 = vmatprep.mubr.f32.mxu0 %v7055_v44  ;;  %5184 = vmatpush1.msra.mxu1 %v6707_v63  ;;  %v2998_v47 = vpop.f32.mrf.mxu1  ;;  %v3508_v1 = vpop.f32.mrf.mxu0 }
 0x33f   : > { %5185 = vmatprep.subr.mxu1 %v6704_v43  ;;  %v10570_v12 = vadd.f32 %v2998_v47, %v10314_v48  ;;  %v10573_v27 = vadd.f32 %v3508_v1, %v10317_v46  ;;  %5705 = vmatpush1.msra.mxu0 %v6825_v13  ;;  %v6780_v46 = vld [vmem:[%s11590_s2 + $0xef8] sm:$0xff]  ;;  %v10628_v47 = vld [vmem:[#allocation2 + $0x101] sm:$0xff] }
 0x340   : > { %6699 = vmatmul.mubr.msk.f32.gmra.mxu1 %vm721_vm1, %v10180_v54  ;;  %6783 = vmatmul.mubr.msk.f32.gmra.mxu0 %vm721_vm1, %v10567_v49  ;;  %v3000_v48 = vpop.f32.mrf.mxu1  ;;  %v3510_v8 = vpop.f32.mrf.mxu0  ;;  %v6776_v1 = vld [vmem:[%s11590_s2 + $0xed8] sm:$0xff] }
 0x341   : > { %4937 = vmatprep.mubr.f32.mxu1 %v7055_v44  ;;  %5447 = vmatprep.mubr.f32.mxu0 %v7055_v44  ;;  %v10594_v39 = vadd.f32 %v3000_v48, %v10338_v16  ;;  %v10597_v54 = vadd.f32 %v3510_v8, %v10341_v50  ;;  %v6818_v16 = vld [vmem:[%s11590_s2 + $0xfa8] sm:$0xff] }
 0x342   : > { %5186 = vmatpush1.msra.mxu1 %v6703_v56  ;;  %v3279_v62 = vpop.f32.mrf.mxu1  ;;  %v3514_v61 = vpop.f32.mrf.mxu0  ;;  %5706 = vmatprep.subr.mxu0 %v6822_v35 }
 0x343   : > { %5494 = vmatprep.subr.mxu1 %v6780_v46  ;;  %v10602_v42 = vadd.f32 %v3279_v62, %v10346_v24  ;;  %v10605_v63 = vadd.f32 %v3514_v61, %v10349_v58  ;;  %5707 = vmatpush1.msra.mxu0 %v6821_v45  ;;  %v6817_v24 = vld [vmem:[%s11590_s2 + $0xfa0] sm:$0xff]  ;;  %v10657_v45 = vld [vmem:[#allocation2 + $0x111] sm:$0xff] }
 0x344   : > { %6700 = vmatmul.mubr.msk.f32.gmra.mxu1 %vm721_vm1, %v10202_v11  ;;  %6784 = vmatmul.mubr.msk.f32.gmra.mxu0 %vm721_vm1, %v10599_v53  ;;  %v3281_v50 = vpop.f32.mrf.mxu1  ;;  %v3516_v7 = vpop.f32.mrf.mxu0  ;;  %v6779_v11 = vld [vmem:[%s11590_s2 + $0xef0] sm:$0xff]  ;;  %v6772_v62 = vld [vmem:[%s11590_s2 + $0xeb8] sm:$0xff] }
 0x345   : > { %5219 = vmatprep.mubr.f32.mxu1 %v7055_v44  ;;  %5453 = vmatprep.mubr.f32.mxu0 %v7055_v44  ;;  %v10620_v58 = vadd.f32 %v3281_v50, %v10364_v33  ;;  %v10623_v28 = vadd.f32 %v3516_v7, %v10367_v59  ;;  %v6775_v59 = vld [vmem:[%s11590_s2 + $0xed0] sm:$0xff]  ;;  %v6810_v50 = vld [vmem:[%s11590_s2 + $0xf68] sm:$0xff] }
 0x346   : > { %v3285_v43 = vpop.f32.mrf.mxu1  ;;  %v3520_v13 = vpop.f32.mrf.mxu0  ;;  %5708 = vmatprep.subr.mxu0 %v6818_v16  ;;  %v6771_v16 = vld [vmem:[%s11590_s2 + $0xeb0] sm:$0xff] }
 0x347   : > { %v10634_v56 = vadd.f32 %v3285_v43, %v10378_v26  ;;  %v10637_v33 = vadd.f32 %v3520_v13, %v10381_v32  ;;  %5709 = vmatpush1.msra.mxu0 %v6817_v24  ;;  %v6814_v26 = vld [vmem:[%s11590_s2 + $0xf88] sm:$0xff]  ;;  %v6809_v24 = vld [vmem:[%s11590_s2 + $0xf60] sm:$0xff] }
 0x348   : > { %6741 = vmatmul.mubr.msk.f32.vlgmr.msra.gmra.mxu1 %vm721_vm1, %v10250_v9  ;;  %6785 = vmatmul.mubr.msk.f32.gmra.mxu0 %vm721_vm1, %v10628_v47  ;;  %v3287_v35 = vpop.f32.mrf.mxu1  ;;  %v3522_v48 = vpop.f32.mrf.mxu0  ;;  %v10692_v13 = vld [vmem:[#allocation2 + $0x121] sm:$0xff] }
 0x349   : > { %5495 = vmatpush1.msra.mxu1 %v6779_v11  ;;  %5225 = vmatprep.mubr.f32.mxu1 %v7055_v44  ;;  %v10651_v32 = vadd.f32 %v3287_v35, %v10395_v20  ;;  %v10654_v9 = vadd.f32 %v3522_v48, %v10398_v23  ;;  %v6813_v20 = vld [vmem:[%s11590_s2 + $0xf80] sm:$0xff] }
 0x34a   : > { %5459 = vmatprep.mubr.f32.mxu0 %v7055_v44  ;;  %5496 = vmatprep.subr.mxu1 %v6776_v1  ;;  %v3291_v8 = vpop.f32.mrf.mxu1  ;;  %v3526_v46 = vpop.f32.mrf.mxu0  ;;  %v6805_v35 = vld [vmem:[%s11590_s2 + $0xf40] sm:$0xff] }
 0x34b   : > { %5497 = vmatpush1.msra.mxu1 %v6775_v59  ;;  %5710 = vmatprep.subr.mxu0 %v6814_v26  ;;  %v10666_v23 = vadd.f32 %v3291_v8, %v10410_v2  ;;  %v10669_v61 = vadd.f32 %v3526_v46, %v10413_v38  ;;  %v6768_v59 = vld [vmem:[%s11590_s2 + $0xe98] sm:$0xff]  ;;  %v6767_v8 = vld [vmem:[%s11590_s2 + $0xe90] sm:$0xff]  ;;  %v6802_v46 = vld [vmem:[%s11590_s2 + $0xf28] sm:$0xff] }
 0x34c   : > { %6742 = vmatmul.mubr.msk.f32.gmra.mxu1 %vm721_vm1, %v10282_v5  ;;  %6786 = vmatmul.mubr.msk.f32.gmra.mxu0 %vm721_vm1, %v10657_v45  ;;  %v3293_v7 = vpop.f32.mrf.mxu1  ;;  %v3528_v2 = vpop.f32.mrf.mxu0 }
 0x34d   : > { %5231 = vmatprep.mubr.f32.mxu1 %v7055_v44  ;;  %5465 = vmatprep.mubr.f32.mxu0 %v7055_v44  ;;  %v10684_v38 = vadd.f32 %v3293_v7, %v10428_v55  ;;  %v10687_v5 = vadd.f32 %v3528_v2, %v10431_v31  ;;  %v6806_v55 = vld [vmem:[%s11590_s2 + $0xf48] sm:$0xff] }
 0x34e   : > { %5498 = vmatprep.subr.mxu1 %v6772_v62  ;;  %5711 = vmatpush1.msra.mxu0 %v6813_v20  ;;  %v3297_v11 = vpop.f32.mrf.mxu1  ;;  %v3532_v43 = vpop.f32.mrf.mxu0  ;;  %v6798_v20 = vld [vmem:[%s11590_s2 + $0xf08] sm:$0xff] }
 0x34f   : > { %5499 = vmatpush1.msra.mxu1 %v6771_v16  ;;  %5712 = vmatprep.subr.mxu0 %v6810_v50  ;;  %v10698_v1 = vadd.f32 %v3297_v11, %v10442_v21  ;;  %v10701_v31 = vadd.f32 %v3532_v43, %v10445_v40  ;;  %v10714_v40 = vld [vmem:[#allocation2 + $0x131] sm:$0xff] }
 0x350   : > { %6743 = vmatmul.mubr.msk.f32.gmra.mxu1 %vm721_vm1, %v10311_v0  ;;  %6787 = vmatmul.mubr.msk.f32.gmra.mxu0 %vm721_vm1, %v10692_v13  ;;  %v3299_v48 = vpop.f32.mrf.mxu1  ;;  %v3534_v21 = vpop.f32.mrf.mxu0  ;;  %v6764_v16 = vld [vmem:[%s11590_s2 + $0xe78] sm:$0xff] }
 0x351   : > { %5713 = vmatpush1.msra.mxu0 %v6809_v24  ;;  %5237 = vmatprep.mubr.f32.mxu1 %v7055_v44  ;;  %v10717_v0 = vadd.f32 %v3299_v48, %v10461_v41  ;;  %v10720_v26 = vadd.f32 %v3534_v21, %v10464_v29  ;;  %v6801_v41 = vld [vmem:[%s11590_s2 + $0xf20] sm:$0xff]  ;;  %v6759_v48 = vld [vmem:[%s11590_s2 + $0xe50] sm:$0xff] }
 0x352   : > { %5714 = vmatprep.subr.mxu0 %v6806_v55  ;;  %5471 = vmatprep.mubr.f32.mxu0 %v7055_v44 }
 0x353   : > { %5500 = vmatprep.subr.mxu1 %v6768_v59  ;;  %5715 = vmatpush1.msra.mxu0 %v6805_v35  ;;  %v3303_v62 = vpop.f32.mrf.mxu1  ;;  %v3814_v29 = vpop.f32.mrf.mxu0  ;;  %v10762_v59 = vld [vmem:[#allocation2 + $0x22] sm:$0xff] }
 0x354   : > { %6744 = vmatmul.mubr.msk.f32.gmra.mxu1 %vm721_vm1, %v10343_v51  ;;  %6788 = vmatmul.mubr.msk.f32.gmra.mxu0 %vm721_vm1, %v10714_v40  ;;  %v10743_v50 = vadd.f32 %v3303_v62, %v10487_v60  ;;  %v10746_v7 = vadd.f32 %v3814_v29, %v10490_v14  ;;  %v6797_v51 = vld [vmem:[%s11590_s2 + $0xf00] sm:$0xff]  ;;  %v6763_v14 = vld [vmem:[%s11590_s2 + $0xe70] sm:$0xff] }
 0x355   : > { %5501 = vmatpush1.msra.mxu1 %v6767_v8  ;;  %5716 = vmatprep.subr.mxu0 %v6802_v46  ;;  %v3305_v2 = vpop.f32.mrf.mxu1  ;;  %v3816_v24 = vpop.f32.mrf.mxu0  ;;  %v10791_v62 = vld [vmem:[#allocation2 + $0x32] sm:$0xff] }
 0x356   : > { %5717 = vmatpush1.msra.mxu0 %v6801_v41  ;;  %5243 = vmatprep.mubr.f32.mxu1 %v7055_v44  ;;  %v10753_v11 = vadd.f32 %v3305_v2, %v10497_v30  ;;  %v10756_v60 = vadd.f32 %v3816_v24, %v10500_v36  ;;  %v6760_v30 = vld [vmem:[%s11590_s2 + $0xe58] sm:$0xff]  ;;  %v10817_v24 = vld [vmem:[#allocation2 + $0x42] sm:$0xff] }
 0x357   : > { %5718 = vmatprep.subr.mxu0 %v6798_v20  ;;  %5502 = vmatprep.subr.mxu1 %v6764_v16  ;;  %v3309_v43 = vpop.f32.mrf.mxu1  ;;  %v3820_v55 = vpop.f32.mrf.mxu0 }
 0x358   : > { %5719 = vmatpush1.msra.mxu0 %v6797_v51  ;;  %5752 = vmatprep.mubr.f32.mxu0 %v7055_v44  ;;  %v10768_v36 = vadd.f32 %v3309_v43, %v10512_v52  ;;  %v10771_v35 = vadd.f32 %v3820_v55, %v10515_v15 }
 0x359   : > { %6745 = vmatmul.mubr.msk.f32.gmra.mxu1 %vm721_vm1, %v10372_v3  ;;  %6829 = vmatmul.mubr.msk.f32.vlgmr.msra.gmra.mxu0 %vm721_vm1, %v10762_v59  ;;  %v3311_v21 = vpop.f32.mrf.mxu1  ;;  %v3822_v8 = vpop.f32.mrf.mxu0  ;;  %v6756_v3 = vld [vmem:[%s11590_s2 + $0xe38] sm:$0xff] }
 0x35a   : > { %5503 = vmatpush1.msra.mxu1 %v6763_v14  ;;  %5249 = vmatprep.mubr.f32.mxu1 %v7055_v44  ;;  %v10782_v52 = vadd.f32 %v3311_v21, %v10529_v19  ;;  %v10785_v15 = vadd.f32 %v3822_v8, %v10532_v6  ;;  %v6755_v6 = vld [vmem:[%s11590_s2 + $0xe30] sm:$0xff] }
 0x35b   : > { %5504 = vmatprep.subr.mxu1 %v6760_v30  ;;  %5758 = vmatprep.mubr.f32.mxu0 %v7055_v44  ;;  %v3315_v46 = vpop.f32.mrf.mxu1  ;;  %v3826_v41 = vpop.f32.mrf.mxu0  ;;  %v10843_v21 = vld [vmem:[#allocation2 + $0x52] sm:$0xff] }
 0x35c   : > { %5505 = vmatpush1.msra.mxu1 %v6759_v48  ;;  %v10794_v29 = vadd.f32 %v3315_v46, %v10541_v18  ;;  %v10797_v19 = vadd.f32 %v3826_v41, %v10544_v25  ;;  %v6752_v18 = vld [vmem:[%s11590_s2 + $0xe18] sm:$0xff] }
 0x35d   : > { %6746 = vmatmul.mubr.msk.f32.gmra.mxu1 %vm721_vm1, %v10401_v4  ;;  %6830 = vmatmul.mubr.msk.f32.gmra.mxu0 %vm721_vm1, %v10791_v62  ;;  %v3317_v20 = vpop.f32.mrf.mxu1  ;;  %v3828_v16 = vpop.f32.mrf.mxu0 }
 0x35e   : > { %5255 = vmatprep.mubr.f32.mxu1 %v7055_v44  ;;  %5506 = vmatprep.subr.mxu1 %v6756_v3  ;;  %v10811_v25 = vadd.f32 %v3317_v20, %v10561_v34  ;;  %v10814_v51 = vadd.f32 %v3828_v16, %v10564_v57  ;;  %v6751_v34 = vld [vmem:[%s11590_s2 + $0xe10] sm:$0xff]  ;;  %v6824_v20 = vld [vmem:[%s11590_s2 + $0xfd8] sm:$0xff] }
 0x35f   : > { %5764 = vmatprep.mubr.f32.mxu0 %v7055_v44  ;;  %5507 = vmatpush1.msra.mxu1 %v6755_v6  ;;  %v3321_v4 = vpop.f32.mrf.mxu1  ;;  %v3832_v2 = vpop.f32.mrf.mxu0  ;;  %v10866_v6 = vld [vmem:[#allocation2 + $0x62] sm:$0xff] }
 0x360   : > { %5508 = vmatprep.subr.mxu1 %v6752_v18  ;;  %v10820_v14 = vadd.f32 %v3321_v4, %v10570_v12  ;;  %v10823_v43 = vadd.f32 %v3832_v2, %v10573_v27  ;;  %v6828_v12 = vld [vmem:[%s11590_s2 + $0xff8] sm:$0xff] }
 0x361   : > { %6747 = vmatmul.mubr.msk.f32.gmra.mxu1 %vm721_vm1, %v10436_v17  ;;  %6831 = vmatmul.mubr.msk.f32.gmra.mxu0 %vm721_vm1, %v10817_v24  ;;  %v3323_v57 = vpop.f32.mrf.mxu1  ;;  %v3834_v55 = vpop.f32.mrf.mxu0 }
 0x362   : > { %5261 = vmatprep.mubr.f32.mxu1 %v7055_v44  ;;  %5770 = vmatprep.mubr.f32.mxu0 %v7055_v44  ;;  %v10838_v27 = vadd.f32 %v3323_v57, %v10594_v39  ;;  %v10841_v30 = vadd.f32 %v3834_v55, %v10597_v54  ;;  %v6820_v57 = vld [vmem:[%s11590_s2 + $0xfb8] sm:$0xff] }
 0x363   : > { %5509 = vmatpush1.msra.mxu1 %v6751_v34  ;;  %v3603_v17 = vpop.f32.mrf.mxu1  ;;  %v3838_v48 = vpop.f32.mrf.mxu0  ;;  %v10892_v34 = vld [vmem:[#allocation2 + $0x72] sm:$0xff] }
 0x364   : > { %5817 = vmatprep.subr.mxu1 %v6828_v12  ;;  %v10846_v8 = vadd.f32 %v3603_v17, %v10602_v42  ;;  %v10849_v3 = vadd.f32 %v3838_v48, %v10605_v63  ;;  %v6827_v63 = vld [vmem:[%s11590_s2 + $0xff0] sm:$0xff] }
 0x365   : > { %6748 = vmatmul.mubr.msk.f32.gmra.mxu1 %vm721_vm1, %v10458_v22  ;;  %6832 = vmatmul.mubr.msk.f32.gmra.mxu0 %vm721_vm1, %v10843_v21  ;;  %v3605_v39 = vpop.f32.mrf.mxu1  ;;  %v3840_v54 = vpop.f32.mrf.mxu0 }
 0x366   : > { %5542 = vmatprep.mubr.f32.mxu1 %v7055_v44  ;;  %5776 = vmatprep.mubr.f32.mxu0 %v7055_v44  ;;  %v10858_v46 = vadd.f32 %v3605_v39, %v10620_v58  ;;  %v10861_v42 = vadd.f32 %v3840_v54, %v10623_v28  ;;  %v6823_v28 = vld [vmem:[%s11590_s2 + $0xfd0] sm:$0xff]  ;;  %v10918_v39 = vld [vmem:[#allocation2 + $0x82] sm:$0xff]  ;;  %v6816_v54 = vld [vmem:[%s11590_s2 + $0xf98] sm:$0xff] }
 0x367   : > { %v3609_v22 = vpop.f32.mrf.mxu1  ;;  %v3844_v41 = vpop.f32.mrf.mxu0 }
 0x368   : > { %v10872_v16 = vadd.f32 %v3609_v22, %v10634_v56  ;;  %v10875_v58 = vadd.f32 %v3844_v41, %v10637_v33 }
 0x369   : > { %6789 = vmatmul.mubr.msk.f32.vlgmr.msra.gmra.mxu1 %vm721_vm1, %v10506_v10  ;;  %6833 = vmatmul.mubr.msk.f32.gmra.mxu0 %vm721_vm1, %v10866_v6  ;;  %v3611_v18 = vpop.f32.mrf.mxu1  ;;  %v3846_v4 = vpop.f32.mrf.mxu0 }
 0x36a   : > { %5818 = vmatpush1.msra.mxu1 %v6827_v63  ;;  %5548 = vmatprep.mubr.f32.mxu1 %v7055_v44  ;;  %v10886_v56 = vadd.f32 %v3611_v18, %v10651_v32  ;;  %v10889_v33 = vadd.f32 %v3846_v4, %v10654_v9  ;;  %v6819_v9 = vld [vmem:[%s11590_s2 + $0xfb0] sm:$0xff] }
 0x36b   : > { %5782 = vmatprep.mubr.f32.mxu0 %v7055_v44  ;;  %5819 = vmatprep.subr.mxu1 %v6824_v20  ;;  %v3615_v10 = vpop.f32.mrf.mxu1  ;;  %v3850_v2 = vpop.f32.mrf.mxu0  ;;  %v6812_v20 = vld [vmem:[%s11590_s2 + $0xf78] sm:$0xff]  ;;  %v6811_v4 = vld [vmem:[%s11590_s2 + $0xf70] sm:$0xff] }
 0x36c   : > { %5820 = vmatpush1.msra.mxu1 %v6823_v28  ;;  %v10898_v55 = vadd.f32 %v3615_v10, %v10666_v23  ;;  %v10901_v32 = vadd.f32 %v3850_v2, %v10669_v61  ;;  %v6808_v10 = vld [vmem:[%s11590_s2 + $0xf58] sm:$0xff] }
 0x36d   : > { %6790 = vmatmul.mubr.msk.f32.gmra.mxu1 %vm721_vm1, %v10538_v37  ;;  %6834 = vmatmul.mubr.msk.f32.gmra.mxu0 %vm721_vm1, %v10892_v34  ;;  %v3617_v12 = vpop.f32.mrf.mxu1  ;;  %v3852_v17 = vpop.f32.mrf.mxu0 }
 0x36e   : > { %5554 = vmatprep.mubr.f32.mxu1 %v7055_v44  ;;  %5788 = vmatprep.mubr.f32.mxu0 %v7055_v44  ;;  %v10913_v23 = vadd.f32 %v3617_v12, %v10684_v38  ;;  %v10916_v61 = vadd.f32 %v3852_v17, %v10687_v5  ;;  %v6815_v38 = vld [vmem:[%s11590_s2 + $0xf90] sm:$0xff]  ;;  %v6804_v17 = vld [vmem:[%s11590_s2 + $0xf38] sm:$0xff] }
 0x36f   : > { %5821 = vmatprep.subr.mxu1 %v6820_v57  ;;  %v3621_v37 = vpop.f32.mrf.mxu1  ;;  %v3856_v48 = vpop.f32.mrf.mxu0 }
 0x370   : > { %5822 = vmatpush1.msra.mxu1 %v6819_v9  ;;  %v10924_v63 = vadd.f32 %v3621_v37, %v10698_v1  ;;  %v10927_v22 = vadd.f32 %v3856_v48, %v10701_v31  ;;  %v10938_v1 = vld [vmem:[#allocation2 + $0x92] sm:$0xff] }
 0x371   : > { %6791 = vmatmul.mubr.msk.f32.gmra.mxu1 %vm721_vm1, %v10567_v49  ;;  %6835 = vmatmul.mubr.msk.f32.gmra.mxu0 %vm721_vm1, %v10918_v39  ;;  %v3623_v5 = vpop.f32.mrf.mxu1  ;;  %v3858_v41 = vpop.f32.mrf.mxu0  ;;  %v6803_v37 = vld [vmem:[%s11590_s2 + $0xf30] sm:$0xff] }
 0x372   : > { %5560 = vmatprep.mubr.f32.mxu1 %v7055_v44  ;;  %5794 = vmatprep.mubr.f32.mxu0 %v7055_v44  ;;  %v10941_v31 = vadd.f32 %v3623_v5, %v10717_v0  ;;  %v10944_v49 = vadd.f32 %v3858_v41, %v10720_v26 }
 0x373   : > { %5823 = vmatprep.subr.mxu1 %v6816_v54 }
 0x374   : > { %5824 = vmatpush1.msra.mxu1 %v6815_v38  ;;  %v3627_v28 = vpop.f32.mrf.mxu1  ;;  %v4137_v18 = vpop.f32.mrf.mxu0  ;;  %v6800_v38 = vld [vmem:[%s11590_s2 + $0xf18] sm:$0xff] }
 0x375   : > { %6792 = vmatmul.mubr.msk.f32.gmra.mxu1 %vm721_vm1, %v10599_v53  ;;  %6836 = vmatmul.mubr.msk.f32.gmra.mxu0 %vm721_vm1, %v10938_v1  ;;  %v10957_v0 = vadd.f32 %v3627_v28, %v10743_v50  ;;  %v10960_v26 = vadd.f32 %v4137_v18, %v10746_v7  ;;  %v6807_v50 = vld [vmem:[%s11590_s2 + $0xf50] sm:$0xff] }
 0x376   : > { %5566 = vmatprep.mubr.f32.mxu1 %v7055_v44  ;;  %5825 = vmatprep.subr.mxu1 %v6812_v20  ;;  %v3629_v2 = vpop.f32.mrf.mxu1  ;;  %v4139_v57 = vpop.f32.mrf.mxu0 }
 0x377   : > { %5826 = vmatpush1.msra.mxu1 %v6811_v4  ;;  %v10967_v53 = vadd.f32 %v3629_v2, %v10753_v11  ;;  %v10970_v9 = vadd.f32 %v4139_v57, %v10756_v60 }
 0x378   : > { %5827 = vmatprep.subr.mxu1 %v6808_v10  ;;  %v3633_v7 = vpop.f32.mrf.mxu1  ;;  %v4143_v12 = vpop.f32.mrf.mxu0 }
 0x379   : > { %6793 = vmatmul.mubr.msk.f32.gmra.mxu1 %vm721_vm1, %v10628_v47  ;;  %v10981_v11 = vadd.f32 %v3633_v7, %v10768_v36  ;;  %v10984_v60 = vadd.f32 %v4143_v12, %v10771_v35  ;;  %v6799_v35 = vld [vmem:[%s11590_s2 + $0xf10] sm:$0xff] }
 0x37a   : > { %5572 = vmatprep.mubr.f32.mxu1 %v7055_v44  ;;  %5828 = vmatpush1.msra.mxu1 %v6807_v50  ;;  %v3635_v48 = vpop.f32.mrf.mxu1  ;;  %v4145_v54 = vpop.f32.mrf.mxu0 }
 0x37b   : > { %v10994_v47 = vadd.f32 %v3635_v48, %v10782_v52  ;;  %v10997_v36 = vadd.f32 %v4145_v54, %v10785_v15  ;;  %5829 = vmatprep.subr.mxu1 %v6804_v17 }
 0x37c   : > { %v3639_v5 = vpop.f32.mrf.mxu1  ;;  %v4149_v41 = vpop.f32.mrf.mxu0  ;;  %5830 = vmatpush1.msra.mxu1 %v6803_v37 }
 0x37d   : > { %6794 = vmatmul.mubr.msk.f32.gmra.mxu1 %vm721_vm1, %v10657_v45  ;;  %v11005_v20 = vadd.f32 %v3639_v5, %v10794_v29  ;;  %v11008_v52 = vadd.f32 %v4149_v41, %v10797_v19  ;;  %5831 = vmatprep.subr.mxu1 %v6800_v38 }
 0x37e   : > { %5578 = vmatprep.mubr.f32.mxu1 %v7055_v44  ;;  %v3641_v15 = vpop.f32.mrf.mxu1  ;;  %v4151_v28 = vpop.f32.mrf.mxu0  ;;  %5832 = vmatpush1.msra.mxu1 %v6799_v35 }
 0x37f   : > { %v11012_v18 = vadd.f32 %v3641_v15, %v10811_v25  ;;  %v11015_v4 = vadd.f32 %v4151_v28, %v10814_v51 }
 0x380   : > { %v3645_v10 = vpop.f32.mrf.mxu1  ;;  %v4155_v45 = vpop.f32.mrf.mxu0 }
 0x381   : > { %6795 = vmatmul.mubr.msk.f32.gmra.mxu1 %vm721_vm1, %v10692_v13  ;;  %v11020_v29 = vadd.f32 %v3645_v10, %v10820_v14  ;;  %v11023_v19 = vadd.f32 %v4155_v45, %v10823_v43 }
 0x382   : > { %5584 = vmatprep.mubr.f32.mxu1 %v7055_v44  ;;  %v3647_v2 = vpop.f32.mrf.mxu1  ;;  %v4157_v57 = vpop.f32.mrf.mxu0 }
 0x383   : > { %v11027_v25 = vadd.f32 %v3647_v2, %v10838_v27  ;;  %v11030_v51 = vadd.f32 %v4157_v57, %v10841_v30 }
 0x384   : > { %v3927_v50 = vpop.f32.mrf.mxu1  ;;  %v4161_v7 = vpop.f32.mrf.mxu0 }
 0x385   : > { %6796 = vmatmul.mubr.msk.f32.gmra.mxu1 %vm721_vm1, %v10714_v40  ;;  %v11035_v13 = vadd.f32 %v3927_v50, %v10846_v8  ;;  %v11038_v14 = vadd.f32 %v4161_v7, %v10849_v3 }
 0x386   : > { %5865 = vmatprep.mubr.f32.mxu1 %v7055_v44  ;;  %v3929_v43 = vpop.f32.mrf.mxu1  ;;  %v4163_v12 = vpop.f32.mrf.mxu0 }
 0x387   : > { %v11042_v27 = vadd.f32 %v3929_v43, %v10858_v46  ;;  %v11045_v30 = vadd.f32 %v4163_v12, %v10861_v42 }
 0x388   : > { %v3933_v17 = vpop.f32.mrf.mxu1  ;;  %v4167_v37 = vpop.f32.mrf.mxu0 }
 0x389   : > { %6837 = vmatmul.mubr.msk.f32.vlgmr.msra.gmra.mxu1 %vm721_vm1, %v10762_v59  ;;  %v11050_v40 = vadd.f32 %v3933_v17, %v10872_v16  ;;  %v11053_v8 = vadd.f32 %v4167_v37, %v10875_v58 }
 0x38a   : > { %5871 = vmatprep.mubr.f32.mxu1 %v7055_v44  ;;  %v3935_v3 = vpop.f32.mrf.mxu1  ;;  %v4169_v48 = vpop.f32.mrf.mxu0 }
 0x38b   : > { %v11057_v46 = vadd.f32 %v3935_v3, %v10886_v56  ;;  %v11060_v42 = vadd.f32 %v4169_v48, %v10889_v33 }
 0x38c   : > { %v3939_v54 = vpop.f32.mrf.mxu1  ;;  %v4173_v38 = vpop.f32.mrf.mxu0 }
 0x38d   : > { %6838 = vmatmul.mubr.msk.f32.gmra.mxu1 %vm721_vm1, %v10791_v62  ;;  %v11065_v59 = vadd.f32 %v3939_v54, %v10898_v55  ;;  %v11068_v16 = vadd.f32 %v4173_v38, %v10901_v32 }
 0x38e   : > { %5877 = vmatprep.mubr.f32.mxu1 %v7055_v44  ;;  %v3941_v58 = vpop.f32.mrf.mxu1  ;;  %v4175_v35 = vpop.f32.mrf.mxu0 }
 0x38f   : > { %v11072_v56 = vadd.f32 %v3941_v58, %v10913_v23  ;;  %v11075_v33 = vadd.f32 %v4175_v35, %v10916_v61 }
 0x390   : > { %v3945_v5 = vpop.f32.mrf.mxu1  ;;  %v4179_v41 = vpop.f32.mrf.mxu0 }
 0x391   : > { %6839 = vmatmul.mubr.msk.f32.gmra.mxu1 %vm721_vm1, %v10817_v24  ;;  %v11080_v62 = vadd.f32 %v3945_v5, %v10924_v63  ;;  %v11083_v55 = vadd.f32 %v4179_v41, %v10927_v22 }
 0x392   : > { %5883 = vmatprep.mubr.f32.mxu1 %v7055_v44  ;;  %v3947_v32 = vpop.f32.mrf.mxu1  ;;  %v4181_v15 = vpop.f32.mrf.mxu0 }
 0x393   : > { %v11087_v23 = vadd.f32 %v3947_v32, %v10941_v31  ;;  %v11090_v61 = vadd.f32 %v4181_v15, %v10944_v49 }
 0x395   : > { %6840 = vmatmul.mubr.msk.f32.gmra.mxu1 %vm721_vm1, %v10843_v21  ;;  %v3951_v24 = vpop.f32.mrf.mxu1  ;;  %v4460_v28 = vpop.f32.mrf.mxu0 }
 0x396   : > { %5889 = vmatprep.mubr.f32.mxu1 %v7055_v44  ;;  %v11096_v63 = vadd.f32 %v3951_v24, %v10957_v0  ;;  %v11099_v22 = vadd.f32 %v4460_v28, %v10960_v26 }
 0x397   : > { %v3953_v10 = vpop.f32.mrf.mxu1  ;;  %v4462_v45 = vpop.f32.mrf.mxu0 }
 0x398   : > { %v11102_v31 = vadd.f32 %v3953_v10, %v10967_v53  ;;  %v11105_v49 = vadd.f32 %v4462_v45, %v10970_v9 }
 0x399   : > { %6841 = vmatmul.mubr.msk.f32.gmra.mxu1 %vm721_vm1, %v10866_v6  ;;  %v3957_v21 = vpop.f32.mrf.mxu1  ;;  %v4466_v2 = vpop.f32.mrf.mxu0 }
 0x39a   : > { %5895 = vmatprep.mubr.f32.mxu1 %v7055_v44  ;;  %v11111_v0 = vadd.f32 %v3957_v21, %v10981_v11  ;;  %v11114_v26 = vadd.f32 %v4466_v2, %v10984_v60 }
 0x39b   : > { %v3959_v57 = vpop.f32.mrf.mxu1  ;;  %v4468_v50 = vpop.f32.mrf.mxu0 }
 0x39c   : > { %v11117_v53 = vadd.f32 %v3959_v57, %v10994_v47  ;;  %v11120_v9 = vadd.f32 %v4468_v50, %v10997_v36 }
 0x39d   : > { %6842 = vmatmul.mubr.msk.f32.gmra.mxu1 %vm721_vm1, %v10892_v34  ;;  %v3963_v6 = vpop.f32.mrf.mxu1  ;;  %v4472_v7 = vpop.f32.mrf.mxu0 }
 0x39e   : > { %5901 = vmatprep.mubr.f32.mxu1 %v7055_v44  ;;  %v11126_v11 = vadd.f32 %v3963_v6, %v11005_v20  ;;  %v11129_v60 = vadd.f32 %v4472_v7, %v11008_v52 }
 0x39f   : > { %v3965_v43 = vpop.f32.mrf.mxu1  ;;  %v4474_v12 = vpop.f32.mrf.mxu0 }
 0x3a0   : > { %v11132_v47 = vadd.f32 %v3965_v43, %v11012_v18  ;;  %v11135_v36 = vadd.f32 %v4474_v12, %v11015_v4 }
 0x3a1   : > { %6843 = vmatmul.mubr.msk.f32.gmra.mxu1 %vm721_vm1, %v10918_v39  ;;  %v3969_v34 = vpop.f32.mrf.mxu1  ;;  %v4478_v17 = vpop.f32.mrf.mxu0 }
 0x3a2   : > { %5907 = vmatprep.mubr.f32.mxu1 %v7055_v44  ;;  %v11141_v20 = vadd.f32 %v3969_v34, %v11020_v29  ;;  %v11144_v52 = vadd.f32 %v4478_v17, %v11023_v19 }
 0x3a3   : > { %v3971_v37 = vpop.f32.mrf.mxu1  ;;  %v4480_v3 = vpop.f32.mrf.mxu0 }
 0x3a4   : > { %v11147_v18 = vadd.f32 %v3971_v37, %v11027_v25  ;;  %v11150_v4 = vadd.f32 %v4480_v3, %v11030_v51 }
 0x3a5   : > { %6844 = vmatmul.mubr.msk.f32.gmra.mxu1 %vm721_vm1, %v10938_v1  ;;  %v4250_v39 = vpop.f32.mrf.mxu1  ;;  %v4484_v48 = vpop.f32.mrf.mxu0 }
 0x3a6   : > { %v11155_v44 = vadd.f32 %v4250_v39, %v11035_v13  ;;  %v11158_v29 = vadd.f32 %v4484_v48, %v11038_v14 }
 0x3a7   : > { %v4252_v19 = vpop.f32.mrf.mxu1  ;;  %v4486_v54 = vpop.f32.mrf.mxu0 }
 0x3a8   : > { %v11161_v38 = vadd.f32 %v4252_v19, %v11042_v27  ;;  %v11164_v25 = vadd.f32 %v4486_v54, %v11045_v30 }
 0x3a9   : > { %v4256_v51 = vpop.f32.mrf.mxu1  ;;  %v4490_v58 = vpop.f32.mrf.mxu0 }
 0x3aa   : > { %v11167_v1 = vadd.f32 %v4256_v51, %v11050_v40  ;;  %v11170_v35 = vadd.f32 %v4490_v58, %v11053_v8 }
 0x3ab   : > { %v4258_v13 = vpop.f32.mrf.mxu1  ;;  %v4492_v5 = vpop.f32.mrf.mxu0 }
 0x3ac   : > { %v11173_v14 = vadd.f32 %v4258_v13, %v11057_v46  ;;  %v11176_v41 = vadd.f32 %v4492_v5, %v11060_v42 }
 0x3ad   : > { %v4262_v27 = vpop.f32.mrf.mxu1  ;;  %v4496_v32 = vpop.f32.mrf.mxu0 }
 0x3ae   : > { %v11179_v30 = vadd.f32 %v4262_v27, %v11065_v59  ;;  %v11182_v15 = vadd.f32 %v4496_v32, %v11068_v16 }
 0x3af   : > { %v4264_v40 = vpop.f32.mrf.mxu1  ;;  %v4498_v24 = vpop.f32.mrf.mxu0 }
 0x3b0   : > { %v11185_v8 = vadd.f32 %v4264_v40, %v11072_v56  ;;  %v11188_v28 = vadd.f32 %v4498_v24, %v11075_v33 }
 0x3b1   : > { %v4268_v46 = vpop.f32.mrf.mxu1  ;;  %v4502_v10 = vpop.f32.mrf.mxu0 }
 0x3b2   : > { %v11191_v42 = vadd.f32 %v4268_v46, %v11080_v62  ;;  %v11194_v45 = vadd.f32 %v4502_v10, %v11083_v55 }
 0x3b3   : > { %v4270_v59 = vpop.f32.mrf.mxu1  ;;  %v4504_v21 = vpop.f32.mrf.mxu0 }
 0x3b4   : > { %v11197_v16 = vadd.f32 %v4270_v59, %v11087_v23  ;;  %v11200_v2 = vadd.f32 %v4504_v21, %v11090_v61 }
 0x3b6   : > { %v4274_v56 = vpop.f32.mrf.mxu1  ;;  %v4784_v57 = vpop.f32.mrf.mxu0 }
 0x3b7   : > { %v11203_v33 = vadd.f32 %v4274_v56, %v11096_v63  ;;  %v11206_v50 = vadd.f32 %v4784_v57, %v11099_v22 }
 0x3b8   : > { %v4276_v62 = vpop.f32.mrf.mxu1  ;;  %v4786_v6 = vpop.f32.mrf.mxu0 }
 0x3b9   : > { %v11209_v55 = vadd.f32 %v4276_v62, %v11102_v31  ;;  %v11212_v7 = vadd.f32 %v4786_v6, %v11105_v49 }
 0x3ba   : > { %v4280_v23 = vpop.f32.mrf.mxu1  ;;  %v4790_v43 = vpop.f32.mrf.mxu0 }
 0x3bb   : > { %v4319_v61 = vadd.f32 %v4280_v23, %v11111_v0  ;;  %v11216_v12 = vadd.f32 %v4790_v43, %v11114_v26 }
 0x3bc   : > { %v4282_v63 = vpop.f32.mrf.mxu1  ;;  %v4792_v34 = vpop.f32.mrf.mxu0 }
 0x3bd   : > { %v4320_v22 = vadd.f32 %v4282_v63, %v11117_v53  ;;  %v11220_v17 = vadd.f32 %v4792_v34, %v11120_v9 }
 0x3be   : > { %v4286_v37 = vpop.f32.mrf.mxu1  ;;  %v4796_v31 = vpop.f32.mrf.mxu0 }
 0x3bf   : > { %v4323_v3 = vadd.f32 %v4286_v37, %v11126_v11  ;;  %v11224_v49 = vadd.f32 %v4796_v31, %v11129_v60 }
 0x3c0   : > { %v4288_v39 = vpop.f32.mrf.mxu1  ;;  %v4798_v48 = vpop.f32.mrf.mxu0 }
 0x3c1   : > { %v4324_v0 = vadd.f32 %v4288_v39, %v11132_v47  ;;  %v11228_v26 = vadd.f32 %v4798_v48, %v11135_v36 }
 0x3c2   : > { %v4292_v19 = vpop.f32.mrf.mxu1  ;;  %v4802_v54 = vpop.f32.mrf.mxu0 }
 0x3c3   : > { %v4327_v53 = vadd.f32 %v4292_v19, %v11141_v20  ;;  %v11232_v9 = vadd.f32 %v4802_v54, %v11144_v52 }
 0x3c4   : > { %v4294_v51 = vpop.f32.mrf.mxu1  ;;  %v4804_v58 = vpop.f32.mrf.mxu0 }
 0x3c5   : > { %v4328_v11 = vadd.f32 %v4294_v51, %v11147_v18  ;;  %v11236_v60 = vadd.f32 %v4804_v58, %v11150_v4 }
 0x3c6   : > { %v4573_v13 = vpop.f32.mrf.mxu1  ;;  %v4808_v5 = vpop.f32.mrf.mxu0 }
 0x3c7   : > { %v4622_v47 = vadd.f32 %v4573_v13, %v11155_v44  ;;  %v11240_v36 = vadd.f32 %v4808_v5, %v11158_v29 }
 0x3c8   : > { %v4575_v27 = vpop.f32.mrf.mxu1  ;;  %v4810_v32 = vpop.f32.mrf.mxu0 }
 0x3c9   : > { %v4623_v20 = vadd.f32 %v4575_v27, %v11161_v38  ;;  %v11244_v52 = vadd.f32 %v4810_v32, %v11164_v25 }
 0x3ca   : > { %v4579_v40 = vpop.f32.mrf.mxu1  ;;  %v4814_v24 = vpop.f32.mrf.mxu0 }
 0x3cb   : > { %11594 = vst [vmem:[#allocation6_spill] sm:$0xff] %v11244_v52  ;;  %v4626_v18 = vadd.f32 %v4579_v40, %v11167_v1  ;;  %v11248_v4 = vadd.f32 %v4814_v24, %v11170_v35 }
 0x3cc   : > { %v4581_v46 = vpop.f32.mrf.mxu1  ;;  %v4816_v10 = vpop.f32.mrf.mxu0 }
 0x3cd   : > { %11595 = vst [vmem:[#allocation7_spill] sm:$0xff] %v11248_v4  ;;  %v4627_v44 = vadd.f32 %v4581_v46, %v11173_v14  ;;  %v11252_v29 = vadd.f32 %v4816_v10, %v11176_v41 }
 0x3ce   : > { %v4585_v59 = vpop.f32.mrf.mxu1  ;;  %v4820_v21 = vpop.f32.mrf.mxu0 }
 0x3cf   : > { %11596 = vst [vmem:[#allocation8_spill] sm:$0xff] %v11252_v29  ;;  %v4630_v38 = vadd.f32 %v4585_v59, %v11179_v30  ;;  %v11256_v25 = vadd.f32 %v4820_v21, %v11182_v15 }
 0x3d0   : > { %v4587_v56 = vpop.f32.mrf.mxu1  ;;  %v4822_v57 = vpop.f32.mrf.mxu0 }
 0x3d1   : > { %11597 = vst [vmem:[#allocation9_spill] sm:$0xff] %v11256_v25  ;;  %v4631_v1 = vadd.f32 %v4587_v56, %v11185_v8  ;;  %v11260_v35 = vadd.f32 %v4822_v57, %v11188_v28 }
 0x3d2   : > { %v4591_v62 = vpop.f32.mrf.mxu1  ;;  %v4826_v6 = vpop.f32.mrf.mxu0 }
 0x3d3   : > { %11598 = vst [vmem:[#allocation10_spill] sm:$0xff] %v11260_v35  ;;  %v4634_v14 = vadd.f32 %v4591_v62, %v11191_v42  ;;  %v11264_v41 = vadd.f32 %v4826_v6, %v11194_v45 }
 0x3d4   : > { %v4593_v23 = vpop.f32.mrf.mxu1  ;;  %v4828_v43 = vpop.f32.mrf.mxu0 }
 0x3d5   : > { %11599 = vst [vmem:[#allocation11_spill] sm:$0xff] %v11264_v41  ;;  %v4635_v30 = vadd.f32 %v4593_v23, %v11197_v16  ;;  %v11268_v15 = vadd.f32 %v4828_v43, %v11200_v2 }
 0x3d7   : > { %11600 = vst [vmem:[#allocation12_spill] sm:$0xff] %v11268_v15  ;;  %v4597_v63 = vpop.f32.mrf.mxu1  ;;  %v11270_v34 = vpop.f32.mrf.mxu0 }
 0x3d8   : > { %v4638_v8 = vadd.f32 %v4597_v63, %v11203_v33 }
 0x3d9   : > { %v4599_v28 = vpop.f32.mrf.mxu1  ;;  %v11273_v37 = vpop.f32.mrf.mxu0 }
 0x3da   : > { %v4639_v42 = vadd.f32 %v4599_v28, %v11209_v55 }
 0x3db   : > { %v4603_v31 = vpop.f32.mrf.mxu1  ;;  %v11276_v45 = vpop.f32.mrf.mxu0 }
 0x3dc   : > { %v4642_v39 = vadd.f32 %v4603_v31, %v4319_v61 }
 0x3dd   : > { %v4605_v48 = vpop.f32.mrf.mxu1  ;;  %v11278_v19 = vpop.f32.mrf.mxu0 }
 0x3de   : > { %v4643_v16 = vadd.f32 %v4605_v48, %v4320_v22 }
 0x3df   : > { %v4609_v2 = vpop.f32.mrf.mxu1  ;;  %v11280_v54 = vpop.f32.mrf.mxu0 }
 0x3e0   : > { %v4646_v51 = vadd.f32 %v4609_v2, %v4323_v3 }
 0x3e1   : > { %v4611_v58 = vpop.f32.mrf.mxu1  ;;  %v11282_v13 = vpop.f32.mrf.mxu0 }
 0x3e2   : > { %v4647_v33 = vadd.f32 %v4611_v58, %v4324_v0 }
 0x3e3   : > { %v4615_v5 = vpop.f32.mrf.mxu1  ;;  %v11284_v27 = vpop.f32.mrf.mxu0 }
 0x3e4   : > { %v4650_v55 = vadd.f32 %v4615_v5, %v4327_v53 }
 0x3e5   : > { %v4617_v32 = vpop.f32.mrf.mxu1  ;;  %v11286_v40 = vpop.f32.mrf.mxu0 }
 0x3e6   : > { %v4651_v61 = vadd.f32 %v4617_v32, %v4328_v11 }
 0x3e7   : > { %v4897_v24 = vpop.f32.mrf.mxu1  ;;  %v11288_v46 = vpop.f32.mrf.mxu0 }
 0x3e8   : > { %v11290_v22 = vadd.f32 %v4897_v24, %v4622_v47 }
 0x3e9   : > { %v4899_v10 = vpop.f32.mrf.mxu1  ;;  %v11292_v59 = vpop.f32.mrf.mxu0 }
 0x3ea   : > { %11601 = vst [vmem:[#allocation13_spill] sm:$0xff] %v11292_v59  ;;  %v11294_v3 = vadd.f32 %v4899_v10, %v4623_v20 }
 0x3eb   : > { %v4903_v21 = vpop.f32.mrf.mxu1  ;;  %v11296_v0 = vpop.f32.mrf.mxu0 }
 0x3ec   : > { %11602 = vst [vmem:[#allocation14_spill] sm:$0xff] %v11296_v0  ;;  %v11298_v56 = vadd.f32 %v4903_v21, %v4626_v18 }
 0x3ed   : > { %v4905_v53 = vpop.f32.mrf.mxu1  ;;  %v11300_v57 = vpop.f32.mrf.mxu0 }
 0x3ee   : > { %11603 = vst [vmem:[#allocation15_spill] sm:$0xff] %v11300_v57  ;;  %v11302_v62 = vadd.f32 %v4905_v53, %v4627_v44 }
 0x3ef   : > { %v4909_v11 = vpop.f32.mrf.mxu1  ;;  %v11304_v6 = vpop.f32.mrf.mxu0 }
 0x3f0   : > { %11604 = vst [vmem:[#allocation16_spill] sm:$0xff] %v11304_v6  ;;  %v11306_v47 = vadd.f32 %v4909_v11, %v4630_v38 }
 0x3f1   : > { %v4911_v23 = vpop.f32.mrf.mxu1  ;;  %v11308_v43 = vpop.f32.mrf.mxu0 }
 0x3f2   : > { %11605 = vst [vmem:[#allocation17_spill] sm:$0xff] %v11308_v43  ;;  %v11310_v20 = vadd.f32 %v4911_v23, %v4631_v1 }
 0x3f3   : > { %v4915_v63 = vpop.f32.mrf.mxu1  ;;  %v11312_v28 = vpop.f32.mrf.mxu0 }
 0x3f4   : > { %11606 = vst [vmem:[#allocation18_spill] sm:$0xff] %v11312_v28  ;;  %v11314_v18 = vadd.f32 %v4915_v63, %v4634_v14 }
 0x3f5   : > { %v4917_v31 = vpop.f32.mrf.mxu1  ;;  %v11316_v48 = vpop.f32.mrf.mxu0 }
 0x3f6   : > { %11607 = vst [vmem:[#allocation19_spill] sm:$0xff] %v11316_v48  ;;  %v11318_v44 = vadd.f32 %v4917_v31, %v4635_v30 }
 0x3f8   : > { %v4921_v2 = vpop.f32.mrf.mxu1  ;;  %v11320_v58 = vpop.f32.mrf.mxu0 }
 0x3f9   : > { %v11322_v38 = vadd.f32 %v4921_v2, %v4638_v8 }
 0x3fa   : > { %v4923_v5 = vpop.f32.mrf.mxu1  ;;  %v11324_v32 = vpop.f32.mrf.mxu0 }
 0x3fb   : > { %11608 = vst [vmem:[#allocation20_spill] sm:$0xff] %v11322_v38  ;;  %v11326_v1 = vadd.f32 %v4923_v5, %v4639_v42 }
 0x3fc   : > { %v4927_v24 = vpop.f32.mrf.mxu1  ;;  %v11328_v10 = vpop.f32.mrf.mxu0 }
 0x3fd   : > { %11609 = vst [vmem:[#allocation21_spill] sm:$0xff] %v11326_v1  ;;  %v11330_v14 = vadd.f32 %v4927_v24, %v4642_v39 }
 0x3fe   : > { %v4929_v21 = vpop.f32.mrf.mxu1  ;;  %v11332_v53 = vpop.f32.mrf.mxu0 }
 0x3ff   : > { %11610 = vst [vmem:[#allocation22_spill] sm:$0xff] %v11330_v14  ;;  %v11334_v30 = vadd.f32 %v4929_v21, %v4643_v16 }
 0x400   : > { %v4933_v11 = vpop.f32.mrf.mxu1  ;;  %v11336_v23 = vpop.f32.mrf.mxu0 }
 0x401   : > { %11611 = vst [vmem:[#allocation23_spill] sm:$0xff] %v11334_v30  ;;  %v11338_v8 = vadd.f32 %v4933_v11, %v4646_v51 }
 0x402   : > { %v4935_v63 = vpop.f32.mrf.mxu1  ;;  %v11340_v31 = vpop.f32.mrf.mxu0 }
 0x403   : > { %11612 = vst [vmem:[#allocation24_spill] sm:$0xff] %v11338_v8  ;;  %v11342_v42 = vadd.f32 %v4935_v63, %v4647_v33 }
 0x404   : > { %v4939_v2 = vpop.f32.mrf.mxu1  ;;  %v11344_v5 = vpop.f32.mrf.mxu0 }
 0x405   : > { %11613 = vst [vmem:[#allocation25_spill] sm:$0xff] %v11342_v42  ;;  %v11346_v39 = vadd.f32 %v4939_v2, %v4650_v55 }
 0x406   : > { %v4941_v24 = vpop.f32.mrf.mxu1  ;;  %v11348_v48 = vpop.f32.mrf.mxu0 }
 0x407   : > { %11614 = vst [vmem:[#allocation26_spill] sm:$0xff] %v11346_v39  ;;  %11615 = vst [vmem:[#allocation27_spill] sm:$0xff] %v11348_v48  ;;  %v11350_v16 = vadd.f32 %v4941_v24, %v4651_v61 }
 0x408   : > { %v5221_v21 = vpop.f32.mrf.mxu1  ;;  %v11352_v15 = vpop.f32.mrf.mxu0 }
 0x409   : > { %11616 = vst [vmem:[#allocation28_spill] sm:$0xff] %v11350_v16  ;;  %11617 = vst [vmem:[#allocation29_spill] sm:$0xff] %v11352_v15 }
 0x40a   : > { %v5223_v51 = vpop.f32.mrf.mxu1  ;;  %v11354_v28 = vpop.f32.mrf.mxu0 }
 0x40b   : > { %11618 = vst [vmem:[#allocation30_spill] sm:$0xff] %v11354_v28 }
 0x40c   : > { %v5227_v11 = vpop.f32.mrf.mxu1  ;;  %v11358_v63 = vpop.f32.mrf.mxu0 }
 0x40d   : > { %11619 = vst [vmem:[#allocation31_spill] sm:$0xff] %v11358_v63 }
 0x40e   : > { %v5229_v41 = vpop.f32.mrf.mxu1  ;;  %v11364_v2 = vpop.f32.mrf.mxu0 }
 0x40f   : > { %11620 = vst [vmem:[#allocation32_spill] sm:$0xff] %v11364_v2 }
 0x410   : > { %v11356_v33 = vpop.f32.mrf.mxu1  ;;  %v11368_v24 = vpop.f32.mrf.mxu0 }
 0x411   : > { %11621 = vst [vmem:[#allocation33_spill] sm:$0xff] %v11368_v24 }
 0x412   : > { %v11360_v42 = vpop.f32.mrf.mxu1  ;;  %v11374_v43 = vpop.f32.mrf.mxu0 }
 0x413   : > { %11624 = vst [vmem:[#allocation36_spill] sm:$0xff] %v11374_v43 }
 0x414   : > { %v11362_v55 = vpop.f32.mrf.mxu1  ;;  %v11380_v6 = vpop.f32.mrf.mxu0 }
 0x415   : > { %11627 = vst [vmem:[#allocation39_spill] sm:$0xff] %v11380_v6 }
 0x416   : > { %v11366_v61 = vpop.f32.mrf.mxu1  ;;  %v11386_v2 = vpop.f32.mrf.mxu0 }
 0x417   : > { %11630 = vst [vmem:[#allocation42_spill] sm:$0xff] %v11386_v2 }
 0x419   : > { %v11370_v16 = vpop.f32.mrf.mxu1  ;;  %v5754_v57 = vpop.f32.mrf.mxu0 }
 0x41a   : > { %11622 = vst [vmem:[#allocation34_spill] sm:$0xff] %v11370_v16 }
 0x41b   : > { %v11372_v39 = vpop.f32.mrf.mxu1  ;;  %v5756_v43 = vpop.f32.mrf.mxu0 }
 0x41c   : > { %11623 = vst [vmem:[#allocation35_spill] sm:$0xff] %v11372_v39 }
 0x41d   : > { %v11376_v35 = vpop.f32.mrf.mxu1  ;;  %v5760_v0 = vpop.f32.mrf.mxu0 }
 0x41e   : > { %11625 = vst [vmem:[#allocation37_spill] sm:$0xff] %v11376_v35 }
 0x41f   : > { %v11378_v8 = vpop.f32.mrf.mxu1  ;;  %v5762_v6 = vpop.f32.mrf.mxu0 }
 0x420   : > { %11626 = vst [vmem:[#allocation38_spill] sm:$0xff] %v11378_v8 }
 0x421   : > { %v11382_v25 = vpop.f32.mrf.mxu1  ;;  %v5766_v2 = vpop.f32.mrf.mxu0 }
 0x422   : > { %11628 = vst [vmem:[#allocation40_spill] sm:$0xff] %v11382_v25 }
 0x423   : > { %v11384_v30 = vpop.f32.mrf.mxu1  ;;  %v11402_v39 = vpop.f32.mrf.mxu0 }
 0x424   : > { %11629 = vst [vmem:[#allocation41_spill] sm:$0xff] %v11384_v30 }
 0x425   : > { %v11388_v63 = vpop.f32.mrf.mxu1  ;;  %v11408_v59 = vpop.f32.mrf.mxu0 }
 0x426   : > { %11631 = vst [vmem:[#allocation43_spill] sm:$0xff] %v11388_v63  ;;  %11638 = vst [vmem:[#allocation50_spill] sm:$0xff] %v11408_v59 }
 0x427   : > { %v11390_v24 = vpop.f32.mrf.mxu1  ;;  %v11414_v38 = vpop.f32.mrf.mxu0 }
 0x428   : > { %11632 = vst [vmem:[#allocation44_spill] sm:$0xff] %v11390_v24  ;;  %11641 = vst [vmem:[#allocation53_spill] sm:$0xff] %v11414_v38 }
 0x429   : > { %v5544_v29 = vpop.f32.mrf.mxu1  ;;  %v11431_v48 = vpop.f32.mrf.mxu0 }
 0x42b   : > { %v5546_v14 = vpop.f32.mrf.mxu1 }
 0x42d   : > { %v5550_v28 = vpop.f32.mrf.mxu1 }
 0x42f   : > { %v5552_v35 = vpop.f32.mrf.mxu1 }
 0x431   : > { %v5556_v8 = vpop.f32.mrf.mxu1 }
 0x433   : > { %v11392_v4 = vpop.f32.mrf.mxu1 }
 0x435   : > { %v11394_v25 = vpop.f32.mrf.mxu1 }
 0x437   : > { %v11396_v30 = vpop.f32.mrf.mxu1 }
 0x438   : > { %11633 = vst [vmem:[#allocation45_spill] sm:$0xff] %v11396_v30 }
 0x439   : > { %v11398_v63 = vpop.f32.mrf.mxu1 }
 0x43a   : > { %11634 = vst [vmem:[#allocation46_spill] sm:$0xff] %v11398_v63  ;;  %v5270_v63 = vadd.f32 %v5221_v21, %v11290_v22 }
 0x43b   : > { %v11400_v24 = vpop.f32.mrf.mxu1 }
 0x43c   : > { %11635 = vst [vmem:[#allocation47_spill] sm:$0xff] %v11400_v24  ;;  %v5268_v24 = vadd.f32 %v11270_v34, %v11206_v50  ;;  %v5593_v59 = vadd.f32 %v5544_v29, %v5270_v63  ;;  %v5274_v34 = vadd.f32 %v5227_v11, %v11298_v56  ;;  %v5276_v56 = vadd.f32 %v11280_v54, %v11224_v49 }
 0x43d   : > { %v11404_v1 = vpop.f32.mrf.mxu1  ;;  %v5279_v49 = vadd.f32 %v11360_v42, %v11310_v20  ;;  %v5281_v11 = vadd.f32 %v11286_v40, %v11236_v60  ;;  %v11644_v40 = vld [vmem:[#allocation20_spill] sm:$0xff] }
 0x43e   : > { %11636 = vst [vmem:[#allocation48_spill] sm:$0xff] %v11404_v1  ;;  %v5269_v1 = vadd.f32 %v11273_v37, %v11212_v7 }
 0x43f   : > { %v11406_v15 = vpop.f32.mrf.mxu1 }
 0x440   : > { %11637 = vst [vmem:[#allocation49_spill] sm:$0xff] %v11406_v15  ;;  %v5592_v38 = vadd.f32 %v11324_v32, %v5269_v1  ;;  %v5597_v32 = vadd.f32 %v5550_v28, %v5274_v34  ;;  %v5599_v28 = vadd.f32 %v11336_v23, %v5276_v56  ;;  %v11646_v34 = vld [vmem:[#allocation50_spill] sm:$0xff] }
 0x441   : > { %v11410_v52 = vpop.f32.mrf.mxu1 }
 0x442   : > { %11639 = vst [vmem:[#allocation51_spill] sm:$0xff] %v11410_v52  ;;  %v5591_v52 = vadd.f32 %v11320_v58, %v5268_v24  ;;  %v5273_v58 = vadd.f32 %v11278_v19, %v11220_v17  ;;  %v11643_v24 = vld [vmem:[#allocation27_spill] sm:$0xff] }
 0x443   : > { %v11412_v16 = vpop.f32.mrf.mxu1  ;;  %v5604_v60 = vadd.f32 %v11643_v24, %v5281_v11  ;;  %v11667_v24 = vld [vmem:[#allocation9_spill] sm:$0xff] }
 0x444   : > { %11640 = vst [vmem:[#allocation52_spill] sm:$0xff] %v11412_v16  ;;  %v5271_v16 = vadd.f32 %v5223_v51, %v11294_v3  ;;  %v5914_v22 = vadd.f32 %v5754_v57, %v5591_v52  ;;  %v5275_v3 = vadd.f32 %v5229_v41, %v11302_v62  ;;  %v5596_v52 = vadd.f32 %v11332_v53, %v5273_v58 }
 0x445   : > { %v11416_v30 = vpop.f32.mrf.mxu1 }
 0x446   : > { %11642 = vst [vmem:[#allocation54_spill] sm:$0xff] %v11416_v30  ;;  %v5272_v30 = vadd.f32 %v11276_v45, %v11216_v12  ;;  %v5594_v7 = vadd.f32 %v5546_v14, %v5271_v16  ;;  %v5915_v45 = vadd.f32 %v5756_v43, %v5592_v38  ;;  %v11445_v14 = vpop.f32.mrf.mxu0  ;;  %v5598_v19 = vadd.f32 %v5552_v35, %v5275_v3  ;;  %v11649_v3 = vld [vmem:[#allocation13_spill] sm:$0xff] }
 0x447   : > { %v11423_v15 = vpop.f32.mrf.mxu1  ;;  %v5277_v43 = vadd.f32 %v11282_v13, %v11228_v26  ;;  %v5919_v54 = vadd.f32 %v5762_v6, %v5596_v52  ;;  %v5282_v13 = vadd.f32 %v11362_v55, %v11314_v18  ;;  %v5922_v6 = vadd.f32 %v5766_v2, %v5599_v28  ;;  %v11657_v28 = vld [vmem:[#allocation30_spill] sm:$0xff] }
 0x448   : > { %v5595_v29 = vadd.f32 %v11328_v10, %v5272_v30  ;;  %v5280_v30 = vadd.f32 %v11284_v27, %v11232_v9  ;;  %v5784_v20 = vpop.f32.mrf.mxu0  ;;  %v5283_v27 = vadd.f32 %v11366_v61, %v11318_v44  ;;  %v5284_v2 = vadd.f32 %v11288_v46, %v11240_v36  ;;  %v11650_v36 = vld [vmem:[#allocation29_spill] sm:$0xff] }
 0x449   : > { %v5867_v50 = vpop.f32.mrf.mxu1  ;;  %v5600_v26 = vadd.f32 %v11340_v31, %v5277_v43 }
 0x44a   : > { %v5916_v37 = vadd.f32 %v5867_v50, %v5593_v59  ;;  %v5278_v59 = vadd.f32 %v11356_v33, %v11306_v47  ;;  %v5918_v57 = vadd.f32 %v5760_v0, %v5595_v29  ;;  %v5603_v9 = vadd.f32 %v11344_v5, %v5280_v30  ;;  %v11645_v5 = vld [vmem:[#allocation34_spill] sm:$0xff]  ;;  %v5786_v61 = vpop.f32.mrf.mxu0  ;;  %v11660_v30 = vld [vmem:[#allocation47_spill] sm:$0xff] }
 0x44b   : > { %v5869_v12 = vpop.f32.mrf.mxu1  ;;  %v5923_v18 = vadd.f32 %v11402_v39, %v5600_v26  ;;  %v5605_v33 = vadd.f32 %v11394_v25, %v5282_v13  ;;  %v5286_v50 = vadd.f32 %v11645_v5, %v11644_v40  ;;  %v11648_v29 = vld [vmem:[#allocation6_spill] sm:$0xff]  ;;  %v5607_v46 = vadd.f32 %v11650_v36, %v5284_v2  ;;  %v11669_v5 = vld [vmem:[#allocation32_spill] sm:$0xff]  ;;  %v11674_v36 = vld [vmem:[#allocation17_spill] sm:$0xff] }
 0x44c   : > { %v5946_v1 = vmul.f32 %v5916_v37, %v5914_v22  ;;  %v5917_v21 = vadd.f32 %v5869_v12, %v5594_v7  ;;  %v5601_v53 = vadd.f32 %v5556_v8, %v5278_v59  ;;  %v5602_v8 = vadd.f32 %v11392_v4, %v5279_v49  ;;  %v11654_v59 = vld [vmem:[#allocation46_spill] sm:$0xff] }
 0x44d   : > { %v5873_v17 = vpop.f32.mrf.mxu1  ;;  %v5926_v44 = vadd.f32 %v11646_v34, %v5603_v9  ;;  %v5285_v12 = vadd.f32 %v11649_v3, %v11648_v29  ;;  %v11664_v9 = vld [vmem:[#allocation23_spill] sm:$0xff]  ;;  %v11670_v34 = vld [vmem:[#allocation24_spill] sm:$0xff] }
 0x44e   : > { %v5962_v10 = vadd.f32 %v5946_v1, %v5914_v22  ;;  %v5947_v41 = vmul.f32 %v5917_v21, %v5915_v45  ;;  %v5920_v62 = vadd.f32 %v5873_v17, %v5597_v32  ;;  %v11647_v22 = vld [vmem:[#allocation45_spill] sm:$0xff]  ;;  %v11652_v32 = vld [vmem:[#allocation35_spill] sm:$0xff] }
 0x44f   : > { %v5875_v38 = vpop.f32.mrf.mxu1  ;;  %v5606_v7 = vadd.f32 %v11647_v22, %v5283_v27  ;;  %v11653_v21 = vld [vmem:[#allocation53_spill] sm:$0xff]  ;;  %v5608_v49 = vadd.f32 %v11657_v28, %v5285_v12  ;;  %v11665_v27 = vld [vmem:[#allocation38_spill] sm:$0xff]  ;;  %v11681_v28 = vld [vmem:[#allocation36_spill] sm:$0xff] }
 0x450   : > { %5978 = vst [vmem:[%s11452_s27] sm:$0xff] %v5962_v10  ;;  %v5963_v35 = vadd.f32 %v5947_v41, %v5915_v45  ;;  %v5948_v0 = vmul.f32 %v5920_v62, %v5918_v57  ;;  %v5921_v47 = vadd.f32 %v5875_v38, %v5598_v19  ;;  %v11651_v45 = vld [vmem:[#allocation21_spill] sm:$0xff]  ;;  %v5927_v56 = vadd.f32 %v11653_v21, %v5604_v60  ;;  %v11655_v41 = vld [vmem:[#allocation7_spill] sm:$0xff]  ;;  %v11656_v62 = vld [vmem:[#allocation14_spill] sm:$0xff] }
 0x451   : > { %v5879_v23 = vpop.f32.mrf.mxu1  ;;  %v5287_v1 = vadd.f32 %v11652_v32, %v11651_v45  ;;  %v5288_v43 = vadd.f32 %v11656_v62, %v11655_v41  ;;  %v11659_v38 = vld [vmem:[#allocation37_spill] sm:$0xff]  ;;  %v11668_v60 = vld [vmem:[#allocation16_spill] sm:$0xff]  ;;  %v11673_v12 = vld [vmem:[#allocation10_spill] sm:$0xff] }
 0x452   : > { %5979 = vst [vmem:[%s11452_s27 + $0x8] sm:$0xff] %v5963_v35  ;;  %v5964_v42 = vadd.f32 %v5948_v0, %v5918_v57  ;;  %v5949_v16 = vmul.f32 %v5921_v47, %v5919_v54  ;;  %v5924_v51 = vadd.f32 %v5879_v23, %v5601_v53  ;;  %v5609_v57 = vadd.f32 %v11654_v59, %v5286_v50  ;;  %v5790_v0 = vpop.f32.mrf.mxu0  ;;  %v11675_v45 = vld [vmem:[#allocation33_spill] sm:$0xff]  ;;  %v11679_v41 = vld [vmem:[#allocation11_spill] sm:$0xff]  ;;  %v11680_v62 = vld [vmem:[#allocation18_spill] sm:$0xff] }
 0x453   : > { %v5881_v31 = vpop.f32.mrf.mxu1  ;;  %v5930_v35 = vadd.f32 %v11431_v48, %v5607_v46  ;;  %v5610_v26 = vadd.f32 %v11660_v30, %v5287_v1  ;;  %v5292_v40 = vadd.f32 %v11668_v60, %v11667_v24  ;;  %v5293_v46 = vadd.f32 %v11674_v36, %v11673_v12  ;;  %v11676_v1 = vld [vmem:[#allocation25_spill] sm:$0xff] }
 0x454   : > { %5980 = vst [vmem:[%s11452_s27 + $0x10] sm:$0xff] %v5964_v42  ;;  %v5965_v4 = vadd.f32 %v5949_v16, %v5919_v54  ;;  %v5950_v63 = vmul.f32 %v5924_v51, %v5922_v6  ;;  %v5925_v55 = vadd.f32 %v5881_v31, %v5602_v8  ;;  %v11658_v54 = vld [vmem:[#allocation22_spill] sm:$0xff]  ;;  %v11661_v8 = vld [vmem:[#allocation8_spill] sm:$0xff]  ;;  %v11662_v42 = vld [vmem:[#allocation15_spill] sm:$0xff]  ;;  %v5931_v31 = vadd.f32 %v11445_v14, %v5608_v49 }
 0x455   : > { %v5885_v39 = vpop.f32.mrf.mxu1  ;;  %v5290_v53 = vadd.f32 %v11659_v38, %v11658_v54  ;;  %v5289_v16 = vadd.f32 %v11662_v42, %v11661_v8  ;;  %v11663_v51 = vld [vmem:[#allocation31_spill] sm:$0xff]  ;;  %v11672_v14 = vld [vmem:[#allocation49_spill] sm:$0xff]  ;;  %v5615_v32 = vadd.f32 %v11675_v45, %v5292_v40  ;;  %v5616_v49 = vadd.f32 %v11681_v28, %v5293_v46  ;;  %v11682_v54 = vld [vmem:[#allocation26_spill] sm:$0xff] }
 0x456   : > { %5981 = vst [vmem:[%s11452_s27 + $0x18] sm:$0xff] %v5965_v4  ;;  %v5966_v25 = vadd.f32 %v5950_v63, %v5922_v6  ;;  %v5951_v37 = vmul.f32 %v5925_v55, %v5923_v18  ;;  %v5928_v58 = vadd.f32 %v5885_v39, %v5605_v33  ;;  %v5611_v11 = vadd.f32 %v11663_v51, %v5288_v43  ;;  %v11666_v33 = vld [vmem:[#allocation48_spill] sm:$0xff]  ;;  %v11677_v21 = vld [vmem:[#allocation41_spill] sm:$0xff]  ;;  %v11683_v38 = vld [vmem:[#allocation43_spill] sm:$0xff] }
 0x457   : > { %v5887_v52 = vpop.f32.mrf.mxu1  ;;  %v5613_v4 = vadd.f32 %v11666_v33, %v5290_v53  ;;  %v5612_v50 = vadd.f32 %v11669_v5, %v5289_v16  ;;  %v5296_v43 = vadd.f32 %v11680_v62, %v11679_v41  ;;  %v5298_v53 = vadd.f32 %v11683_v38, %v11682_v54  ;;  %v11685_v8 = vld [vmem:[#allocation12_spill] sm:$0xff]  ;;  %v11686_v42 = vld [vmem:[#allocation19_spill] sm:$0xff] }
 0x458   : > { %5982 = vst [vmem:[%s11452_s27 + $0x20] sm:$0xff] %v5966_v25  ;;  %v5967_v17 = vadd.f32 %v5951_v37, %v5923_v18  ;;  %v5952_v19 = vmul.f32 %v5928_v58, %v5926_v44  ;;  %v5929_v10 = vadd.f32 %v5887_v52, %v5606_v7  ;;  %v5291_v18 = vadd.f32 %v11665_v27, %v11664_v9  ;;  %v5792_v7 = vpop.f32.mrf.mxu0  ;;  %v11687_v51 = vld [vmem:[#allocation39_spill] sm:$0xff]  ;;  %v11688_v9 = vld [vmem:[#allocation28_spill] sm:$0xff] }
 0x459   : > { %v5891_v47 = vpop.f32.mrf.mxu1  ;;  %v5934_v22 = vadd.f32 %v5784_v20, %v5611_v11  ;;  %v5935_v52 = vadd.f32 %v5786_v61, %v5612_v50  ;;  %v11678_v20 = vld [vmem:[#allocation51_spill] sm:$0xff]  ;;  %v11684_v61 = vld [vmem:[#allocation52_spill] sm:$0xff]  ;;  %v5297_v16 = vadd.f32 %v11686_v42, %v11685_v8  ;;  %v5619_v11 = vadd.f32 %v11687_v51, %v5296_v43 }
 0x45a   : > { %5983 = vst [vmem:[%s11452_s27 + $0x28] sm:$0xff] %v5967_v17  ;;  %v5968_v13 = vadd.f32 %v5952_v19, %v5926_v44  ;;  %v5953_v6 = vmul.f32 %v5929_v10, %v5927_v56  ;;  %v5932_v23 = vadd.f32 %v5891_v47, %v5609_v57  ;;  %v11671_v44 = vld [vmem:[#allocation40_spill] sm:$0xff]  ;;  %v5614_v37 = vadd.f32 %v11672_v14, %v5291_v18  ;;  %v5796_v47 = vpop.f32.mrf.mxu0 }
 0x45b   : > { %v5893_v48 = vpop.f32.mrf.mxu1  ;;  %v5294_v39 = vadd.f32 %v11671_v44, %v11670_v34  ;;  %v11689_v27 = vld [vmem:[#allocation44_spill] sm:$0xff]  ;;  %v5942_v60 = vadd.f32 %v5796_v47, %v5619_v11 }
 0x45c   : > { %5984 = vst [vmem:[%s11452_s27 + $0x30] sm:$0xff] %v5968_v13  ;;  %v5969_v63 = vadd.f32 %v5953_v6, %v5927_v56  ;;  %v5954_v55 = vmul.f32 %v5932_v23, %v5930_v35  ;;  %v5933_v2 = vadd.f32 %v5893_v48, %v5610_v26  ;;  %v5295_v56 = vadd.f32 %v11677_v21, %v11676_v1  ;;  %v5798_v40 = vpop.f32.mrf.mxu0 }
 0x45d   : > { %v5897_v25 = vpop.f32.mrf.mxu1  ;;  %v5617_v57 = vadd.f32 %v11678_v20, %v5294_v39  ;;  %v5299_v18 = vadd.f32 %v11689_v27, %v11688_v9 }
 0x45e   : > { %5985 = vst [vmem:[%s11452_s27 + $0x38] sm:$0xff] %v5969_v63  ;;  %v5970_v58 = vadd.f32 %v5954_v55, %v5930_v35  ;;  %v5955_v29 = vmul.f32 %v5933_v2, %v5931_v31  ;;  %v5936_v3 = vadd.f32 %v5897_v25, %v5613_v4  ;;  %v5938_v35 = vadd.f32 %v5790_v0, %v5615_v32  ;;  %v11690_v0 = vld [vmem:[#allocation54_spill] sm:$0xff] }
 0x45f   : > { %v5899_v59 = vpop.f32.mrf.mxu1  ;;  %v5618_v26 = vadd.f32 %v11684_v61, %v5295_v56  ;;  %v5621_v33 = vadd.f32 %v11690_v0, %v5298_v53  ;;  %v11691_v2 = vld [vmem:[#allocation42_spill] sm:$0xff]  ;;  %v5622_v50 = vadd.f32 %v11423_v15, %v5299_v18 }
 0x460   : > { %5986 = vst [vmem:[%s11452_s27 + $0x40] sm:$0xff] %v5970_v58  ;;  %v5971_v17 = vadd.f32 %v5955_v29, %v5931_v31  ;;  %v5956_v19 = vmul.f32 %v5936_v3, %v5934_v22  ;;  %v5937_v10 = vadd.f32 %v5899_v59, %v5614_v37  ;;  %v5939_v31 = vadd.f32 %v5792_v7, %v5616_v49 }
 0x461   : > { %v5903_v30 = vpop.f32.mrf.mxu1  ;;  %v5620_v24 = vadd.f32 %v11691_v2, %v5297_v16 }
 0x462   : > { %5987 = vst [vmem:[%s11452_s27 + $0x48] sm:$0xff] %v5971_v17  ;;  %v5972_v13 = vadd.f32 %v5956_v19, %v5934_v22  ;;  %v5957_v6 = vmul.f32 %v5937_v10, %v5935_v52  ;;  %v5940_v23 = vadd.f32 %v5903_v30, %v5617_v57 }
 0x463   : > { %v5905_v48 = vpop.f32.mrf.mxu1  ;;  %v5943_v7 = vadd.f32 %v5798_v40, %v5620_v24 }
 0x464   : > { %5988 = vst [vmem:[%s11452_s27 + $0x50] sm:$0xff] %v5972_v13  ;;  %v5973_v4 = vadd.f32 %v5957_v6, %v5935_v52  ;;  %v5958_v63 = vmul.f32 %v5940_v23, %v5938_v35  ;;  %v5941_v55 = vadd.f32 %v5905_v48, %v5618_v26 }
 0x465   : > { %v5909_v5 = vpop.f32.mrf.mxu1 }
 0x466   : > { %5989 = vst [vmem:[%s11452_s27 + $0x58] sm:$0xff] %v5973_v4  ;;  %v5974_v34 = vadd.f32 %v5958_v63, %v5938_v35  ;;  %v5959_v44 = vmul.f32 %v5941_v55, %v5939_v31  ;;  %v5944_v39 = vadd.f32 %v5909_v5, %v5621_v33 }
 0x467   : > { %v5911_v22 = vpop.f32.mrf.mxu1 }
 0x468   : > { %5990 = vst [vmem:[%s11452_s27 + $0x60] sm:$0xff] %v5974_v34  ;;  %v5975_v25 = vadd.f32 %v5959_v44, %v5939_v31  ;;  %v5960_v14 = vmul.f32 %v5944_v39, %v5942_v60  ;;  %v5945_v37 = vadd.f32 %v5911_v22, %v5622_v50 }
 0x46a   : > { %5991 = vst [vmem:[%s11452_s27 + $0x68] sm:$0xff] %v5975_v25  ;;  %v5976_v58 = vadd.f32 %v5960_v14, %v5942_v60  ;;  %v5961_v29 = vmul.f32 %v5945_v37, %v5943_v7 }
 0x46c   : > { %5992 = vst [vmem:[%s11452_s27 + $0x70] sm:$0xff] %v5976_v58  ;;  %v5977_v15 = vadd.f32 %v5961_v29, %v5943_v7 }
 0x46e   : > { %5993 = vst [vmem:[%s11452_s27 + $0x78] sm:$0xff] %v5977_v15 }
 0x46f   : > { %7006 = shalt.err (!%p7003_p3)
}
 0x470   : > { %s7007_s9 = scalar_lea.hbm %s11540_s5, 2048  ;;  %s7011_s19 = scalar_lea.hbm %s11591_s3, 4096 }
 0x471   : > { %p7008_p4 = scmp.ne.s32.totalorder %s11540_s5, %s7007_s9  ;;  %p7012_p9 = scmp.lt.s32.totalorder %s11540_s5, %s11591_s3 }
 0x472   : > { %p7013_p10 = scmp.lt.s32.totalorder %s7011_s19, %s7007_s9 }
 0x473   : > { %p7009_p7 = pnand %p7008_p4, %p7118_p5 }
 0x474   : > { %p7014_p11 = por %p7013_p10, %p7012_p9 }
 0x475   : > { %p7010_p8 = pneg %p7009_p7 }
 0x477   : > { %p7015_p12 = pnand %p7014_p11, %p7010_p8 }
 0x479   : > { %7018 = shalt.err (!%p7015_p12)
}
 0x47a   : > { %s7058_s25 = smov 256   ;;  %s7059_s26 = smov 16  }
 0x47b   : > { %6950 = dma.vmem_to_hbm [thread:$0]  (%p7118_p5), %s11542_s29, 2048, %s11540_s5, %s11548_s17, %s7058_s25, %s7058_s25, %s7059_s26  }
 0x47c PF: > { %p6956_p13 = scmp.ge.s32.totalorder %s7053_s15, 2  ;;  %s6023_s27 = sand.u32 1, %s7041_s12  }
 0x47d   : > { %s6024_s28 = scalar_lea.sflag [#allocation4], %s6023_s27 }
 0x47e   : > { %p6953_p0 = pnand %p6956_p13, %p7122_p6 }
 0x480   : > { %p6954_p1 = pneg %p6953_p0 }
 0x482   : > { %7036 = dma.done.wait (%p6954_p1), %s6024_s28, 2048  }
 0x483   : > { %7038 = vsyncadd (%p6954_p1), %s6024_s28, 4294965248  ;;  %p13_p2 = scmp.ge.s32.totalorder %s7105_s18, 4   ;;  %s11692_s12 = smov %s7045_s13 }
 0x484   : > { %s11693_s13 = smov %s7049_s14  ;;  %s11694_s14 = smov %s7116_s21 }
 0x485   : > { %s11695_s15 = smov %s7105_s18  ;;  %15 = sbr.rel (!%p13_p2) target bundleno = 3 (0x3), region = 90 }
 0x48a   :  { %6029 = vsyncpa [#allocation4], 1 }
 0x48b   :  { %6031 = vsyncpa [#allocation4 + $0x1], 1 }

</bundles_post_ra>
